<compile_context>
chip_gen: v7x
topology: tpu7x:2x2x1
jax: 0.10.0
libtpu: 0.0.40
codegen_flags: <defaults>
</compile_context>

<pallas_src>
import functools
import math
import numpy as np

import jax
import jax.numpy as jnp
from jax import lax
from jax.experimental import pallas as pl
from jax.experimental.pallas import tpu as pltpu

LN_EPS = 1e-12          # torch module uses LayerNorm(..., eps=1e-12) explicitly
NEG_INF = -1e30         # finite sentinel; exp(NEG_INF - m) underflows to 0.0
MiB = 1 << 20


# --------------------------------------------------------------------------
# small helpers
# --------------------------------------------------------------------------
def _ln(x, w, b):
    """LayerNorm identical to torch.nn.LayerNorm(eps=1e-12)."""
    mu = jnp.mean(x, axis=-1, keepdims=True)
    var = jnp.mean((x - mu) ** 2, axis=-1, keepdims=True)
    return (x - mu) * lax.rsqrt(var + LN_EPS) * w + b


def _ceil_to(n, m):
    return ((n + m - 1) // m) * m


def _vmem_cap(nbytes):
    """Explicit scoped-VMEM limit with headroom, valid on all generations."""
    return int(min(max(2 * nbytes, 16 * MiB), 64 * MiB))


def _const_spec(shape, grid_rank):
    """BlockSpec for a grid-invariant operand; single-buffered when supported."""
    zeros = (0,) * len(shape)
    imap = {1: (lambda i: zeros),
            2: (lambda i, j: zeros),
            3: (lambda i, j, k: zeros)}[grid_rank]
    if hasattr(pl, "Buffered"):
        try:
            return pl.BlockSpec(shape, imap, pipeline_mode=pl.Buffered(1))
        except TypeError:          # older BlockSpec without pipeline_mode kwarg
            pass
    return pl.BlockSpec(shape, imap)


def _row_tile(n, target=512):
    """(row_tile, padded_rows): tile is the full extent or a multiple of 8."""
    if n <= target:
        return n, n
    for t in range(target, 7, -1):
        if t % 8 == 0 and n % t == 0:
            return t, n
    t = (target // 8) * 8
    return t, _ceil_to(n, t)


def _batch_tile(b, target=128):
    """LSTM batch tile: fill the MXU M dimension, pad batch if awkward."""
    if b <= target:
        return b, b
    for t in range(target, 7, -1):
        if t % 8 == 0 and b % t == 0:
            return t, b
    t = (target // 8) * 8
    return t, _ceil_to(b, t)


def _time_chunk(s, bb, e, budget=2 * MiB, max_tc=64):
    """Timesteps per LSTM grid step, sized so the streamed x block stays small."""
    cap = max(1, min(max_tc, budget // max(1, bb * e * 4)))
    best = 1
    for t in range(1, min(s, cap) + 1):
        if s % t == 0:
            best = t
    return best


def _attn_tile(s, target=256):
    """(tile, padded_seq) for the flash-attention Q/K tiling."""
    if s <= target:
        return s, s
    for t in range(target, 7, -1):
        if t % 8 == 0 and s % t == 0:
            return t, s
    t = (target // 8) * 8
    return t, _ceil_to(s, t)


# --------------------------------------------------------------------------
# Kernel 1: fused ln_start + i2h + LSTM recurrence (time-major blocks).
# Gate order matches torch.nn.LSTM: [i, f, g, o].
# --------------------------------------------------------------------------
def _lstm_kernel(x_ref, lnw_ref, lnb_ref, wih_ref, whh_ref, bias_ref,
                 y_ref, hN_ref, cN_ref, h_scr, c_scr, *, t_chunk, mxu_dtype):
    t = pl.program_id(1)
    H = hN_ref.shape[-1]

    @pl.when(t == 0)
    def _():
        h_scr[...] = jnp.zeros_like(h_scr)
        c_scr[...] = jnp.zeros_like(c_scr)

    lnw = lnw_ref[...]
    lnb = lnb_ref[...]
    wih = wih_ref[...].astype(mxu_dtype)      # (E, 4H)  VMEM-resident
    whh = whh_ref[...].astype(mxu_dtype)      # (H, 4H)  VMEM-resident
    bias = bias_ref[...]                      # (1, 4H)
    h = h_scr[...]
    c = c_scr[...]
    # Statically unrolled chunk -> LLO gets full visibility.
    for s in range(t_chunk):
        xs = _ln(x_ref[s], lnw, lnb)                               # (BB, E)
        pre = (jnp.dot(xs.astype(mxu_dtype), wih,
                       preferred_element_type=jnp.float32)
               + jnp.dot(h.astype(mxu_dtype), whh,
                         preferred_element_type=jnp.float32)
               + bias)
        i = jax.nn.sigmoid(pre[:, 0 * H:1 * H])
        f = jax.nn.sigmoid(pre[:, 1 * H:2 * H])
        g = jnp.tanh(pre[:, 2 * H:3 * H])
        o = jax.nn.sigmoid(pre[:, 3 * H:4 * H])
        c = f * c + i * g
        h = o * jnp.tanh(c)
        y_ref[s] = h                                               # dense tile
    h_scr[...] = h
    c_scr[...] = c

    @pl.when(t == pl.num_programs(1) - 1)
    def _():
        hN_ref[...] = h
        cN_ref[...] = c


def lstm_layer(x_sm, kp, mxu_dtype):
    """x_sm: (S, B, E) time-major.  Returns rnn_out (S,B,H), h_n (B,H), c_n (B,H)."""
    S, B, E = x_sm.shape
    H = E
    G = 4 * H
    BB, Bp = _batch_tile(B)
    if Bp != B:
        x_sm = jnp.pad(x_sm, ((0, 0), (0, Bp - B), (0, 0)))
    TC = _time_chunk(S, BB, E)
    kernel = functools.partial(_lstm_kernel, t_chunk=TC, mxu_dtype=mxu_dtype)
    blk_bytes = 4 * (2 * TC * BB * E + 2 * TC * BB * H + 4 * BB * H
                     + E * G + H * G + G + 2 * E)
    y, h_n, c_n = pl.pallas_call(
        kernel,
        out_shape=(
            jax.ShapeDtypeStruct((S, Bp, H), jnp.float32),
            jax.ShapeDtypeStruct((Bp, H), jnp.float32),
            jax.ShapeDtypeStruct((Bp, H), jnp.float32),
        ),
        grid_spec=pltpu.PrefetchScalarGridSpec(
            num_scalar_prefetch=0,
            grid=(Bp // BB, S // TC),
            in_specs=[
                pl.BlockSpec((TC, BB, E), lambda b, t: (t, b, 0)),
                _const_spec((1, E), 2), _const_spec((1, E), 2),
                _const_spec((E, G), 2), _const_spec((H, G), 2),
                _const_spec((1, G), 2),
            ],
            out_specs=[
                pl.BlockSpec((TC, BB, H), lambda b, t: (t, b, 0)),
                pl.BlockSpec((BB, H), lambda b, t: (b, 0)),
                pl.BlockSpec((BB, H), lambda b, t: (b, 0)),
            ],
            scratch_shapes=[pltpu.VMEM((BB, H), jnp.float32),
                            pltpu.VMEM((BB, H), jnp.float32)],
        ),
        compiler_params=pltpu.CompilerParams(
            dimension_semantics=("parallel", "arbitrary"),
            vmem_limit_bytes=_vmem_cap(blk_bytes)),
        cost_estimate=pl.CostEstimate(
            flops=2 * S * Bp * (E * G + H * G) + 24 * S * Bp * H,
            transcendentals=4 * S * Bp * H,
            bytes_accessed=4 * (S * Bp * E + S * Bp * H + E * G + H * G)),
    )(x_sm, kp["ln_start_w"], kp["ln_start_b"],
      kp["w_ih_t"], kp["w_hh_t"], kp["bias"])
    if Bp != B:
        y, h_n, c_n = y[:, :B], h_n[:B], c_n[:B]
    return y, h_n, c_n


# --------------------------------------------------------------------------
# Kernel 2: attention prep — q = qs * LN(W_q · ln_mid(rnn)),  mh = ln_mem(rnn).
# --------------------------------------------------------------------------
def _attn_prep_kernel(rnn_ref, lnmw, lnmb, lnmidw, lnmidb, wq_ref, bq_ref,
                      lnqw, lnqb, qs_ref, q_ref, mh_ref, *, mxu_dtype):
    rnn = rnn_ref[...]
    mh_ref[...] = _ln(rnn, lnmw[...], lnmb[...])
    hq = _ln(rnn, lnmidw[...], lnmidb[...])
    q_lin = jnp.dot(hq.astype(mxu_dtype), wq_ref[...],
                    preferred_element_type=jnp.float32) + bq_ref[...]
    q_ref[...] = qs_ref[...] * _ln(q_lin, lnqw[...], lnqb[...])


def attn_prep(rnn_bm, kp, mxu_dtype):
    """rnn_bm: (B, S, H) batch-major.  Returns q (B,S,H) and mh (B,S,H)."""
    B, S, H = rnn_bm.shape
    N = B * S
    R, Np = _row_tile(N)
    x2 = rnn_bm.reshape(N, H)
    if Np != N:
        x2 = jnp.pad(x2, ((0, Np - N), (0, 0)))
    blk_bytes = 4 * (6 * R * H + H * H + 10 * H)
    q, mh = pl.pallas_call(
        functools.partial(_attn_prep_kernel, mxu_dtype=mxu_dtype),
        out_shape=(jax.ShapeDtypeStruct((Np, H), jnp.float32),
                   jax.ShapeDtypeStruct((Np, H), jnp.float32)),
        grid_spec=pltpu.PrefetchScalarGridSpec(
            num_scalar_prefetch=0,
            grid=(Np // R,),
            in_specs=[
                pl.BlockSpec((R, H), lambda r: (r, 0)),
                _const_spec((1, H), 1), _const_spec((1, H), 1),
                _const_spec((1, H), 1), _const_spec((1, H), 1),
                _const_spec((H, H), 1), _const_spec((1, H), 1),
                _const_spec((1, H), 1), _const_spec((1, H), 1),
                _const_spec((1, H), 1),
            ],
            out_specs=[pl.BlockSpec((R, H), lambda r: (r, 0)),
                       pl.BlockSpec((R, H), lambda r: (r, 0))],
        ),
        compiler_params=pltpu.CompilerParams(
            dimension_semantics=("parallel",),
            vmem_limit_bytes=_vmem_cap(blk_bytes)),
        cost_estimate=pl.CostEstimate(
            flops=2 * Np * H * H + 30 * Np * H,
            transcendentals=0,
            bytes_accessed=4 * (3 * Np * H + H * H)),
    )(x2, kp["ln_mem_w"], kp["ln_mem_b"], kp["ln_mid_w"], kp["ln_mid_b"],
      kp["q_w_t"], kp["q_b"], kp["q_ln_w"], kp["q_ln_b"], kp["qs"])
    if Np != N:
        q, mh = q[:N], mh[:N]
    return q.reshape(B, S, H), mh.reshape(B, S, H)


# --------------------------------------------------------------------------
# Kernel 3: flash-style causal single-head attention (+ fused rnn residual).
# K/V are derived in-kernel from the streamed mh block (k = ks*mh, v = vs*mh).
# --------------------------------------------------------------------------
def _flash_attn_kernel(q_ref, mh_ref, rnn_ref, ks_ref, vs_ref, o_ref,
                       m_scr, l_scr, acc_scr, *, tq, tk, scale, mxu_dtype):
    qi = pl.program_id(1)
    ki = pl.program_id(2)

    @pl.when(ki == 0)
    def _():
        m_scr[...] = jnp.full(m_scr.shape, NEG_INF, dtype=m_scr.dtype)
        l_scr[...] = jnp.zeros_like(l_scr)
        acc_scr[...] = jnp.zeros_like(acc_scr)

    q_start = qi * tq
    k_start = ki * tk

    @pl.when(k_start <= q_start + tq - 1)          # skip fully-masked K blocks
    def _():
        q = q_ref[0]                                # (TQ, H)
        kv = mh_ref[0]                              # (TK, H)
        k = ks_ref[...] * kv
        v = vs_ref[...] * kv
        s = lax.dot_general(q.astype(mxu_dtype), k.astype(mxu_dtype),
                            (((1,), (1,)), ((), ())),
                            preferred_element_type=jnp.float32) * scale
        rows = q_start + lax.broadcasted_iota(jnp.int32, (tq, tk), 0)
        cols = k_start + lax.broadcasted_iota(jnp.int32, (tq, tk), 1)
        s = jnp.where(cols > rows, NEG_INF, s)      # in-kernel causal mask
        m_prev = m_scr[...]
        m_new = jnp.maximum(m_prev, jnp.max(s, axis=-1, keepdims=True))
        alpha = jnp.exp(m_prev - m_new)
        p = jnp.exp(s - m_new)
        l_scr[...] = alpha * l_scr[...] + jnp.sum(p, axis=-1, keepdims=True)
        acc_scr[...] = alpha * acc_scr[...] + jnp.dot(
            p.astype(mxu_dtype), v.astype(mxu_dtype),
            preferred_element_type=jnp.float32)
        m_scr[...] = m_new

    @pl.when(ki == pl.num_programs(2) - 1)
    def _():
        inv_l = pl.reciprocal(l_scr[...], approx=True)   # EUP slot, ~free
        o_ref[0] = acc_scr[...] * inv_l + rnn_ref[0]     # fused residual add


def flash_attention(q_bm, mh_bm, rnn_bm, kp, mxu_dtype):
    """Returns attention_output + rnn_output, batch-major (B, S, H)."""
    B, S, H = q_bm.shape
    TQ, Sp = _attn_tile(S)
    TK = TQ
    if Sp != S:
        pad = ((0, 0), (0, Sp - S), (0, 0))
        q_bm = jnp.pad(q_bm, pad)
        mh_bm = jnp.pad(mh_bm, pad)
        rnn_bm = jnp.pad(rnn_bm, pad)
    scale = 1.0 / math.sqrt(H)
    kernel = functools.partial(_flash_attn_kernel, tq=TQ, tk=TK, scale=scale,
                               mxu_dtype=mxu_dtype)
    blk_bytes = 4 * (2 * TQ * H + 2 * TK * H + 2 * TQ * H + 2 * TQ * H
                     + TQ * TK + 2 * TQ + 4 * H)
    out = pl.pallas_call(
        kernel,
        out_shape=jax.ShapeDtypeStruct((B, Sp, H), jnp.float32),
        grid_spec=pltpu.PrefetchScalarGridSpec(
            num_scalar_prefetch=0,
            grid=(B, Sp // TQ, Sp // TK),
            in_specs=[
                pl.BlockSpec((1, TQ, H), lambda b, qi, ki: (b, qi, 0)),
                pl.BlockSpec((1, TK, H), lambda b, qi, ki: (b, ki, 0)),
                pl.BlockSpec((1, TQ, H), lambda b, qi, ki: (b, qi, 0)),
                _const_spec((1, H), 3), _const_spec((1, H), 3),
            ],
            out_specs=pl.BlockSpec((1, TQ, H), lambda b, qi, ki: (b, qi, 0)),
            scratch_shapes=[pltpu.VMEM((TQ, 1), jnp.float32),
                            pltpu.VMEM((TQ, 1), jnp.float32),
                            pltpu.VMEM((TQ, H), jnp.float32)],
        ),
        compiler_params=pltpu.CompilerParams(
            dimension_semantics=("parallel", "parallel", "arbitrary"),
            vmem_limit_bytes=_vmem_cap(blk_bytes)),
        cost_estimate=pl.CostEstimate(
            flops=B * (4 * Sp * Sp * H + 12 * Sp * Sp),
            transcendentals=B * Sp * Sp,
            bytes_accessed=4 * 4 * B * Sp * H),
    )(q_bm, mh_bm, rnn_bm, kp["ks"], kp["vs"])
    if Sp != S:
        out = out[:, :S]
    return out


# --------------------------------------------------------------------------
# Kernel 4: lnff / lnxff + Boom(shortcut=True, d_ff == d_model) + residual.
# The "_mem" variant also emits ln_mem(x) (new_mem for non-attention layers).
# --------------------------------------------------------------------------
def _boom_ffn(x, lnffw, lnffb, lnxw, lnxb, w1, b1, mxu_dtype):
    o1 = _ln(x, lnffw, lnffb)                          # lnff(output)
    bi = _ln(x, lnxw, lnxb)                            # lnxff(output)
    z = jnp.dot(bi.astype(mxu_dtype), w1,
                preferred_element_type=jnp.float32) + b1
    return z * jax.nn.sigmoid(1.702 * z) + o1          # GELU(x)=x*sigmoid(1.702x)


def _ffn_kernel(x_ref, lnffw, lnffb, lnxw, lnxb, w1_ref, b1_ref, o_ref, *,
                mxu_dtype):
    o_ref[...] = _boom_ffn(x_ref[...], lnffw[...], lnffb[...], lnxw[...],
                           lnxb[...], w1_ref[...], b1_ref[...], mxu_dtype)


def _ffn_mem_kernel(x_ref, lnffw, lnffb, lnxw, lnxb, lnmw, lnmb,
                    w1_ref, b1_ref, o_ref, mh_ref, *, mxu_dtype):
    x = x_ref[...]
    mh_ref[...] = _ln(x, lnmw[...], lnmb[...])
    o_ref[...] = _boom_ffn(x, lnffw[...], lnffb[...], lnxw[...], lnxb[...],
                           w1_ref[...], b1_ref[...], mxu_dtype)


def ffn_post(x, kp, with_mem, mxu_dtype):
    """x: (..., E).  Fused lnff/lnxff + Boom + residual (+ ln_mem if with_mem)."""
    shape = x.shape
    E = shape[-1]
    N = int(np.prod(shape[:-1]))
    R, Np = _row_tile(N)
    x2 = x.reshape(N, E)
    if Np != N:
        x2 = jnp.pad(x2, ((0, Np - N), (0, 0)))

    in_specs = [pl.BlockSpec((R, E), lambda r: (r, 0)),
                _const_spec((1, E), 1), _const_spec((1, E), 1),
                _const_spec((1, E), 1), _const_spec((1, E), 1)]
    args = [x2, kp["ln_ff_w"], kp["ln_ff_b"], kp["ln_xff_w"], kp["ln_xff_b"]]
    if with_mem:
        kernel = functools.partial(_ffn_mem_kernel, mxu_dtype=mxu_dtype)
        in_specs += [_const_spec((1, E), 1), _const_spec((1, E), 1),
                     _const_spec((E, E), 1), _const_spec((1, E), 1)]
        args += [kp["ln_mem_w"], kp["ln_mem_b"], kp["boom_w1_t"], kp["boom_b1"]]
        out_shape = (jax.ShapeDtypeStruct((Np, E), jnp.float32),
                     jax.ShapeDtypeStruct((Np, E), jnp.float32))
        out_specs = [pl.BlockSpec((R, E), lambda r: (r, 0)),
                     pl.BlockSpec((R, E), lambda r: (r, 0))]
    else:
        kernel = functools.partial(_ffn_kernel, mxu_dtype=mxu_dtype)
        in_specs += [_const_spec((E, E), 1), _const_spec((1, E), 1)]
        args += [kp["boom_w1_t"], kp["boom_b1"]]
        out_shape = jax.ShapeDtypeStruct((Np, E), jnp.float32)
        out_specs = pl.BlockSpec((R, E), lambda r: (r, 0))

    blk_bytes = 4 * (2 * R * E * (3 if with_mem else 2) + E * E + 12 * E)
    res = pl.pallas_call(
        kernel,
        out_shape=out_shape,
        grid_spec=pltpu.PrefetchScalarGridSpec(
            num_scalar_prefetch=0,
            grid=(Np // R,),
            in_specs=in_specs,
            out_specs=out_specs),
        compiler_params=pltpu.CompilerParams(
            dimension_semantics=("parallel",),
            vmem_limit_bytes=_vmem_cap(blk_bytes)),
        cost_estimate=pl.CostEstimate(
            flops=2 * Np * E * E + 40 * Np * E,
            transcendentals=Np * E,
            bytes_accessed=4 * (Np * E * (3 if with_mem else 2) + E * E)),
    )(*args)
    if with_mem:
        out, mh = res
        if Np != N:
            out, mh = out[:N], mh[:N]
        return out.reshape(shape), mh.reshape(shape)
    out = res
    if Np != N:
        out = out[:N]
    return out.reshape(shape)


# --------------------------------------------------------------------------
# SHARNN layer / model wrappers (glue in plain JAX, time-major activations)
# --------------------------------------------------------------------------
def sharnn_layer_forward(x_sm, kp, use_attn, mxu_dtype):
    rnn_sm, h_n, c_n = lstm_layer(x_sm, kp, mxu_dtype)
    # rnn_output.view(..., hidden//ninp, ninp).sum(-2) is identity (hidden==ninp)
    if use_attn:
        rnn_bm = jnp.transpose(rnn_sm, (1, 0, 2))               # (B, S, H)
        q_bm, mh_bm = attn_prep(rnn_bm, kp, mxu_dtype)
        attn_bm = flash_attention(q_bm, mh_bm, rnn_bm, kp, mxu_dtype)
        out_bm = ffn_post(attn_bm, kp, with_mem=False, mxu_dtype=mxu_dtype)
        out_sm = jnp.transpose(out_bm, (1, 0, 2))
        mh_sm = jnp.transpose(mh_bm, (1, 0, 2))
    else:
        out_sm, mh_sm = ffn_post(rnn_sm, kp, with_mem=True, mxu_dtype=mxu_dtype)
    return out_sm, mh_sm, (h_n, c_n)


def sharnn_model_forward(kparams, inputs, input_ids, *, num_max_positions,
                         mxu_dtype=jnp.float32):
    """Fresh forward (mem=None, hidden=None, id_memory=None); dropout=identity."""
    num_layers = len(kparams)
    x_sm = inputs                                       # (S, B, E) time-major
    new_hiddens, new_mems, new_id_mems = [], [], []
    for l, kp in enumerate(kparams):
        use_attn = (l == num_layers - 2)
        x_sm, mh_sm, (h_n, c_n) = sharnn_layer_forward(x_sm, kp, use_attn,
                                                       mxu_dtype)
        new_hiddens.append((h_n[None], c_n[None]))      # (1, B, H) like nn.LSTM
        new_mems.append(mh_sm[-num_max_positions:])
        new_id_mems.append(input_ids[-num_max_positions:] if use_attn else None)
    return x_sm, new_hiddens, new_mems, new_id_mems


# --------------------------------------------------------------------------
# Parameter construction and one-time kernel-layout preparation
# --------------------------------------------------------------------------
def init_params(key, num_layers, E):
    params = []
    for l in range(num_layers):
        k = jax.random.fold_in(key, l)
        sub = jax.random.split(k, 26)
        std = 1.0 / math.sqrt(E)

        def uni(kk, shape, s=std):
            return jax.random.uniform(kk, shape, jnp.float32, -s, s)

        def nrm(kk, shape, s=1.0):
            return s * jax.random.normal(kk, shape, jnp.float32)

        p = dict(
            ln_start_w=1.0 + 0.1 * nrm(sub[0], (E,)), ln_start_b=0.02 * nrm(sub[1], (E,)),
            ln_mem_w=1.0 + 0.1 * nrm(sub[2], (E,)), ln_mem_b=0.02 * nrm(sub[3], (E,)),
            ln_mid_w=1.0 + 0.1 * nrm(sub[4], (E,)), ln_mid_b=0.02 * nrm(sub[5], (E,)),
            ln_ff_w=1.0 + 0.1 * nrm(sub[6], (E,)), ln_ff_b=0.02 * nrm(sub[7], (E,)),
            ln_xff_w=1.0 + 0.1 * nrm(sub[8], (E,)), ln_xff_b=0.02 * nrm(sub[9], (E,)),
            # nn.LSTM(embed, embed): weight_ih (4E,E), weight_hh (4E,E), biases (4E,)
            w_ih=uni(sub[10], (4 * E, E)), w_hh=uni(sub[11], (4 * E, E)),
            b_ih=uni(sub[12], (4 * E,)), b_hh=uni(sub[13], (4 * E,)),
            # Boom(embed, embed, shortcut=True): only linear1 (E,E)
            boom_w1=uni(sub[14], (E, E)), boom_b1=uni(sub[15], (E,)),
            # SingleHeadAttention params ((1,1,E) in torch; stored flat)
            qs=0.1 * nrm(sub[16], (E,)), ks=0.1 * nrm(sub[17], (E,)),
            vs=0.1 * nrm(sub[18], (E,)),
            q_w=uni(sub[19], (E, E)), q_b=uni(sub[20], (E,)),
            q_ln_w=1.0 + 0.1 * nrm(sub[21], (E,)), q_ln_b=0.02 * nrm(sub[22], (E,)),
            op_w=uni(sub[23], (2 * E, E)), op_b=uni(sub[24], (2 * E,)),
        )
        params.append(p)
    return params


def prepare_params(params, mxu_dtype=jnp.float32):
    """One-time prep: pre-transpose matmul weights (stored in the MXU dtype),
    merge LSTM biases, apply the parameter-only sigmoid/Overparam transforms."""
    kparams = []
    for p in params:
        E = p["ln_start_w"].shape[0]
        vs_raw = jax.nn.sigmoid(p["vs"])
        cf = vs_raw @ p["op_w"].T + p["op_b"]
        vs = jax.nn.sigmoid(cf[E:]) * jnp.tanh(cf[:E])

        def row(v):
            return v.reshape(1, -1)

        kparams.append(dict(
            ln_start_w=row(p["ln_start_w"]), ln_start_b=row(p["ln_start_b"]),
            ln_mem_w=row(p["ln_mem_w"]), ln_mem_b=row(p["ln_mem_b"]),
            ln_mid_w=row(p["ln_mid_w"]), ln_mid_b=row(p["ln_mid_b"]),
            ln_ff_w=row(p["ln_ff_w"]), ln_ff_b=row(p["ln_ff_b"]),
            ln_xff_w=row(p["ln_xff_w"]), ln_xff_b=row(p["ln_xff_b"]),
            w_ih_t=jnp.transpose(p["w_ih"]).astype(mxu_dtype),
            w_hh_t=jnp.transpose(p["w_hh"]).astype(mxu_dtype),
            bias=row(p["b_ih"] + p["b_hh"]),
            boom_w1_t=jnp.transpose(p["boom_w1"]).astype(mxu_dtype),
            boom_b1=row(p["boom_b1"]),
            q_w_t=jnp.transpose(p["q_w"]).astype(mxu_dtype),
            q_b=row(p["q_b"]),
            q_ln_w=row(p["q_ln_w"]), q_ln_b=row(p["q_ln_b"]),
            qs=row(jax.nn.sigmoid(p["qs"])),
            ks=row(jax.nn.sigmoid(p["ks"])),
            vs=row(vs),
        ))
    return kparams


# --------------------------------------------------------------------------
# Pure-JAX reference (eval semantics) for validation
# --------------------------------------------------------------------------
def _ref_lstm(x, w_ih, w_hh, b_ih, b_hh):
    S, B, E = x.shape
    H = w_hh.shape[1]

    def step(carry, xt):
        h, c = carry
        pre = xt @ w_ih.T + h @ w_hh.T + b_ih + b_hh
        i = jax.nn.sigmoid(pre[:, :H])
        f = jax.nn.sigmoid(pre[:, H:2 * H])
        g = jnp.tanh(pre[:, 2 * H:3 * H])
        o = jax.nn.sigmoid(pre[:, 3 * H:4 * H])
        c = f * c + i * g
        h = o * jnp.tanh(c)
        return (h, c), h

    (h, c), ys = jax.lax.scan(step, (jnp.zeros((B, H)), jnp.zeros((B, H))), x)
    return ys, h[None], c[None]


def ref_forward(params, inputs):
    S, B, E = inputs.shape
    mask = jnp.triu(jnp.full((S, S), -jnp.inf, jnp.float32), k=1)
    out = inputs
    num_layers = len(params)
    for l, p in enumerate(params):
        use_attn = (l == num_layers - 2)
        x_ln = _ln(out, p["ln_start_w"], p["ln_start_b"])
        rnn_out, _, _ = _ref_lstm(x_ln, p["w_ih"], p["w_hh"], p["b_ih"], p["b_hh"])
        mh = _ln(rnn_out, p["ln_mem_w"], p["ln_mem_b"])
        if use_attn:
            h = _ln(rnn_out, p["ln_mid_w"], p["ln_mid_b"])
            qs = jax.nn.sigmoid(p["qs"])
            ks_ = jax.nn.sigmoid(p["ks"])
            vs_raw = jax.nn.sigmoid(p["vs"])
            cf = vs_raw @ p["op_w"].T + p["op_b"]
            vs = jax.nn.sigmoid(cf[E:]) * jnp.tanh(cf[:E])
            q = qs * _ln(h @ p["q_w"].T + p["q_b"], p["q_ln_w"], p["q_ln_b"])
            k = ks_ * mh
            v = vs * mh
            qb, kb, vb = (jnp.transpose(t, (1, 0, 2)) for t in (q, k, v))
            scores = jnp.einsum("bqd,bkd->bqk", qb, kb) / math.sqrt(E) + mask[None]
            w = jax.nn.softmax(scores, axis=-1)
            mix = jnp.einsum("bqk,bkd->bqd", w, vb)
            output = jnp.transpose(mix, (1, 0, 2)) + rnn_out
        else:
            output = rnn_out
        o1 = _ln(output, p["ln_ff_w"], p["ln_ff_b"])
        bi = _ln(output, p["ln_xff_w"], p["ln_xff_b"])
        z = bi @ p["boom_w1"].T + p["boom_b1"]
        out = z * jax.nn.sigmoid(1.702 * z) + o1
    return out


if __name__ == "__main__":
    S, B, E = 8, 2, 32          # seq_len, batch, embed (= config.input_size)
    num_layers = 2              # layer 0 gets attention (l == num_layers - 2)
    num_max_positions = 2000
    key = jax.random.PRNGKey(0)
    k_in, k_ids, k_par = jax.random.split(key, 3)

    inputs = jax.random.normal(k_in, (S, B, E), jnp.float32)
    # token ids (no reset_token_id present -> no hidden-state / mask resets)
    input_ids = jax.random.randint(k_ids, (S, B), 0, 100, dtype=jnp.int32)
    params = init_params(k_par, num_layers, E)

    fwd = jax.jit(sharnn_model_forward,
                  static_argnames=("num_max_positions", "mxu_dtype"))

    # f32 MXU path: tight check against the pure-JAX reference.
    kparams32 = prepare_params(params, jnp.float32)
    out, new_hiddens, new_mems, new_id_mems = fwd(
        kparams32, inputs, input_ids,
        num_max_positions=num_max_positions, mxu_dtype=jnp.float32)
    out = jax.block_until_ready(out)
    assert out.shape == (S, B, E)
    assert new_hiddens[0][0].shape == (1, B, E)
    ref = jax.block_until_ready(ref_forward(params, inputs))
    np.testing.assert_allclose(np.asarray(out), np.asarray(ref),
                               rtol=1e-2, atol=1e-2)

    # bf16 MXU path (recommended on v6e/v7x): compile/run smoke test.
    kparams16 = prepare_params(params, jnp.bfloat16)
    out16, _, _, _ = fwd(kparams16, inputs, input_ids,
                         num_max_positions=num_max_positions,
                         mxu_dtype=jnp.bfloat16)
    out16 = jax.block_until_ready(out16)
    assert bool(jnp.all(jnp.isfinite(out16)))

    print("KERNEL_OK")
</pallas_src>

<mosaic_0001>
module attributes {stable_mosaic.version = 11 : i64} {
  func.func @_attn_prep_kernel(%arg0: i32, %arg1: memref<16x32xf32, #tpu.memory_space<vmem>>, %arg2: memref<1x32xf32, #tpu.memory_space<vmem>>, %arg3: memref<1x32xf32, #tpu.memory_space<vmem>>, %arg4: memref<1x32xf32, #tpu.memory_space<vmem>>, %arg5: memref<1x32xf32, #tpu.memory_space<vmem>>, %arg6: memref<32x32xf32, #tpu.memory_space<vmem>>, %arg7: memref<1x32xf32, #tpu.memory_space<vmem>>, %arg8: memref<1x32xf32, #tpu.memory_space<vmem>>, %arg9: memref<1x32xf32, #tpu.memory_space<vmem>>, %arg10: memref<1x32xf32, #tpu.memory_space<vmem>>, %arg11: memref<16x32xf32, #tpu.memory_space<vmem>>, %arg12: memref<16x32xf32, #tpu.memory_space<vmem>>) attributes {dimension_semantics = [#tpu.dimension_semantics<parallel>], iteration_bounds = array<i64: 1>, scalar_prefetch = 0 : i64, scratch_operands = 0 : i64, tpu.core_type = #tpu.core_type<tc>, window_params = [{transform_indices = @transform_0, window_bounds = array<i64: 16, 32>}, {pipeline_mode = #tpu.pipeline_mode<synchronous>, transform_indices = @transform_1, window_bounds = array<i64: 1, 32>}, {pipeline_mode = #tpu.pipeline_mode<synchronous>, transform_indices = @transform_2, window_bounds = array<i64: 1, 32>}, {pipeline_mode = #tpu.pipeline_mode<synchronous>, transform_indices = @transform_3, window_bounds = array<i64: 1, 32>}, {pipeline_mode = #tpu.pipeline_mode<synchronous>, transform_indices = @transform_4, window_bounds = array<i64: 1, 32>}, {pipeline_mode = #tpu.pipeline_mode<synchronous>, transform_indices = @transform_5, window_bounds = array<i64: 32, 32>}, {pipeline_mode = #tpu.pipeline_mode<synchronous>, transform_indices = @transform_6, window_bounds = array<i64: 1, 32>}, {pipeline_mode = #tpu.pipeline_mode<synchronous>, transform_indices = @transform_7, window_bounds = array<i64: 1, 32>}, {pipeline_mode = #tpu.pipeline_mode<synchronous>, transform_indices = @transform_8, window_bounds = array<i64: 1, 32>}, {pipeline_mode = #tpu.pipeline_mode<synchronous>, transform_indices = @transform_9, window_bounds = array<i64: 1, 32>}, {transform_indices = @transform_10, window_bounds = array<i64: 16, 32>}, {transform_indices = @transform_11, window_bounds = array<i64: 16, 32>}]} {
    %c0 = arith.constant 0 : index
    %c0_0 = arith.constant 0 : index
    %0 = vector.load %arg1[%c0, %c0_0] : memref<16x32xf32, #tpu.memory_space<vmem>>, vector<16x32xf32>
    %c0_1 = arith.constant 0 : index
    %c0_2 = arith.constant 0 : index
    %1 = vector.load %arg2[%c0_1, %c0_2] : memref<1x32xf32, #tpu.memory_space<vmem>>, vector<1x32xf32>
    %c0_3 = arith.constant 0 : index
    %c0_4 = arith.constant 0 : index
    %2 = vector.load %arg3[%c0_3, %c0_4] : memref<1x32xf32, #tpu.memory_space<vmem>>, vector<1x32xf32>
    %cst = arith.constant dense<0.000000e+00> : vector<16xf32>
    %3 = vector.multi_reduction <add>, %0, %cst [1] : vector<16x32xf32> to vector<16xf32>
    %4 = vector.shape_cast %3 : vector<16xf32> to vector<16x1xf32>
    %cst_5 = arith.constant 3.200000e+01 : f32
    %5 = vector.broadcast %cst_5 : f32 to vector<16x1xf32>
    %6 = arith.divf %4, %5 : vector<16x1xf32>
    %7 = vector.broadcast %6 : vector<16x1xf32> to vector<16x32xf32>
    %8 = arith.subf %0, %7 : vector<16x32xf32>
    %9 = arith.mulf %8, %8 : vector<16x32xf32>
    %cst_6 = arith.constant dense<0.000000e+00> : vector<16xf32>
    %10 = vector.multi_reduction <add>, %9, %cst_6 [1] : vector<16x32xf32> to vector<16xf32>
    %11 = vector.shape_cast %10 : vector<16xf32> to vector<16x1xf32>
    %cst_7 = arith.constant 3.200000e+01 : f32
    %12 = vector.broadcast %cst_7 : f32 to vector<16x1xf32>
    %13 = arith.divf %11, %12 : vector<16x1xf32>
    %14 = vector.broadcast %6 : vector<16x1xf32> to vector<16x32xf32>
    %15 = arith.subf %0, %14 : vector<16x32xf32>
    %cst_8 = arith.constant 9.99999996E-13 : f32
    %16 = vector.broadcast %cst_8 : f32 to vector<16x1xf32>
    %17 = arith.addf %13, %16 : vector<16x1xf32>
    %18 = math.rsqrt %17 : vector<16x1xf32>
    %19 = vector.broadcast %18 : vector<16x1xf32> to vector<16x32xf32>
    %20 = arith.mulf %15, %19 : vector<16x32xf32>
    %21 = vector.broadcast %1 : vector<1x32xf32> to vector<16x32xf32>
    %22 = arith.mulf %20, %21 : vector<16x32xf32>
    %23 = vector.broadcast %2 : vector<1x32xf32> to vector<16x32xf32>
    %24 = arith.addf %22, %23 : vector<16x32xf32>
    %c0_9 = arith.constant 0 : index
    %c0_10 = arith.constant 0 : index
    %25 = vector.load %arg12[%c0_9, %c0_10] : memref<16x32xf32, #tpu.memory_space<vmem>>, vector<16x32xf32>
    tpu.vector_store %arg12[%c0_9, %c0_10], %24 {strides = array<i32>} : memref<16x32xf32, #tpu.memory_space<vmem>>, vector<16x32xf32>,
    %c0_11 = arith.constant 0 : index
    %c0_12 = arith.constant 0 : index
    %26 = vector.load %arg4[%c0_11, %c0_12] : memref<1x32xf32, #tpu.memory_space<vmem>>, vector<1x32xf32>
    %c0_13 = arith.constant 0 : index
    %c0_14 = arith.constant 0 : index
    %27 = vector.load %arg5[%c0_13, %c0_14] : memref<1x32xf32, #tpu.memory_space<vmem>>, vector<1x32xf32>
    %cst_15 = arith.constant dense<0.000000e+00> : vector<16xf32>
    %28 = vector.multi_reduction <add>, %0, %cst_15 [1] : vector<16x32xf32> to vector<16xf32>
    %29 = vector.shape_cast %28 : vector<16xf32> to vector<16x1xf32>
    %cst_16 = arith.constant 3.200000e+01 : f32
    %30 = vector.broadcast %cst_16 : f32 to vector<16x1xf32>
    %31 = arith.divf %29, %30 : vector<16x1xf32>
    %32 = vector.broadcast %31 : vector<16x1xf32> to vector<16x32xf32>
    %33 = arith.subf %0, %32 : vector<16x32xf32>
    %34 = arith.mulf %33, %33 : vector<16x32xf32>
    %cst_17 = arith.constant dense<0.000000e+00> : vector<16xf32>
    %35 = vector.multi_reduction <add>, %34, %cst_17 [1] : vector<16x32xf32> to vector<16xf32>
    %36 = vector.shape_cast %35 : vector<16xf32> to vector<16x1xf32>
    %cst_18 = arith.constant 3.200000e+01 : f32
    %37 = vector.broadcast %cst_18 : f32 to vector<16x1xf32>
    %38 = arith.divf %36, %37 : vector<16x1xf32>
    %39 = vector.broadcast %31 : vector<16x1xf32> to vector<16x32xf32>
    %40 = arith.subf %0, %39 : vector<16x32xf32>
    %cst_19 = arith.constant 9.99999996E-13 : f32
    %41 = vector.broadcast %cst_19 : f32 to vector<16x1xf32>
    %42 = arith.addf %38, %41 : vector<16x1xf32>
    %43 = math.rsqrt %42 : vector<16x1xf32>
    %44 = vector.broadcast %43 : vector<16x1xf32> to vector<16x32xf32>
    %45 = arith.mulf %40, %44 : vector<16x32xf32>
    %46 = vector.broadcast %26 : vector<1x32xf32> to vector<16x32xf32>
    %47 = arith.mulf %45, %46 : vector<16x32xf32>
    %48 = vector.broadcast %27 : vector<1x32xf32> to vector<16x32xf32>
    %49 = arith.addf %47, %48 : vector<16x32xf32>
    %c0_20 = arith.constant 0 : index
    %c0_21 = arith.constant 0 : index
    %50 = vector.load %arg6[%c0_20, %c0_21] : memref<32x32xf32, #tpu.memory_space<vmem>>, vector<32x32xf32>
    %cst_22 = arith.constant dense<0.000000e+00> : vector<16x32xf32>
    %51 = tpu.matmul %49, %50, %cst_22 {dimension_numbers = #tpu.dot_dimension_numbers<[1], [0], [0], [1], [0, 0, 1, 1], [], []>} : vector<16x32xf32>, vector<32x32xf32>, vector<16x32xf32> -> vector<16x32xf32>
    %c0_23 = arith.constant 0 : index
    %c0_24 = arith.constant 0 : index
    %52 = vector.load %arg7[%c0_23, %c0_24] : memref<1x32xf32, #tpu.memory_space<vmem>>, vector<1x32xf32>
    %53 = vector.broadcast %52 : vector<1x32xf32> to vector<16x32xf32>
    %54 = arith.addf %51, %53 : vector<16x32xf32>
    %c0_25 = arith.constant 0 : index
    %c0_26 = arith.constant 0 : index
    %55 = vector.load %arg10[%c0_25, %c0_26] : memref<1x32xf32, #tpu.memory_space<vmem>>, vector<1x32xf32>
    %c0_27 = arith.constant 0 : index
    %c0_28 = arith.constant 0 : index
    %56 = vector.load %arg8[%c0_27, %c0_28] : memref<1x32xf32, #tpu.memory_space<vmem>>, vector<1x32xf32>
    %c0_29 = arith.constant 0 : index
    %c0_30 = arith.constant 0 : index
    %57 = vector.load %arg9[%c0_29, %c0_30] : memref<1x32xf32, #tpu.memory_space<vmem>>, vector<1x32xf32>
    %cst_31 = arith.constant dense<0.000000e+00> : vector<16xf32>
    %58 = vector.multi_reduction <add>, %54, %cst_31 [1] : vector<16x32xf32> to vector<16xf32>
    %59 = vector.shape_cast %58 : vector<16xf32> to vector<16x1xf32>
    %cst_32 = arith.constant 3.200000e+01 : f32
    %60 = vector.broadcast %cst_32 : f32 to vector<16x1xf32>
    %61 = arith.divf %59, %60 : vector<16x1xf32>
    %62 = vector.broadcast %61 : vector<16x1xf32> to vector<16x32xf32>
    %63 = arith.subf %54, %62 : vector<16x32xf32>
    %64 = arith.mulf %63, %63 : vector<16x32xf32>
    %cst_33 = arith.constant dense<0.000000e+00> : vector<16xf32>
    %65 = vector.multi_reduction <add>, %64, %cst_33 [1] : vector<16x32xf32> to vector<16xf32>
    %66 = vector.shape_cast %65 : vector<16xf32> to vector<16x1xf32>
    %cst_34 = arith.constant 3.200000e+01 : f32
    %67 = vector.broadcast %cst_34 : f32 to vector<16x1xf32>
    %68 = arith.divf %66, %67 : vector<16x1xf32>
    %69 = vector.broadcast %61 : vector<16x1xf32> to vector<16x32xf32>
    %70 = arith.subf %54, %69 : vector<16x32xf32>
    %cst_35 = arith.constant 9.99999996E-13 : f32
    %71 = vector.broadcast %cst_35 : f32 to vector<16x1xf32>
    %72 = arith.addf %68, %71 : vector<16x1xf32>
    %73 = math.rsqrt %72 : vector<16x1xf32>
    %74 = vector.broadcast %73 : vector<16x1xf32> to vector<16x32xf32>
    %75 = arith.mulf %70, %74 : vector<16x32xf32>
    %76 = vector.broadcast %56 : vector<1x32xf32> to vector<16x32xf32>
    %77 = arith.mulf %75, %76 : vector<16x32xf32>
    %78 = vector.broadcast %57 : vector<1x32xf32> to vector<16x32xf32>
    %79 = arith.addf %77, %78 : vector<16x32xf32>
    %80 = vector.broadcast %55 : vector<1x32xf32> to vector<16x32xf32>
    %81 = arith.mulf %80, %79 : vector<16x32xf32>
    %c0_36 = arith.constant 0 : index
    %c0_37 = arith.constant 0 : index
    %82 = vector.load %arg11[%c0_36, %c0_37] : memref<16x32xf32, #tpu.memory_space<vmem>>, vector<16x32xf32>
    tpu.vector_store %arg11[%c0_36, %c0_37], %81 {strides = array<i32>} : memref<16x32xf32, #tpu.memory_space<vmem>>, vector<16x32xf32>,
    return
  }
  func.func @transform_0(%arg0: i32) -> (i32, i32) {
    %c0_i32 = arith.constant 0 : i32
    %c0_i32_0 = arith.constant 0 : i32
    return %arg0, %c0_i32 : i32, i32
  }
  func.func @transform_1(%arg0: i32) -> (i32, i32) {
    %c0_i32 = arith.constant 0 : i32
    %c0_i32_0 = arith.constant 0 : i32
    %c0_i32_1 = arith.constant 0 : i32
    return %c0_i32, %c0_i32_0 : i32, i32
  }
  func.func @transform_2(%arg0: i32) -> (i32, i32) {
    %c0_i32 = arith.constant 0 : i32
    %c0_i32_0 = arith.constant 0 : i32
    %c0_i32_1 = arith.constant 0 : i32
    return %c0_i32, %c0_i32_0 : i32, i32
  }
  func.func @transform_3(%arg0: i32) -> (i32, i32) {
    %c0_i32 = arith.constant 0 : i32
    %c0_i32_0 = arith.constant 0 : i32
    %c0_i32_1 = arith.constant 0 : i32
    return %c0_i32, %c0_i32_0 : i32, i32
  }
  func.func @transform_4(%arg0: i32) -> (i32, i32) {
    %c0_i32 = arith.constant 0 : i32
    %c0_i32_0 = arith.constant 0 : i32
    %c0_i32_1 = arith.constant 0 : i32
    return %c0_i32, %c0_i32_0 : i32, i32
  }
  func.func @transform_5(%arg0: i32) -> (i32, i32) {
    %c0_i32 = arith.constant 0 : i32
    %c0_i32_0 = arith.constant 0 : i32
    %c0_i32_1 = arith.constant 0 : i32
    return %c0_i32, %c0_i32_0 : i32, i32
  }
  func.func @transform_6(%arg0: i32) -> (i32, i32) {
    %c0_i32 = arith.constant 0 : i32
    %c0_i32_0 = arith.constant 0 : i32
    %c0_i32_1 = arith.constant 0 : i32
    return %c0_i32, %c0_i32_0 : i32, i32
  }
  func.func @transform_7(%arg0: i32) -> (i32, i32) {
    %c0_i32 = arith.constant 0 : i32
    %c0_i32_0 = arith.constant 0 : i32
    %c0_i32_1 = arith.constant 0 : i32
    return %c0_i32, %c0_i32_0 : i32, i32
  }
  func.func @transform_8(%arg0: i32) -> (i32, i32) {
    %c0_i32 = arith.constant 0 : i32
    %c0_i32_0 = arith.constant 0 : i32
    %c0_i32_1 = arith.constant 0 : i32
    return %c0_i32, %c0_i32_0 : i32, i32
  }
  func.func @transform_9(%arg0: i32) -> (i32, i32) {
    %c0_i32 = arith.constant 0 : i32
    %c0_i32_0 = arith.constant 0 : i32
    %c0_i32_1 = arith.constant 0 : i32
    return %c0_i32, %c0_i32_0 : i32, i32
  }
  func.func @transform_10(%arg0: i32) -> (i32, i32) {
    %c0_i32 = arith.constant 0 : i32
    %c0_i32_0 = arith.constant 0 : i32
    return %arg0, %c0_i32 : i32, i32
  }
  func.func @transform_11(%arg0: i32) -> (i32, i32) {
    %c0_i32 = arith.constant 0 : i32
    %c0_i32_0 = arith.constant 0 : i32
    return %arg0, %c0_i32 : i32, i32
  }
}

module attributes {stable_mosaic.version = 11 : i64} {
  func.func @_flash_attn_kernel(%arg0: i32, %arg1: i32, %arg2: i32, %arg3: memref<1x8x32xf32, #tpu.memory_space<vmem>>, %arg4: memref<1x8x32xf32, #tpu.memory_space<vmem>>, %arg5: memref<1x8x32xf32, #tpu.memory_space<vmem>>, %arg6: memref<1x32xf32, #tpu.memory_space<vmem>>, %arg7: memref<1x32xf32, #tpu.memory_space<vmem>>, %arg8: memref<1x8x32xf32, #tpu.memory_space<vmem>>, %arg9: memref<8x1xf32, #tpu.memory_space<vmem>>, %arg10: memref<8x1xf32, #tpu.memory_space<vmem>>, %arg11: memref<8x32xf32, #tpu.memory_space<vmem>>) attributes {dimension_semantics = [#tpu.dimension_semantics<parallel>, #tpu.dimension_semantics<parallel>, #tpu.dimension_semantics<arbitrary>], iteration_bounds = array<i64: 2, 1, 1>, scalar_prefetch = 0 : i64, scratch_operands = 3 : i64, tpu.core_type = #tpu.core_type<tc>, window_params = [{transform_indices = @transform_0, window_bounds = array<i64: 1, 8, 32>}, {transform_indices = @transform_1, window_bounds = array<i64: 1, 8, 32>}, {transform_indices = @transform_2, window_bounds = array<i64: 1, 8, 32>}, {pipeline_mode = #tpu.pipeline_mode<synchronous>, transform_indices = @transform_3, window_bounds = array<i64: 1, 32>}, {pipeline_mode = #tpu.pipeline_mode<synchronous>, transform_indices = @transform_4, window_bounds = array<i64: 1, 32>}, {transform_indices = @transform_5, window_bounds = array<i64: 1, 8, 32>}]} {
    %c0_i32 = arith.constant 0 : i32
    %0 = arith.cmpi eq, %arg2, %c0_i32 : i32
    %1 = arith.extui %0 : i1 to i32
    %c0_i32_0 = arith.constant 0 : i32
    %2 = arith.cmpi ne, %1, %c0_i32_0 : i32
    scf.if %2 {
      %cst = arith.constant -1.000000e+30 : f32
      %13 = vector.broadcast %cst : f32 to vector<8x1xf32>
      %c0 = arith.constant 0 : index
      %c0_6 = arith.constant 0 : index
      %14 = vector.load %arg9[%c0, %c0_6] : memref<8x1xf32, #tpu.memory_space<vmem>>, vector<8x1xf32>
      tpu.vector_store %arg9[%c0, %c0_6], %13 {strides = array<i32>} : memref<8x1xf32, #tpu.memory_space<vmem>>, vector<8x1xf32>,
      %cst_7 = arith.constant 0.000000e+00 : f32
      %15 = vector.broadcast %cst_7 : f32 to vector<8x1xf32>
      %c0_8 = arith.constant 0 : index
      %c0_9 = arith.constant 0 : index
      %16 = vector.load %arg10[%c0_8, %c0_9] : memref<8x1xf32, #tpu.memory_space<vmem>>, vector<8x1xf32>
      tpu.vector_store %arg10[%c0_8, %c0_9], %15 {strides = array<i32>} : memref<8x1xf32, #tpu.memory_space<vmem>>, vector<8x1xf32>,
      %cst_10 = arith.constant 0.000000e+00 : f32
      %17 = vector.broadcast %cst_10 : f32 to vector<8x32xf32>
      %c0_11 = arith.constant 0 : index
      %c0_12 = arith.constant 0 : index
      %18 = vector.load %arg11[%c0_11, %c0_12] : memref<8x32xf32, #tpu.memory_space<vmem>>, vector<8x32xf32>
      tpu.vector_store %arg11[%c0_11, %c0_12], %17 {strides = array<i32>} : memref<8x32xf32, #tpu.memory_space<vmem>>, vector<8x32xf32>,
    } else {
    }
    %c8_i32 = arith.constant 8 : i32
    %3 = arith.muli %arg1, %c8_i32 : i32
    %c8_i32_1 = arith.constant 8 : i32
    %4 = arith.muli %arg2, %c8_i32_1 : i32
    %c8_i32_2 = arith.constant 8 : i32
    %5 = arith.addi %3, %c8_i32_2 : i32
    %c1_i32 = arith.constant 1 : i32
    %6 = arith.subi %5, %c1_i32 : i32
    %7 = arith.cmpi sle, %4, %6 : i32
    %8 = arith.extui %7 : i1 to i32
    %c0_i32_3 = arith.constant 0 : i32
    %9 = arith.cmpi ne, %8, %c0_i32_3 : i32
    scf.if %9 {
      %c0 = arith.constant 0 : index
      %c0_6 = arith.constant 0 : index
      %c0_7 = arith.constant 0 : index
      %13 = vector.load %arg3[%c0, %c0_6, %c0_7] : memref<1x8x32xf32, #tpu.memory_space<vmem>>, vector<1x8x32xf32>
      %14 = vector.shape_cast %13 : vector<1x8x32xf32> to vector<8x32xf32>
      %c0_8 = arith.constant 0 : index
      %c0_9 = arith.constant 0 : index
      %c0_10 = arith.constant 0 : index
      %15 = vector.load %arg4[%c0_8, %c0_9, %c0_10] : memref<1x8x32xf32, #tpu.memory_space<vmem>>, vector<1x8x32xf32>
      %16 = vector.shape_cast %15 : vector<1x8x32xf32> to vector<8x32xf32>
      %c0_11 = arith.constant 0 : index
      %c0_12 = arith.constant 0 : index
      %17 = vector.load %arg6[%c0_11, %c0_12] : memref<1x32xf32, #tpu.memory_space<vmem>>, vector<1x32xf32>
      %18 = vector.broadcast %17 : vector<1x32xf32> to vector<8x32xf32>
      %19 = arith.mulf %18, %16 : vector<8x32xf32>
      %c0_13 = arith.constant 0 : index
      %c0_14 = arith.constant 0 : index
      %20 = vector.load %arg7[%c0_13, %c0_14] : memref<1x32xf32, #tpu.memory_space<vmem>>, vector<1x32xf32>
      %21 = vector.broadcast %20 : vector<1x32xf32> to vector<8x32xf32>
      %22 = arith.mulf %21, %16 : vector<8x32xf32>
      %cst = arith.constant dense<0.000000e+00> : vector<8x8xf32>
      %23 = tpu.matmul %14, %19, %cst {dimension_numbers = #tpu.dot_dimension_numbers<[1], [1], [0], [0], [0, 0, 1, 0], [], []>} : vector<8x32xf32>, vector<8x32xf32>, vector<8x8xf32> -> vector<8x8xf32>
      %cst_15 = arith.constant 0.176776692 : f32
      %24 = vector.broadcast %cst_15 : f32 to vector<8x8xf32>
      %25 = arith.mulf %23, %24 : vector<8x8xf32>
      %26 = tpu.iota {dimensions = array<i32: 0>} : vector<8x8xi32>
      %27 = vector.broadcast %3 : i32 to vector<8x8xi32>
      %28 = arith.addi %27, %26 : vector<8x8xi32>
      %29 = tpu.iota {dimensions = array<i32: 1>} : vector<8x8xi32>
      %30 = vector.broadcast %4 : i32 to vector<8x8xi32>
      %31 = arith.addi %30, %29 : vector<8x8xi32>
      %32 = arith.cmpi sgt, %31, %28 : vector<8x8xi32>
      %cst_16 = arith.constant -1.000000e+30 : f32
      %33 = vector.broadcast %cst_16 : f32 to vector<8x8xf32>
      %34 = arith.select %32, %33, %25 : vector<8x8xi1>, vector<8x8xf32>
      %c0_17 = arith.constant 0 : index
      %c0_18 = arith.constant 0 : index
      %35 = vector.load %arg9[%c0_17, %c0_18] : memref<8x1xf32, #tpu.memory_space<vmem>>, vector<8x1xf32>
      %cst_19 = arith.constant dense<0xFF800000> : vector<8xf32>
      %36 = vector.multi_reduction <maximumf>, %34, %cst_19 [1] : vector<8x8xf32> to vector<8xf32>
      %37 = vector.shape_cast %36 : vector<8xf32> to vector<8x1xf32>
      %38 = arith.maximumf %35, %37 : vector<8x1xf32>
      %39 = arith.subf %35, %38 : vector<8x1xf32>
      %40 = math.exp %39 : vector<8x1xf32>
      %41 = vector.broadcast %38 : vector<8x1xf32> to vector<8x8xf32>
      %42 = arith.subf %34, %41 : vector<8x8xf32>
      %43 = math.exp %42 : vector<8x8xf32>
      %c0_20 = arith.constant 0 : index
      %c0_21 = arith.constant 0 : index
      %44 = vector.load %arg10[%c0_20, %c0_21] : memref<8x1xf32, #tpu.memory_space<vmem>>, vector<8x1xf32>
      %45 = arith.mulf %40, %44 : vector<8x1xf32>
      %cst_22 = arith.constant dense<0.000000e+00> : vector<8xf32>
      %46 = vector.multi_reduction <add>, %43, %cst_22 [1] : vector<8x8xf32> to vector<8xf32>
      %47 = vector.shape_cast %46 : vector<8xf32> to vector<8x1xf32>
      %48 = arith.addf %45, %47 : vector<8x1xf32>
      %c0_23 = arith.constant 0 : index
      %c0_24 = arith.constant 0 : index
      %49 = vector.load %arg10[%c0_23, %c0_24] : memref<8x1xf32, #tpu.memory_space<vmem>>, vector<8x1xf32>
      tpu.vector_store %arg10[%c0_23, %c0_24], %48 {strides = array<i32>} : memref<8x1xf32, #tpu.memory_space<vmem>>, vector<8x1xf32>,
      %c0_25 = arith.constant 0 : index
      %c0_26 = arith.constant 0 : index
      %50 = vector.load %arg11[%c0_25, %c0_26] : memref<8x32xf32, #tpu.memory_space<vmem>>, vector<8x32xf32>
      %51 = vector.broadcast %40 : vector<8x1xf32> to vector<8x32xf32>
      %52 = arith.mulf %51, %50 : vector<8x32xf32>
      %cst_27 = arith.constant dense<0.000000e+00> : vector<8x32xf32>
      %53 = tpu.matmul %43, %22, %cst_27 {dimension_numbers = #tpu.dot_dimension_numbers<[1], [0], [0], [1], [0, 0, 1, 1], [], []>} : vector<8x8xf32>, vector<8x32xf32>, vector<8x32xf32> -> vector<8x32xf32>
      %54 = arith.addf %52, %53 : vector<8x32xf32>
      %c0_28 = arith.constant 0 : index
      %c0_29 = arith.constant 0 : index
      %55 = vector.load %arg11[%c0_28, %c0_29] : memref<8x32xf32, #tpu.memory_space<vmem>>, vector<8x32xf32>
      tpu.vector_store %arg11[%c0_28, %c0_29], %54 {strides = array<i32>} : memref<8x32xf32, #tpu.memory_space<vmem>>, vector<8x32xf32>,
      %c0_30 = arith.constant 0 : index
      %c0_31 = arith.constant 0 : index
      %56 = vector.load %arg9[%c0_30, %c0_31] : memref<8x1xf32, #tpu.memory_space<vmem>>, vector<8x1xf32>
      tpu.vector_store %arg9[%c0_30, %c0_31], %38 {strides = array<i32>} : memref<8x1xf32, #tpu.memory_space<vmem>>, vector<8x1xf32>,
    } else {
    }
    %c0_i32_4 = arith.constant 0 : i32
    %10 = arith.cmpi eq, %arg2, %c0_i32_4 : i32
    %11 = arith.extui %10 : i1 to i32
    %c0_i32_5 = arith.constant 0 : i32
    %12 = arith.cmpi ne, %11, %c0_i32_5 : i32
    scf.if %12 {
      %c0 = arith.constant 0 : index
      %c0_6 = arith.constant 0 : index
      %13 = vector.load %arg10[%c0, %c0_6] : memref<8x1xf32, #tpu.memory_space<vmem>>, vector<8x1xf32>
      %14 = tpu.reciprocal %13 {approx = true} : vector<8x1xf32> -> vector<8x1xf32>
      %c0_7 = arith.constant 0 : index
      %c0_8 = arith.constant 0 : index
      %15 = vector.load %arg11[%c0_7, %c0_8] : memref<8x32xf32, #tpu.memory_space<vmem>>, vector<8x32xf32>
      %16 = vector.broadcast %14 : vector<8x1xf32> to vector<8x32xf32>
      %17 = arith.mulf %15, %16 : vector<8x32xf32>
      %c0_9 = arith.constant 0 : index
      %c0_10 = arith.constant 0 : index
      %c0_11 = arith.constant 0 : index
      %18 = vector.load %arg5[%c0_9, %c0_10, %c0_11] : memref<1x8x32xf32, #tpu.memory_space<vmem>>, vector<1x8x32xf32>
      %19 = vector.shape_cast %18 : vector<1x8x32xf32> to vector<8x32xf32>
      %20 = arith.addf %17, %19 : vector<8x32xf32>
      %c0_12 = arith.constant 0 : index
      %c0_13 = arith.constant 0 : index
      %c0_14 = arith.constant 0 : index
      %21 = vector.load %arg8[%c0_12, %c0_13, %c0_14] : memref<1x8x32xf32, #tpu.memory_space<vmem>>, vector<1x8x32xf32>
      %22 = vector.shape_cast %21 : vector<1x8x32xf32> to vector<8x32xf32>
      %23 = vector.shape_cast %20 : vector<8x32xf32> to vector<1x8x32xf32>
      tpu.vector_store %arg8[%c0_12, %c0_13, %c0_14], %23 {strides = array<i32>} : memref<1x8x32xf32, #tpu.memory_space<vmem>>, vector<1x8x32xf32>,
    } else {
    }
    return
  }
  func.func @transform_0(%arg0: i32, %arg1: i32, %arg2: i32) -> (i32, i32, i32) {
    %c0_i32 = arith.constant 0 : i32
    %c0_i32_0 = arith.constant 0 : i32
    return %arg0, %arg1, %c0_i32 : i32, i32, i32
  }
  func.func @transform_1(%arg0: i32, %arg1: i32, %arg2: i32) -> (i32, i32, i32) {
    %c0_i32 = arith.constant 0 : i32
    %c0_i32_0 = arith.constant 0 : i32
    return %arg0, %arg2, %c0_i32 : i32, i32, i32
  }
  func.func @transform_2(%arg0: i32, %arg1: i32, %arg2: i32) -> (i32, i32, i32) {
    %c0_i32 = arith.constant 0 : i32
    %c0_i32_0 = arith.constant 0 : i32
    return %arg0, %arg1, %c0_i32 : i32, i32, i32
  }
  func.func @transform_3(%arg0: i32, %arg1: i32, %arg2: i32) -> (i32, i32) {
    %c0_i32 = arith.constant 0 : i32
    %c0_i32_0 = arith.constant 0 : i32
    %c0_i32_1 = arith.constant 0 : i32
    return %c0_i32, %c0_i32_0 : i32, i32
  }
  func.func @transform_4(%arg0: i32, %arg1: i32, %arg2: i32) -> (i32, i32) {
    %c0_i32 = arith.constant 0 : i32
    %c0_i32_0 = arith.constant 0 : i32
    %c0_i32_1 = arith.constant 0 : i32
    return %c0_i32, %c0_i32_0 : i32, i32
  }
  func.func @transform_5(%arg0: i32, %arg1: i32, %arg2: i32) -> (i32, i32, i32) {
    %c0_i32 = arith.constant 0 : i32
    %c0_i32_0 = arith.constant 0 : i32
    return %arg0, %arg1, %c0_i32 : i32, i32, i32
  }
}

module attributes {stable_mosaic.version = 11 : i64} {
  func.func @_lstm_kernel(%arg0: i32, %arg1: i32, %arg2: memref<8x2x32xf32, #tpu.memory_space<vmem>>, %arg3: memref<1x32xf32, #tpu.memory_space<vmem>>, %arg4: memref<1x32xf32, #tpu.memory_space<vmem>>, %arg5: memref<32x128xf32, #tpu.memory_space<vmem>>, %arg6: memref<32x128xf32, #tpu.memory_space<vmem>>, %arg7: memref<1x128xf32, #tpu.memory_space<vmem>>, %arg8: memref<8x2x32xf32, #tpu.memory_space<vmem>>, %arg9: memref<2x32xf32, #tpu.memory_space<vmem>>, %arg10: memref<2x32xf32, #tpu.memory_space<vmem>>, %arg11: memref<2x32xf32, #tpu.memory_space<vmem>>, %arg12: memref<2x32xf32, #tpu.memory_space<vmem>>) attributes {dimension_semantics = [#tpu.dimension_semantics<parallel>, #tpu.dimension_semantics<arbitrary>], iteration_bounds = array<i64: 1, 1>, scalar_prefetch = 0 : i64, scratch_operands = 2 : i64, tpu.core_type = #tpu.core_type<tc>, window_params = [{transform_indices = @transform_0, window_bounds = array<i64: 8, 2, 32>}, {pipeline_mode = #tpu.pipeline_mode<synchronous>, transform_indices = @transform_1, window_bounds = array<i64: 1, 32>}, {pipeline_mode = #tpu.pipeline_mode<synchronous>, transform_indices = @transform_2, window_bounds = array<i64: 1, 32>}, {pipeline_mode = #tpu.pipeline_mode<synchronous>, transform_indices = @transform_3, window_bounds = array<i64: 32, 128>}, {pipeline_mode = #tpu.pipeline_mode<synchronous>, transform_indices = @transform_4, window_bounds = array<i64: 32, 128>}, {pipeline_mode = #tpu.pipeline_mode<synchronous>, transform_indices = @transform_5, window_bounds = array<i64: 1, 128>}, {transform_indices = @transform_6, window_bounds = array<i64: 8, 2, 32>}, {transform_indices = @transform_7, window_bounds = array<i64: 2, 32>}, {transform_indices = @transform_8, window_bounds = array<i64: 2, 32>}]} {
    %c0_i32 = arith.constant 0 : i32
    %0 = arith.cmpi eq, %arg1, %c0_i32 : i32
    %1 = arith.extui %0 : i1 to i32
    %c0_i32_0 = arith.constant 0 : i32
    %2 = arith.cmpi ne, %1, %c0_i32_0 : i32
    scf.if %2 {
      %cst_140 = arith.constant 0.000000e+00 : f32
      %471 = vector.broadcast %cst_140 : f32 to vector<2x32xf32>
      %c0_141 = arith.constant 0 : index
      %c0_142 = arith.constant 0 : index
      %472 = vector.load %arg11[%c0_141, %c0_142] : memref<2x32xf32, #tpu.memory_space<vmem>>, vector<2x32xf32>
      tpu.vector_store %arg11[%c0_141, %c0_142], %471 {strides = array<i32>} : memref<2x32xf32, #tpu.memory_space<vmem>>, vector<2x32xf32>,
      %cst_143 = arith.constant 0.000000e+00 : f32
      %473 = vector.broadcast %cst_143 : f32 to vector<2x32xf32>
      %c0_144 = arith.constant 0 : index
      %c0_145 = arith.constant 0 : index
      %474 = vector.load %arg12[%c0_144, %c0_145] : memref<2x32xf32, #tpu.memory_space<vmem>>, vector<2x32xf32>
      tpu.vector_store %arg12[%c0_144, %c0_145], %473 {strides = array<i32>} : memref<2x32xf32, #tpu.memory_space<vmem>>, vector<2x32xf32>,
    } else {
    }
    %c0 = arith.constant 0 : index
    %c0_1 = arith.constant 0 : index
    %3 = vector.load %arg3[%c0, %c0_1] : memref<1x32xf32, #tpu.memory_space<vmem>>, vector<1x32xf32>
    %c0_2 = arith.constant 0 : index
    %c0_3 = arith.constant 0 : index
    %4 = vector.load %arg4[%c0_2, %c0_3] : memref<1x32xf32, #tpu.memory_space<vmem>>, vector<1x32xf32>
    %c0_4 = arith.constant 0 : index
    %c0_5 = arith.constant 0 : index
    %5 = vector.load %arg5[%c0_4, %c0_5] : memref<32x128xf32, #tpu.memory_space<vmem>>, vector<32x128xf32>
    %c0_6 = arith.constant 0 : index
    %c0_7 = arith.constant 0 : index
    %6 = vector.load %arg6[%c0_6, %c0_7] : memref<32x128xf32, #tpu.memory_space<vmem>>, vector<32x128xf32>
    %c0_8 = arith.constant 0 : index
    %c0_9 = arith.constant 0 : index
    %7 = vector.load %arg7[%c0_8, %c0_9] : memref<1x128xf32, #tpu.memory_space<vmem>>, vector<1x128xf32>
    %c0_10 = arith.constant 0 : index
    %c0_11 = arith.constant 0 : index
    %8 = vector.load %arg11[%c0_10, %c0_11] : memref<2x32xf32, #tpu.memory_space<vmem>>, vector<2x32xf32>
    %c0_12 = arith.constant 0 : index
    %c0_13 = arith.constant 0 : index
    %9 = vector.load %arg12[%c0_12, %c0_13] : memref<2x32xf32, #tpu.memory_space<vmem>>, vector<2x32xf32>
    %c0_14 = arith.constant 0 : index
    %c0_15 = arith.constant 0 : index
    %c0_16 = arith.constant 0 : index
    %10 = vector.load %arg2[%c0_14, %c0_15, %c0_16] : memref<8x2x32xf32, #tpu.memory_space<vmem>>, vector<1x2x32xf32>
    %11 = vector.shape_cast %10 : vector<1x2x32xf32> to vector<2x32xf32>
    %cst = arith.constant dense<0.000000e+00> : vector<2xf32>
    %12 = vector.multi_reduction <add>, %11, %cst [1] : vector<2x32xf32> to vector<2xf32>
    %13 = vector.shape_cast %12 : vector<2xf32> to vector<2x1xf32>
    %cst_17 = arith.constant 3.200000e+01 : f32
    %14 = vector.broadcast %cst_17 : f32 to vector<2x1xf32>
    %15 = arith.divf %13, %14 : vector<2x1xf32>
    %16 = vector.broadcast %15 : vector<2x1xf32> to vector<2x32xf32>
    %17 = arith.subf %11, %16 : vector<2x32xf32>
    %18 = arith.mulf %17, %17 : vector<2x32xf32>
    %cst_18 = arith.constant dense<0.000000e+00> : vector<2xf32>
    %19 = vector.multi_reduction <add>, %18, %cst_18 [1] : vector<2x32xf32> to vector<2xf32>
    %20 = vector.shape_cast %19 : vector<2xf32> to vector<2x1xf32>
    %cst_19 = arith.constant 3.200000e+01 : f32
    %21 = vector.broadcast %cst_19 : f32 to vector<2x1xf32>
    %22 = arith.divf %20, %21 : vector<2x1xf32>
    %23 = vector.broadcast %15 : vector<2x1xf32> to vector<2x32xf32>
    %24 = arith.subf %11, %23 : vector<2x32xf32>
    %cst_20 = arith.constant 9.99999996E-13 : f32
    %25 = vector.broadcast %cst_20 : f32 to vector<2x1xf32>
    %26 = arith.addf %22, %25 : vector<2x1xf32>
    %27 = math.rsqrt %26 : vector<2x1xf32>
    %28 = vector.broadcast %27 : vector<2x1xf32> to vector<2x32xf32>
    %29 = arith.mulf %24, %28 : vector<2x32xf32>
    %30 = vector.broadcast %3 : vector<1x32xf32> to vector<2x32xf32>
    %31 = arith.mulf %29, %30 : vector<2x32xf32>
    %32 = vector.broadcast %4 : vector<1x32xf32> to vector<2x32xf32>
    %33 = arith.addf %31, %32 : vector<2x32xf32>
    %cst_21 = arith.constant dense<0.000000e+00> : vector<2x128xf32>
    %34 = tpu.matmul %33, %5, %cst_21 {dimension_numbers = #tpu.dot_dimension_numbers<[1], [0], [0], [1], [0, 0, 1, 1], [], []>} : vector<2x32xf32>, vector<32x128xf32>, vector<2x128xf32> -> vector<2x128xf32>
    %cst_22 = arith.constant dense<0.000000e+00> : vector<2x128xf32>
    %35 = tpu.matmul %8, %6, %cst_22 {dimension_numbers = #tpu.dot_dimension_numbers<[1], [0], [0], [1], [0, 0, 1, 1], [], []>} : vector<2x32xf32>, vector<32x128xf32>, vector<2x128xf32> -> vector<2x128xf32>
    %36 = arith.addf %34, %35 : vector<2x128xf32>
    %37 = vector.broadcast %7 : vector<1x128xf32> to vector<2x128xf32>
    %38 = arith.addf %36, %37 : vector<2x128xf32>
    %39 = vector.extract_strided_slice %38 {offsets = [0, 0], sizes = [2, 32], strides = [1, 1]} : vector<2x128xf32> to vector<2x32xf32>
    %40 = arith.negf %39 : vector<2x32xf32>
    %41 = math.exp %40 : vector<2x32xf32>
    %cst_23 = arith.constant 1.000000e+00 : f32
    %42 = vector.broadcast %cst_23 : f32 to vector<2x32xf32>
    %43 = arith.addf %42, %41 : vector<2x32xf32>
    %44 = arith.divf %42, %43 : vector<2x32xf32>
    %45 = vector.extract_strided_slice %38 {offsets = [0, 32], sizes = [2, 32], strides = [1, 1]} : vector<2x128xf32> to vector<2x32xf32>
    %46 = arith.negf %45 : vector<2x32xf32>
    %47 = math.exp %46 : vector<2x32xf32>
    %cst_24 = arith.constant 1.000000e+00 : f32
    %48 = vector.broadcast %cst_24 : f32 to vector<2x32xf32>
    %49 = arith.addf %48, %47 : vector<2x32xf32>
    %50 = arith.divf %48, %49 : vector<2x32xf32>
    %51 = vector.extract_strided_slice %38 {offsets = [0, 64], sizes = [2, 32], strides = [1, 1]} : vector<2x128xf32> to vector<2x32xf32>
    %52 = math.tanh %51 : vector<2x32xf32>
    %53 = vector.extract_strided_slice %38 {offsets = [0, 96], sizes = [2, 32], strides = [1, 1]} : vector<2x128xf32> to vector<2x32xf32>
    %54 = arith.negf %53 : vector<2x32xf32>
    %55 = math.exp %54 : vector<2x32xf32>
    %cst_25 = arith.constant 1.000000e+00 : f32
    %56 = vector.broadcast %cst_25 : f32 to vector<2x32xf32>
    %57 = arith.addf %56, %55 : vector<2x32xf32>
    %58 = arith.divf %56, %57 : vector<2x32xf32>
    %59 = arith.mulf %50, %9 : vector<2x32xf32>
    %60 = arith.mulf %44, %52 : vector<2x32xf32>
    %61 = arith.addf %59, %60 : vector<2x32xf32>
    %62 = math.tanh %61 : vector<2x32xf32>
    %63 = arith.mulf %58, %62 : vector<2x32xf32>
    %c0_26 = arith.constant 0 : index
    %c0_27 = arith.constant 0 : index
    %c0_28 = arith.constant 0 : index
    %64 = vector.load %arg8[%c0_26, %c0_27, %c0_28] : memref<8x2x32xf32, #tpu.memory_space<vmem>>, vector<1x2x32xf32>
    %65 = vector.shape_cast %64 : vector<1x2x32xf32> to vector<2x32xf32>
    %66 = vector.shape_cast %63 : vector<2x32xf32> to vector<1x2x32xf32>
    tpu.vector_store %arg8[%c0_26, %c0_27, %c0_28], %66 {strides = array<i32>} : memref<8x2x32xf32, #tpu.memory_space<vmem>>, vector<1x2x32xf32>,
    %c1 = arith.constant 1 : index
    %c0_29 = arith.constant 0 : index
    %c0_30 = arith.constant 0 : index
    %67 = vector.load %arg2[%c1, %c0_29, %c0_30] : memref<8x2x32xf32, #tpu.memory_space<vmem>>, vector<1x2x32xf32>
    %68 = vector.shape_cast %67 : vector<1x2x32xf32> to vector<2x32xf32>
    %cst_31 = arith.constant dense<0.000000e+00> : vector<2xf32>
    %69 = vector.multi_reduction <add>, %68, %cst_31 [1] : vector<2x32xf32> to vector<2xf32>
    %70 = vector.shape_cast %69 : vector<2xf32> to vector<2x1xf32>
    %cst_32 = arith.constant 3.200000e+01 : f32
    %71 = vector.broadcast %cst_32 : f32 to vector<2x1xf32>
    %72 = arith.divf %70, %71 : vector<2x1xf32>
    %73 = vector.broadcast %72 : vector<2x1xf32> to vector<2x32xf32>
    %74 = arith.subf %68, %73 : vector<2x32xf32>
    %75 = arith.mulf %74, %74 : vector<2x32xf32>
    %cst_33 = arith.constant dense<0.000000e+00> : vector<2xf32>
    %76 = vector.multi_reduction <add>, %75, %cst_33 [1] : vector<2x32xf32> to vector<2xf32>
    %77 = vector.shape_cast %76 : vector<2xf32> to vector<2x1xf32>
    %cst_34 = arith.constant 3.200000e+01 : f32
    %78 = vector.broadcast %cst_34 : f32 to vector<2x1xf32>
    %79 = arith.divf %77, %78 : vector<2x1xf32>
    %80 = vector.broadcast %72 : vector<2x1xf32> to vector<2x32xf32>
    %81 = arith.subf %68, %80 : vector<2x32xf32>
    %cst_35 = arith.constant 9.99999996E-13 : f32
    %82 = vector.broadcast %cst_35 : f32 to vector<2x1xf32>
    %83 = arith.addf %79, %82 : vector<2x1xf32>
    %84 = math.rsqrt %83 : vector<2x1xf32>
    %85 = vector.broadcast %84 : vector<2x1xf32> to vector<2x32xf32>
    %86 = arith.mulf %81, %85 : vector<2x32xf32>
    %87 = vector.broadcast %3 : vector<1x32xf32> to vector<2x32xf32>
    %88 = arith.mulf %86, %87 : vector<2x32xf32>
    %89 = vector.broadcast %4 : vector<1x32xf32> to vector<2x32xf32>
    %90 = arith.addf %88, %89 : vector<2x32xf32>
    %cst_36 = arith.constant dense<0.000000e+00> : vector<2x128xf32>
    %91 = tpu.matmul %90, %5, %cst_36 {dimension_numbers = #tpu.dot_dimension_numbers<[1], [0], [0], [1], [0, 0, 1, 1], [], []>} : vector<2x32xf32>, vector<32x128xf32>, vector<2x128xf32> -> vector<2x128xf32>
    %cst_37 = arith.constant dense<0.000000e+00> : vector<2x128xf32>
    %92 = tpu.matmul %63, %6, %cst_37 {dimension_numbers = #tpu.dot_dimension_numbers<[1], [0], [0], [1], [0, 0, 1, 1], [], []>} : vector<2x32xf32>, vector<32x128xf32>, vector<2x128xf32> -> vector<2x128xf32>
    %93 = arith.addf %91, %92 : vector<2x128xf32>
    %94 = vector.broadcast %7 : vector<1x128xf32> to vector<2x128xf32>
    %95 = arith.addf %93, %94 : vector<2x128xf32>
    %96 = vector.extract_strided_slice %95 {offsets = [0, 0], sizes = [2, 32], strides = [1, 1]} : vector<2x128xf32> to vector<2x32xf32>
    %97 = arith.negf %96 : vector<2x32xf32>
    %98 = math.exp %97 : vector<2x32xf32>
    %cst_38 = arith.constant 1.000000e+00 : f32
    %99 = vector.broadcast %cst_38 : f32 to vector<2x32xf32>
    %100 = arith.addf %99, %98 : vector<2x32xf32>
    %101 = arith.divf %99, %100 : vector<2x32xf32>
    %102 = vector.extract_strided_slice %95 {offsets = [0, 32], sizes = [2, 32], strides = [1, 1]} : vector<2x128xf32> to vector<2x32xf32>
    %103 = arith.negf %102 : vector<2x32xf32>
    %104 = math.exp %103 : vector<2x32xf32>
    %cst_39 = arith.constant 1.000000e+00 : f32
    %105 = vector.broadcast %cst_39 : f32 to vector<2x32xf32>
    %106 = arith.addf %105, %104 : vector<2x32xf32>
    %107 = arith.divf %105, %106 : vector<2x32xf32>
    %108 = vector.extract_strided_slice %95 {offsets = [0, 64], sizes = [2, 32], strides = [1, 1]} : vector<2x128xf32> to vector<2x32xf32>
    %109 = math.tanh %108 : vector<2x32xf32>
    %110 = vector.extract_strided_slice %95 {offsets = [0, 96], sizes = [2, 32], strides = [1, 1]} : vector<2x128xf32> to vector<2x32xf32>
    %111 = arith.negf %110 : vector<2x32xf32>
    %112 = math.exp %111 : vector<2x32xf32>
    %cst_40 = arith.constant 1.000000e+00 : f32
    %113 = vector.broadcast %cst_40 : f32 to vector<2x32xf32>
    %114 = arith.addf %113, %112 : vector<2x32xf32>
    %115 = arith.divf %113, %114 : vector<2x32xf32>
    %116 = arith.mulf %107, %61 : vector<2x32xf32>
    %117 = arith.mulf %101, %109 : vector<2x32xf32>
    %118 = arith.addf %116, %117 : vector<2x32xf32>
    %119 = math.tanh %118 : vector<2x32xf32>
    %120 = arith.mulf %115, %119 : vector<2x32xf32>
    %c1_41 = arith.constant 1 : index
    %c0_42 = arith.constant 0 : index
    %c0_43 = arith.constant 0 : index
    %121 = vector.load %arg8[%c1_41, %c0_42, %c0_43] : memref<8x2x32xf32, #tpu.memory_space<vmem>>, vector<1x2x32xf32>
    %122 = vector.shape_cast %121 : vector<1x2x32xf32> to vector<2x32xf32>
    %123 = vector.shape_cast %120 : vector<2x32xf32> to vector<1x2x32xf32>
    tpu.vector_store %arg8[%c1_41, %c0_42, %c0_43], %123 {strides = array<i32>} : memref<8x2x32xf32, #tpu.memory_space<vmem>>, vector<1x2x32xf32>,
    %c2 = arith.constant 2 : index
    %c0_44 = arith.constant 0 : index
    %c0_45 = arith.constant 0 : index
    %124 = vector.load %arg2[%c2, %c0_44, %c0_45] : memref<8x2x32xf32, #tpu.memory_space<vmem>>, vector<1x2x32xf32>
    %125 = vector.shape_cast %124 : vector<1x2x32xf32> to vector<2x32xf32>
    %cst_46 = arith.constant dense<0.000000e+00> : vector<2xf32>
    %126 = vector.multi_reduction <add>, %125, %cst_46 [1] : vector<2x32xf32> to vector<2xf32>
    %127 = vector.shape_cast %126 : vector<2xf32> to vector<2x1xf32>
    %cst_47 = arith.constant 3.200000e+01 : f32
    %128 = vector.broadcast %cst_47 : f32 to vector<2x1xf32>
    %129 = arith.divf %127, %128 : vector<2x1xf32>
    %130 = vector.broadcast %129 : vector<2x1xf32> to vector<2x32xf32>
    %131 = arith.subf %125, %130 : vector<2x32xf32>
    %132 = arith.mulf %131, %131 : vector<2x32xf32>
    %cst_48 = arith.constant dense<0.000000e+00> : vector<2xf32>
    %133 = vector.multi_reduction <add>, %132, %cst_48 [1] : vector<2x32xf32> to vector<2xf32>
    %134 = vector.shape_cast %133 : vector<2xf32> to vector<2x1xf32>
    %cst_49 = arith.constant 3.200000e+01 : f32
    %135 = vector.broadcast %cst_49 : f32 to vector<2x1xf32>
    %136 = arith.divf %134, %135 : vector<2x1xf32>
    %137 = vector.broadcast %129 : vector<2x1xf32> to vector<2x32xf32>
    %138 = arith.subf %125, %137 : vector<2x32xf32>
    %cst_50 = arith.constant 9.99999996E-13 : f32
    %139 = vector.broadcast %cst_50 : f32 to vector<2x1xf32>
    %140 = arith.addf %136, %139 : vector<2x1xf32>
    %141 = math.rsqrt %140 : vector<2x1xf32>
    %142 = vector.broadcast %141 : vector<2x1xf32> to vector<2x32xf32>
    %143 = arith.mulf %138, %142 : vector<2x32xf32>
    %144 = vector.broadcast %3 : vector<1x32xf32> to vector<2x32xf32>
    %145 = arith.mulf %143, %144 : vector<2x32xf32>
    %146 = vector.broadcast %4 : vector<1x32xf32> to vector<2x32xf32>
    %147 = arith.addf %145, %146 : vector<2x32xf32>
    %cst_51 = arith.constant dense<0.000000e+00> : vector<2x128xf32>
    %148 = tpu.matmul %147, %5, %cst_51 {dimension_numbers = #tpu.dot_dimension_numbers<[1], [0], [0], [1], [0, 0, 1, 1], [], []>} : vector<2x32xf32>, vector<32x128xf32>, vector<2x128xf32> -> vector<2x128xf32>
    %cst_52 = arith.constant dense<0.000000e+00> : vector<2x128xf32>
    %149 = tpu.matmul %120, %6, %cst_52 {dimension_numbers = #tpu.dot_dimension_numbers<[1], [0], [0], [1], [0, 0, 1, 1], [], []>} : vector<2x32xf32>, vector<32x128xf32>, vector<2x128xf32> -> vector<2x128xf32>
    %150 = arith.addf %148, %149 : vector<2x128xf32>
    %151 = vector.broadcast %7 : vector<1x128xf32> to vector<2x128xf32>
    %152 = arith.addf %150, %151 : vector<2x128xf32>
    %153 = vector.extract_strided_slice %152 {offsets = [0, 0], sizes = [2, 32], strides = [1, 1]} : vector<2x128xf32> to vector<2x32xf32>
    %154 = arith.negf %153 : vector<2x32xf32>
    %155 = math.exp %154 : vector<2x32xf32>
    %cst_53 = arith.constant 1.000000e+00 : f32
    %156 = vector.broadcast %cst_53 : f32 to vector<2x32xf32>
    %157 = arith.addf %156, %155 : vector<2x32xf32>
    %158 = arith.divf %156, %157 : vector<2x32xf32>
    %159 = vector.extract_strided_slice %152 {offsets = [0, 32], sizes = [2, 32], strides = [1, 1]} : vector<2x128xf32> to vector<2x32xf32>
    %160 = arith.negf %159 : vector<2x32xf32>
    %161 = math.exp %160 : vector<2x32xf32>
    %cst_54 = arith.constant 1.000000e+00 : f32
    %162 = vector.broadcast %cst_54 : f32 to vector<2x32xf32>
    %163 = arith.addf %162, %161 : vector<2x32xf32>
    %164 = arith.divf %162, %163 : vector<2x32xf32>
    %165 = vector.extract_strided_slice %152 {offsets = [0, 64], sizes = [2, 32], strides = [1, 1]} : vector<2x128xf32> to vector<2x32xf32>
    %166 = math.tanh %165 : vector<2x32xf32>
    %167 = vector.extract_strided_slice %152 {offsets = [0, 96], sizes = [2, 32], strides = [1, 1]} : vector<2x128xf32> to vector<2x32xf32>
    %168 = arith.negf %167 : vector<2x32xf32>
    %169 = math.exp %168 : vector<2x32xf32>
    %cst_55 = arith.constant 1.000000e+00 : f32
    %170 = vector.broadcast %cst_55 : f32 to vector<2x32xf32>
    %171 = arith.addf %170, %169 : vector<2x32xf32>
    %172 = arith.divf %170, %171 : vector<2x32xf32>
    %173 = arith.mulf %164, %118 : vector<2x32xf32>
    %174 = arith.mulf %158, %166 : vector<2x32xf32>
    %175 = arith.addf %173, %174 : vector<2x32xf32>
    %176 = math.tanh %175 : vector<2x32xf32>
    %177 = arith.mulf %172, %176 : vector<2x32xf32>
    %c2_56 = arith.constant 2 : index
    %c0_57 = arith.constant 0 : index
    %c0_58 = arith.constant 0 : index
    %178 = vector.load %arg8[%c2_56, %c0_57, %c0_58] : memref<8x2x32xf32, #tpu.memory_space<vmem>>, vector<1x2x32xf32>
    %179 = vector.shape_cast %178 : vector<1x2x32xf32> to vector<2x32xf32>
    %180 = vector.shape_cast %177 : vector<2x32xf32> to vector<1x2x32xf32>
    tpu.vector_store %arg8[%c2_56, %c0_57, %c0_58], %180 {strides = array<i32>} : memref<8x2x32xf32, #tpu.memory_space<vmem>>, vector<1x2x32xf32>,
    %c3 = arith.constant 3 : index
    %c0_59 = arith.constant 0 : index
    %c0_60 = arith.constant 0 : index
    %181 = vector.load %arg2[%c3, %c0_59, %c0_60] : memref<8x2x32xf32, #tpu.memory_space<vmem>>, vector<1x2x32xf32>
    %182 = vector.shape_cast %181 : vector<1x2x32xf32> to vector<2x32xf32>
    %cst_61 = arith.constant dense<0.000000e+00> : vector<2xf32>
    %183 = vector.multi_reduction <add>, %182, %cst_61 [1] : vector<2x32xf32> to vector<2xf32>
    %184 = vector.shape_cast %183 : vector<2xf32> to vector<2x1xf32>
    %cst_62 = arith.constant 3.200000e+01 : f32
    %185 = vector.broadcast %cst_62 : f32 to vector<2x1xf32>
    %186 = arith.divf %184, %185 : vector<2x1xf32>
    %187 = vector.broadcast %186 : vector<2x1xf32> to vector<2x32xf32>
    %188 = arith.subf %182, %187 : vector<2x32xf32>
    %189 = arith.mulf %188, %188 : vector<2x32xf32>
    %cst_63 = arith.constant dense<0.000000e+00> : vector<2xf32>
    %190 = vector.multi_reduction <add>, %189, %cst_63 [1] : vector<2x32xf32> to vector<2xf32>
    %191 = vector.shape_cast %190 : vector<2xf32> to vector<2x1xf32>
    %cst_64 = arith.constant 3.200000e+01 : f32
    %192 = vector.broadcast %cst_64 : f32 to vector<2x1xf32>
    %193 = arith.divf %191, %192 : vector<2x1xf32>
    %194 = vector.broadcast %186 : vector<2x1xf32> to vector<2x32xf32>
    %195 = arith.subf %182, %194 : vector<2x32xf32>
    %cst_65 = arith.constant 9.99999996E-13 : f32
    %196 = vector.broadcast %cst_65 : f32 to vector<2x1xf32>
    %197 = arith.addf %193, %196 : vector<2x1xf32>
    %198 = math.rsqrt %197 : vector<2x1xf32>
    %199 = vector.broadcast %198 : vector<2x1xf32> to vector<2x32xf32>
    %200 = arith.mulf %195, %199 : vector<2x32xf32>
    %201 = vector.broadcast %3 : vector<1x32xf32> to vector<2x32xf32>
    %202 = arith.mulf %200, %201 : vector<2x32xf32>
    %203 = vector.broadcast %4 : vector<1x32xf32> to vector<2x32xf32>
    %204 = arith.addf %202, %203 : vector<2x32xf32>
    %cst_66 = arith.constant dense<0.000000e+00> : vector<2x128xf32>
    %205 = tpu.matmul %204, %5, %cst_66 {dimension_numbers = #tpu.dot_dimension_numbers<[1], [0], [0], [1], [0, 0, 1, 1], [], []>} : vector<2x32xf32>, vector<32x128xf32>, vector<2x128xf32> -> vector<2x128xf32>
    %cst_67 = arith.constant dense<0.000000e+00> : vector<2x128xf32>
    %206 = tpu.matmul %177, %6, %cst_67 {dimension_numbers = #tpu.dot_dimension_numbers<[1], [0], [0], [1], [0, 0, 1, 1], [], []>} : vector<2x32xf32>, vector<32x128xf32>, vector<2x128xf32> -> vector<2x128xf32>
    %207 = arith.addf %205, %206 : vector<2x128xf32>
    %208 = vector.broadcast %7 : vector<1x128xf32> to vector<2x128xf32>
    %209 = arith.addf %207, %208 : vector<2x128xf32>
    %210 = vector.extract_strided_slice %209 {offsets = [0, 0], sizes = [2, 32], strides = [1, 1]} : vector<2x128xf32> to vector<2x32xf32>
    %211 = arith.negf %210 : vector<2x32xf32>
    %212 = math.exp %211 : vector<2x32xf32>
    %cst_68 = arith.constant 1.000000e+00 : f32
    %213 = vector.broadcast %cst_68 : f32 to vector<2x32xf32>
    %214 = arith.addf %213, %212 : vector<2x32xf32>
    %215 = arith.divf %213, %214 : vector<2x32xf32>
    %216 = vector.extract_strided_slice %209 {offsets = [0, 32], sizes = [2, 32], strides = [1, 1]} : vector<2x128xf32> to vector<2x32xf32>
    %217 = arith.negf %216 : vector<2x32xf32>
    %218 = math.exp %217 : vector<2x32xf32>
    %cst_69 = arith.constant 1.000000e+00 : f32
    %219 = vector.broadcast %cst_69 : f32 to vector<2x32xf32>
    %220 = arith.addf %219, %218 : vector<2x32xf32>
    %221 = arith.divf %219, %220 : vector<2x32xf32>
    %222 = vector.extract_strided_slice %209 {offsets = [0, 64], sizes = [2, 32], strides = [1, 1]} : vector<2x128xf32> to vector<2x32xf32>
    %223 = math.tanh %222 : vector<2x32xf32>
    %224 = vector.extract_strided_slice %209 {offsets = [0, 96], sizes = [2, 32], strides = [1, 1]} : vector<2x128xf32> to vector<2x32xf32>
    %225 = arith.negf %224 : vector<2x32xf32>
    %226 = math.exp %225 : vector<2x32xf32>
    %cst_70 = arith.constant 1.000000e+00 : f32
    %227 = vector.broadcast %cst_70 : f32 to vector<2x32xf32>
    %228 = arith.addf %227, %226 : vector<2x32xf32>
    %229 = arith.divf %227, %228 : vector<2x32xf32>
    %230 = arith.mulf %221, %175 : vector<2x32xf32>
    %231 = arith.mulf %215, %223 : vector<2x32xf32>
    %232 = arith.addf %230, %231 : vector<2x32xf32>
    %233 = math.tanh %232 : vector<2x32xf32>
    %234 = arith.mulf %229, %233 : vector<2x32xf32>
    %c3_71 = arith.constant 3 : index
    %c0_72 = arith.constant 0 : index
    %c0_73 = arith.constant 0 : index
    %235 = vector.load %arg8[%c3_71, %c0_72, %c0_73] : memref<8x2x32xf32, #tpu.memory_space<vmem>>, vector<1x2x32xf32>
    %236 = vector.shape_cast %235 : vector<1x2x32xf32> to vector<2x32xf32>
    %237 = vector.shape_cast %234 : vector<2x32xf32> to vector<1x2x32xf32>
    tpu.vector_store %arg8[%c3_71, %c0_72, %c0_73], %237 {strides = array<i32>} : memref<8x2x32xf32, #tpu.memory_space<vmem>>, vector<1x2x32xf32>,
    %c4 = arith.constant 4 : index
    %c0_74 = arith.constant 0 : index
    %c0_75 = arith.constant 0 : index
    %238 = vector.load %arg2[%c4, %c0_74, %c0_75] : memref<8x2x32xf32, #tpu.memory_space<vmem>>, vector<1x2x32xf32>
    %239 = vector.shape_cast %238 : vector<1x2x32xf32> to vector<2x32xf32>
    %cst_76 = arith.constant dense<0.000000e+00> : vector<2xf32>
    %240 = vector.multi_reduction <add>, %239, %cst_76 [1] : vector<2x32xf32> to vector<2xf32>
    %241 = vector.shape_cast %240 : vector<2xf32> to vector<2x1xf32>
    %cst_77 = arith.constant 3.200000e+01 : f32
    %242 = vector.broadcast %cst_77 : f32 to vector<2x1xf32>
    %243 = arith.divf %241, %242 : vector<2x1xf32>
    %244 = vector.broadcast %243 : vector<2x1xf32> to vector<2x32xf32>
    %245 = arith.subf %239, %244 : vector<2x32xf32>
    %246 = arith.mulf %245, %245 : vector<2x32xf32>
    %cst_78 = arith.constant dense<0.000000e+00> : vector<2xf32>
    %247 = vector.multi_reduction <add>, %246, %cst_78 [1] : vector<2x32xf32> to vector<2xf32>
    %248 = vector.shape_cast %247 : vector<2xf32> to vector<2x1xf32>
    %cst_79 = arith.constant 3.200000e+01 : f32
    %249 = vector.broadcast %cst_79 : f32 to vector<2x1xf32>
    %250 = arith.divf %248, %249 : vector<2x1xf32>
    %251 = vector.broadcast %243 : vector<2x1xf32> to vector<2x32xf32>
    %252 = arith.subf %239, %251 : vector<2x32xf32>
    %cst_80 = arith.constant 9.99999996E-13 : f32
    %253 = vector.broadcast %cst_80 : f32 to vector<2x1xf32>
    %254 = arith.addf %250, %253 : vector<2x1xf32>
    %255 = math.rsqrt %254 : vector<2x1xf32>
    %256 = vector.broadcast %255 : vector<2x1xf32> to vector<2x32xf32>
    %257 = arith.mulf %252, %256 : vector<2x32xf32>
    %258 = vector.broadcast %3 : vector<1x32xf32> to vector<2x32xf32>
    %259 = arith.mulf %257, %258 : vector<2x32xf32>
    %260 = vector.broadcast %4 : vector<1x32xf32> to vector<2x32xf32>
    %261 = arith.addf %259, %260 : vector<2x32xf32>
    %cst_81 = arith.constant dense<0.000000e+00> : vector<2x128xf32>
    %262 = tpu.matmul %261, %5, %cst_81 {dimension_numbers = #tpu.dot_dimension_numbers<[1], [0], [0], [1], [0, 0, 1, 1], [], []>} : vector<2x32xf32>, vector<32x128xf32>, vector<2x128xf32> -> vector<2x128xf32>
    %cst_82 = arith.constant dense<0.000000e+00> : vector<2x128xf32>
    %263 = tpu.matmul %234, %6, %cst_82 {dimension_numbers = #tpu.dot_dimension_numbers<[1], [0], [0], [1], [0, 0, 1, 1], [], []>} : vector<2x32xf32>, vector<32x128xf32>, vector<2x128xf32> -> vector<2x128xf32>
    %264 = arith.addf %262, %263 : vector<2x128xf32>
    %265 = vector.broadcast %7 : vector<1x128xf32> to vector<2x128xf32>
    %266 = arith.addf %264, %265 : vector<2x128xf32>
    %267 = vector.extract_strided_slice %266 {offsets = [0, 0], sizes = [2, 32], strides = [1, 1]} : vector<2x128xf32> to vector<2x32xf32>
    %268 = arith.negf %267 : vector<2x32xf32>
    %269 = math.exp %268 : vector<2x32xf32>
    %cst_83 = arith.constant 1.000000e+00 : f32
    %270 = vector.broadcast %cst_83 : f32 to vector<2x32xf32>
    %271 = arith.addf %270, %269 : vector<2x32xf32>
    %272 = arith.divf %270, %271 : vector<2x32xf32>
    %273 = vector.extract_strided_slice %266 {offsets = [0, 32], sizes = [2, 32], strides = [1, 1]} : vector<2x128xf32> to vector<2x32xf32>
    %274 = arith.negf %273 : vector<2x32xf32>
    %275 = math.exp %274 : vector<2x32xf32>
    %cst_84 = arith.constant 1.000000e+00 : f32
    %276 = vector.broadcast %cst_84 : f32 to vector<2x32xf32>
    %277 = arith.addf %276, %275 : vector<2x32xf32>
    %278 = arith.divf %276, %277 : vector<2x32xf32>
    %279 = vector.extract_strided_slice %266 {offsets = [0, 64], sizes = [2, 32], strides = [1, 1]} : vector<2x128xf32> to vector<2x32xf32>
    %280 = math.tanh %279 : vector<2x32xf32>
    %281 = vector.extract_strided_slice %266 {offsets = [0, 96], sizes = [2, 32], strides = [1, 1]} : vector<2x128xf32> to vector<2x32xf32>
    %282 = arith.negf %281 : vector<2x32xf32>
    %283 = math.exp %282 : vector<2x32xf32>
    %cst_85 = arith.constant 1.000000e+00 : f32
    %284 = vector.broadcast %cst_85 : f32 to vector<2x32xf32>
    %285 = arith.addf %284, %283 : vector<2x32xf32>
    %286 = arith.divf %284, %285 : vector<2x32xf32>
    %287 = arith.mulf %278, %232 : vector<2x32xf32>
    %288 = arith.mulf %272, %280 : vector<2x32xf32>
    %289 = arith.addf %287, %288 : vector<2x32xf32>
    %290 = math.tanh %289 : vector<2x32xf32>
    %291 = arith.mulf %286, %290 : vector<2x32xf32>
    %c4_86 = arith.constant 4 : index
    %c0_87 = arith.constant 0 : index
    %c0_88 = arith.constant 0 : index
    %292 = vector.load %arg8[%c4_86, %c0_87, %c0_88] : memref<8x2x32xf32, #tpu.memory_space<vmem>>, vector<1x2x32xf32>
    %293 = vector.shape_cast %292 : vector<1x2x32xf32> to vector<2x32xf32>
    %294 = vector.shape_cast %291 : vector<2x32xf32> to vector<1x2x32xf32>
    tpu.vector_store %arg8[%c4_86, %c0_87, %c0_88], %294 {strides = array<i32>} : memref<8x2x32xf32, #tpu.memory_space<vmem>>, vector<1x2x32xf32>,
    %c5 = arith.constant 5 : index
    %c0_89 = arith.constant 0 : index
    %c0_90 = arith.constant 0 : index
    %295 = vector.load %arg2[%c5, %c0_89, %c0_90] : memref<8x2x32xf32, #tpu.memory_space<vmem>>, vector<1x2x32xf32>
    %296 = vector.shape_cast %295 : vector<1x2x32xf32> to vector<2x32xf32>
    %cst_91 = arith.constant dense<0.000000e+00> : vector<2xf32>
    %297 = vector.multi_reduction <add>, %296, %cst_91 [1] : vector<2x32xf32> to vector<2xf32>
    %298 = vector.shape_cast %297 : vector<2xf32> to vector<2x1xf32>
    %cst_92 = arith.constant 3.200000e+01 : f32
    %299 = vector.broadcast %cst_92 : f32 to vector<2x1xf32>
    %300 = arith.divf %298, %299 : vector<2x1xf32>
    %301 = vector.broadcast %300 : vector<2x1xf32> to vector<2x32xf32>
    %302 = arith.subf %296, %301 : vector<2x32xf32>
    %303 = arith.mulf %302, %302 : vector<2x32xf32>
    %cst_93 = arith.constant dense<0.000000e+00> : vector<2xf32>
    %304 = vector.multi_reduction <add>, %303, %cst_93 [1] : vector<2x32xf32> to vector<2xf32>
    %305 = vector.shape_cast %304 : vector<2xf32> to vector<2x1xf32>
    %cst_94 = arith.constant 3.200000e+01 : f32
    %306 = vector.broadcast %cst_94 : f32 to vector<2x1xf32>
    %307 = arith.divf %305, %306 : vector<2x1xf32>
    %308 = vector.broadcast %300 : vector<2x1xf32> to vector<2x32xf32>
    %309 = arith.subf %296, %308 : vector<2x32xf32>
    %cst_95 = arith.constant 9.99999996E-13 : f32
    %310 = vector.broadcast %cst_95 : f32 to vector<2x1xf32>
    %311 = arith.addf %307, %310 : vector<2x1xf32>
    %312 = math.rsqrt %311 : vector<2x1xf32>
    %313 = vector.broadcast %312 : vector<2x1xf32> to vector<2x32xf32>
    %314 = arith.mulf %309, %313 : vector<2x32xf32>
    %315 = vector.broadcast %3 : vector<1x32xf32> to vector<2x32xf32>
    %316 = arith.mulf %314, %315 : vector<2x32xf32>
    %317 = vector.broadcast %4 : vector<1x32xf32> to vector<2x32xf32>
    %318 = arith.addf %316, %317 : vector<2x32xf32>
    %cst_96 = arith.constant dense<0.000000e+00> : vector<2x128xf32>
    %319 = tpu.matmul %318, %5, %cst_96 {dimension_numbers = #tpu.dot_dimension_numbers<[1], [0], [0], [1], [0, 0, 1, 1], [], []>} : vector<2x32xf32>, vector<32x128xf32>, vector<2x128xf32> -> vector<2x128xf32>
    %cst_97 = arith.constant dense<0.000000e+00> : vector<2x128xf32>
    %320 = tpu.matmul %291, %6, %cst_97 {dimension_numbers = #tpu.dot_dimension_numbers<[1], [0], [0], [1], [0, 0, 1, 1], [], []>} : vector<2x32xf32>, vector<32x128xf32>, vector<2x128xf32> -> vector<2x128xf32>
    %321 = arith.addf %319, %320 : vector<2x128xf32>
    %322 = vector.broadcast %7 : vector<1x128xf32> to vector<2x128xf32>
    %323 = arith.addf %321, %322 : vector<2x128xf32>
    %324 = vector.extract_strided_slice %323 {offsets = [0, 0], sizes = [2, 32], strides = [1, 1]} : vector<2x128xf32> to vector<2x32xf32>
    %325 = arith.negf %324 : vector<2x32xf32>
    %326 = math.exp %325 : vector<2x32xf32>
    %cst_98 = arith.constant 1.000000e+00 : f32
    %327 = vector.broadcast %cst_98 : f32 to vector<2x32xf32>
    %328 = arith.addf %327, %326 : vector<2x32xf32>
    %329 = arith.divf %327, %328 : vector<2x32xf32>
    %330 = vector.extract_strided_slice %323 {offsets = [0, 32], sizes = [2, 32], strides = [1, 1]} : vector<2x128xf32> to vector<2x32xf32>
    %331 = arith.negf %330 : vector<2x32xf32>
    %332 = math.exp %331 : vector<2x32xf32>
    %cst_99 = arith.constant 1.000000e+00 : f32
    %333 = vector.broadcast %cst_99 : f32 to vector<2x32xf32>
    %334 = arith.addf %333, %332 : vector<2x32xf32>
    %335 = arith.divf %333, %334 : vector<2x32xf32>
    %336 = vector.extract_strided_slice %323 {offsets = [0, 64], sizes = [2, 32], strides = [1, 1]} : vector<2x128xf32> to vector<2x32xf32>
    %337 = math.tanh %336 : vector<2x32xf32>
    %338 = vector.extract_strided_slice %323 {offsets = [0, 96], sizes = [2, 32], strides = [1, 1]} : vector<2x128xf32> to vector<2x32xf32>
    %339 = arith.negf %338 : vector<2x32xf32>
    %340 = math.exp %339 : vector<2x32xf32>
    %cst_100 = arith.constant 1.000000e+00 : f32
    %341 = vector.broadcast %cst_100 : f32 to vector<2x32xf32>
    %342 = arith.addf %341, %340 : vector<2x32xf32>
    %343 = arith.divf %341, %342 : vector<2x32xf32>
    %344 = arith.mulf %335, %289 : vector<2x32xf32>
    %345 = arith.mulf %329, %337 : vector<2x32xf32>
    %346 = arith.addf %344, %345 : vector<2x32xf32>
    %347 = math.tanh %346 : vector<2x32xf32>
    %348 = arith.mulf %343, %347 : vector<2x32xf32>
    %c5_101 = arith.constant 5 : index
    %c0_102 = arith.constant 0 : index
    %c0_103 = arith.constant 0 : index
    %349 = vector.load %arg8[%c5_101, %c0_102, %c0_103] : memref<8x2x32xf32, #tpu.memory_space<vmem>>, vector<1x2x32xf32>
    %350 = vector.shape_cast %349 : vector<1x2x32xf32> to vector<2x32xf32>
    %351 = vector.shape_cast %348 : vector<2x32xf32> to vector<1x2x32xf32>
    tpu.vector_store %arg8[%c5_101, %c0_102, %c0_103], %351 {strides = array<i32>} : memref<8x2x32xf32, #tpu.memory_space<vmem>>, vector<1x2x32xf32>,
    %c6 = arith.constant 6 : index
    %c0_104 = arith.constant 0 : index
    %c0_105 = arith.constant 0 : index
    %352 = vector.load %arg2[%c6, %c0_104, %c0_105] : memref<8x2x32xf32, #tpu.memory_space<vmem>>, vector<1x2x32xf32>
    %353 = vector.shape_cast %352 : vector<1x2x32xf32> to vector<2x32xf32>
    %cst_106 = arith.constant dense<0.000000e+00> : vector<2xf32>
    %354 = vector.multi_reduction <add>, %353, %cst_106 [1] : vector<2x32xf32> to vector<2xf32>
    %355 = vector.shape_cast %354 : vector<2xf32> to vector<2x1xf32>
    %cst_107 = arith.constant 3.200000e+01 : f32
    %356 = vector.broadcast %cst_107 : f32 to vector<2x1xf32>
    %357 = arith.divf %355, %356 : vector<2x1xf32>
    %358 = vector.broadcast %357 : vector<2x1xf32> to vector<2x32xf32>
    %359 = arith.subf %353, %358 : vector<2x32xf32>
    %360 = arith.mulf %359, %359 : vector<2x32xf32>
    %cst_108 = arith.constant dense<0.000000e+00> : vector<2xf32>
    %361 = vector.multi_reduction <add>, %360, %cst_108 [1] : vector<2x32xf32> to vector<2xf32>
    %362 = vector.shape_cast %361 : vector<2xf32> to vector<2x1xf32>
    %cst_109 = arith.constant 3.200000e+01 : f32
    %363 = vector.broadcast %cst_109 : f32 to vector<2x1xf32>
    %364 = arith.divf %362, %363 : vector<2x1xf32>
    %365 = vector.broadcast %357 : vector<2x1xf32> to vector<2x32xf32>
    %366 = arith.subf %353, %365 : vector<2x32xf32>
    %cst_110 = arith.constant 9.99999996E-13 : f32
    %367 = vector.broadcast %cst_110 : f32 to vector<2x1xf32>
    %368 = arith.addf %364, %367 : vector<2x1xf32>
    %369 = math.rsqrt %368 : vector<2x1xf32>
    %370 = vector.broadcast %369 : vector<2x1xf32> to vector<2x32xf32>
    %371 = arith.mulf %366, %370 : vector<2x32xf32>
    %372 = vector.broadcast %3 : vector<1x32xf32> to vector<2x32xf32>
    %373 = arith.mulf %371, %372 : vector<2x32xf32>
    %374 = vector.broadcast %4 : vector<1x32xf32> to vector<2x32xf32>
    %375 = arith.addf %373, %374 : vector<2x32xf32>
    %cst_111 = arith.constant dense<0.000000e+00> : vector<2x128xf32>
    %376 = tpu.matmul %375, %5, %cst_111 {dimension_numbers = #tpu.dot_dimension_numbers<[1], [0], [0], [1], [0, 0, 1, 1], [], []>} : vector<2x32xf32>, vector<32x128xf32>, vector<2x128xf32> -> vector<2x128xf32>
    %cst_112 = arith.constant dense<0.000000e+00> : vector<2x128xf32>
    %377 = tpu.matmul %348, %6, %cst_112 {dimension_numbers = #tpu.dot_dimension_numbers<[1], [0], [0], [1], [0, 0, 1, 1], [], []>} : vector<2x32xf32>, vector<32x128xf32>, vector<2x128xf32> -> vector<2x128xf32>
    %378 = arith.addf %376, %377 : vector<2x128xf32>
    %379 = vector.broadcast %7 : vector<1x128xf32> to vector<2x128xf32>
    %380 = arith.addf %378, %379 : vector<2x128xf32>
    %381 = vector.extract_strided_slice %380 {offsets = [0, 0], sizes = [2, 32], strides = [1, 1]} : vector<2x128xf32> to vector<2x32xf32>
    %382 = arith.negf %381 : vector<2x32xf32>
    %383 = math.exp %382 : vector<2x32xf32>
    %cst_113 = arith.constant 1.000000e+00 : f32
    %384 = vector.broadcast %cst_113 : f32 to vector<2x32xf32>
    %385 = arith.addf %384, %383 : vector<2x32xf32>
    %386 = arith.divf %384, %385 : vector<2x32xf32>
    %387 = vector.extract_strided_slice %380 {offsets = [0, 32], sizes = [2, 32], strides = [1, 1]} : vector<2x128xf32> to vector<2x32xf32>
    %388 = arith.negf %387 : vector<2x32xf32>
    %389 = math.exp %388 : vector<2x32xf32>
    %cst_114 = arith.constant 1.000000e+00 : f32
    %390 = vector.broadcast %cst_114 : f32 to vector<2x32xf32>
    %391 = arith.addf %390, %389 : vector<2x32xf32>
    %392 = arith.divf %390, %391 : vector<2x32xf32>
    %393 = vector.extract_strided_slice %380 {offsets = [0, 64], sizes = [2, 32], strides = [1, 1]} : vector<2x128xf32> to vector<2x32xf32>
    %394 = math.tanh %393 : vector<2x32xf32>
    %395 = vector.extract_strided_slice %380 {offsets = [0, 96], sizes = [2, 32], strides = [1, 1]} : vector<2x128xf32> to vector<2x32xf32>
    %396 = arith.negf %395 : vector<2x32xf32>
    %397 = math.exp %396 : vector<2x32xf32>
    %cst_115 = arith.constant 1.000000e+00 : f32
    %398 = vector.broadcast %cst_115 : f32 to vector<2x32xf32>
    %399 = arith.addf %398, %397 : vector<2x32xf32>
    %400 = arith.divf %398, %399 : vector<2x32xf32>
    %401 = arith.mulf %392, %346 : vector<2x32xf32>
    %402 = arith.mulf %386, %394 : vector<2x32xf32>
    %403 = arith.addf %401, %402 : vector<2x32xf32>
    %404 = math.tanh %403 : vector<2x32xf32>
    %405 = arith.mulf %400, %404 : vector<2x32xf32>
    %c6_116 = arith.constant 6 : index
    %c0_117 = arith.constant 0 : index
    %c0_118 = arith.constant 0 : index
    %406 = vector.load %arg8[%c6_116, %c0_117, %c0_118] : memref<8x2x32xf32, #tpu.memory_space<vmem>>, vector<1x2x32xf32>
    %407 = vector.shape_cast %406 : vector<1x2x32xf32> to vector<2x32xf32>
    %408 = vector.shape_cast %405 : vector<2x32xf32> to vector<1x2x32xf32>
    tpu.vector_store %arg8[%c6_116, %c0_117, %c0_118], %408 {strides = array<i32>} : memref<8x2x32xf32, #tpu.memory_space<vmem>>, vector<1x2x32xf32>,
    %c7 = arith.constant 7 : index
    %c0_119 = arith.constant 0 : index
    %c0_120 = arith.constant 0 : index
    %409 = vector.load %arg2[%c7, %c0_119, %c0_120] : memref<8x2x32xf32, #tpu.memory_space<vmem>>, vector<1x2x32xf32>
    %410 = vector.shape_cast %409 : vector<1x2x32xf32> to vector<2x32xf32>
    %cst_121 = arith.constant dense<0.000000e+00> : vector<2xf32>
    %411 = vector.multi_reduction <add>, %410, %cst_121 [1] : vector<2x32xf32> to vector<2xf32>
    %412 = vector.shape_cast %411 : vector<2xf32> to vector<2x1xf32>
    %cst_122 = arith.constant 3.200000e+01 : f32
    %413 = vector.broadcast %cst_122 : f32 to vector<2x1xf32>
    %414 = arith.divf %412, %413 : vector<2x1xf32>
    %415 = vector.broadcast %414 : vector<2x1xf32> to vector<2x32xf32>
    %416 = arith.subf %410, %415 : vector<2x32xf32>
    %417 = arith.mulf %416, %416 : vector<2x32xf32>
    %cst_123 = arith.constant dense<0.000000e+00> : vector<2xf32>
    %418 = vector.multi_reduction <add>, %417, %cst_123 [1] : vector<2x32xf32> to vector<2xf32>
    %419 = vector.shape_cast %418 : vector<2xf32> to vector<2x1xf32>
    %cst_124 = arith.constant 3.200000e+01 : f32
    %420 = vector.broadcast %cst_124 : f32 to vector<2x1xf32>
    %421 = arith.divf %419, %420 : vector<2x1xf32>
    %422 = vector.broadcast %414 : vector<2x1xf32> to vector<2x32xf32>
    %423 = arith.subf %410, %422 : vector<2x32xf32>
    %cst_125 = arith.constant 9.99999996E-13 : f32
    %424 = vector.broadcast %cst_125 : f32 to vector<2x1xf32>
    %425 = arith.addf %421, %424 : vector<2x1xf32>
    %426 = math.rsqrt %425 : vector<2x1xf32>
    %427 = vector.broadcast %426 : vector<2x1xf32> to vector<2x32xf32>
    %428 = arith.mulf %423, %427 : vector<2x32xf32>
    %429 = vector.broadcast %3 : vector<1x32xf32> to vector<2x32xf32>
    %430 = arith.mulf %428, %429 : vector<2x32xf32>
    %431 = vector.broadcast %4 : vector<1x32xf32> to vector<2x32xf32>
    %432 = arith.addf %430, %431 : vector<2x32xf32>
    %cst_126 = arith.constant dense<0.000000e+00> : vector<2x128xf32>
    %433 = tpu.matmul %432, %5, %cst_126 {dimension_numbers = #tpu.dot_dimension_numbers<[1], [0], [0], [1], [0, 0, 1, 1], [], []>} : vector<2x32xf32>, vector<32x128xf32>, vector<2x128xf32> -> vector<2x128xf32>
    %cst_127 = arith.constant dense<0.000000e+00> : vector<2x128xf32>
    %434 = tpu.matmul %405, %6, %cst_127 {dimension_numbers = #tpu.dot_dimension_numbers<[1], [0], [0], [1], [0, 0, 1, 1], [], []>} : vector<2x32xf32>, vector<32x128xf32>, vector<2x128xf32> -> vector<2x128xf32>
    %435 = arith.addf %433, %434 : vector<2x128xf32>
    %436 = vector.broadcast %7 : vector<1x128xf32> to vector<2x128xf32>
    %437 = arith.addf %435, %436 : vector<2x128xf32>
    %438 = vector.extract_strided_slice %437 {offsets = [0, 0], sizes = [2, 32], strides = [1, 1]} : vector<2x128xf32> to vector<2x32xf32>
    %439 = arith.negf %438 : vector<2x32xf32>
    %440 = math.exp %439 : vector<2x32xf32>
    %cst_128 = arith.constant 1.000000e+00 : f32
    %441 = vector.broadcast %cst_128 : f32 to vector<2x32xf32>
    %442 = arith.addf %441, %440 : vector<2x32xf32>
    %443 = arith.divf %441, %442 : vector<2x32xf32>
    %444 = vector.extract_strided_slice %437 {offsets = [0, 32], sizes = [2, 32], strides = [1, 1]} : vector<2x128xf32> to vector<2x32xf32>
    %445 = arith.negf %444 : vector<2x32xf32>
    %446 = math.exp %445 : vector<2x32xf32>
    %cst_129 = arith.constant 1.000000e+00 : f32
    %447 = vector.broadcast %cst_129 : f32 to vector<2x32xf32>
    %448 = arith.addf %447, %446 : vector<2x32xf32>
    %449 = arith.divf %447, %448 : vector<2x32xf32>
    %450 = vector.extract_strided_slice %437 {offsets = [0, 64], sizes = [2, 32], strides = [1, 1]} : vector<2x128xf32> to vector<2x32xf32>
    %451 = math.tanh %450 : vector<2x32xf32>
    %452 = vector.extract_strided_slice %437 {offsets = [0, 96], sizes = [2, 32], strides = [1, 1]} : vector<2x128xf32> to vector<2x32xf32>
    %453 = arith.negf %452 : vector<2x32xf32>
    %454 = math.exp %453 : vector<2x32xf32>
    %cst_130 = arith.constant 1.000000e+00 : f32
    %455 = vector.broadcast %cst_130 : f32 to vector<2x32xf32>
    %456 = arith.addf %455, %454 : vector<2x32xf32>
    %457 = arith.divf %455, %456 : vector<2x32xf32>
    %458 = arith.mulf %449, %403 : vector<2x32xf32>
    %459 = arith.mulf %443, %451 : vector<2x32xf32>
    %460 = arith.addf %458, %459 : vector<2x32xf32>
    %461 = math.tanh %460 : vector<2x32xf32>
    %462 = arith.mulf %457, %461 : vector<2x32xf32>
    %c7_131 = arith.constant 7 : index
    %c0_132 = arith.constant 0 : index
    %c0_133 = arith.constant 0 : index
    %463 = vector.load %arg8[%c7_131, %c0_132, %c0_133] : memref<8x2x32xf32, #tpu.memory_space<vmem>>, vector<1x2x32xf32>
    %464 = vector.shape_cast %463 : vector<1x2x32xf32> to vector<2x32xf32>
    %465 = vector.shape_cast %462 : vector<2x32xf32> to vector<1x2x32xf32>
    tpu.vector_store %arg8[%c7_131, %c0_132, %c0_133], %465 {strides = array<i32>} : memref<8x2x32xf32, #tpu.memory_space<vmem>>, vector<1x2x32xf32>,
    %c0_134 = arith.constant 0 : index
    %c0_135 = arith.constant 0 : index
    %466 = vector.load %arg11[%c0_134, %c0_135] : memref<2x32xf32, #tpu.memory_space<vmem>>, vector<2x32xf32>
    tpu.vector_store %arg11[%c0_134, %c0_135], %462 {strides = array<i32>} : memref<2x32xf32, #tpu.memory_space<vmem>>, vector<2x32xf32>,
    %c0_136 = arith.constant 0 : index
    %c0_137 = arith.constant 0 : index
    %467 = vector.load %arg12[%c0_136, %c0_137] : memref<2x32xf32, #tpu.memory_space<vmem>>, vector<2x32xf32>
    tpu.vector_store %arg12[%c0_136, %c0_137], %460 {strides = array<i32>} : memref<2x32xf32, #tpu.memory_space<vmem>>, vector<2x32xf32>,
    %c0_i32_138 = arith.constant 0 : i32
    %468 = arith.cmpi eq, %arg1, %c0_i32_138 : i32
    %469 = arith.extui %468 : i1 to i32
    %c0_i32_139 = arith.constant 0 : i32
    %470 = arith.cmpi ne, %469, %c0_i32_139 : i32
    scf.if %470 {
      %c0_140 = arith.constant 0 : index
      %c0_141 = arith.constant 0 : index
      %471 = vector.load %arg9[%c0_140, %c0_141] : memref<2x32xf32, #tpu.memory_space<vmem>>, vector<2x32xf32>
      tpu.vector_store %arg9[%c0_140, %c0_141], %462 {strides = array<i32>} : memref<2x32xf32, #tpu.memory_space<vmem>>, vector<2x32xf32>,
      %c0_142 = arith.constant 0 : index
      %c0_143 = arith.constant 0 : index
      %472 = vector.load %arg10[%c0_142, %c0_143] : memref<2x32xf32, #tpu.memory_space<vmem>>, vector<2x32xf32>
      tpu.vector_store %arg10[%c0_142, %c0_143], %460 {strides = array<i32>} : memref<2x32xf32, #tpu.memory_space<vmem>>, vector<2x32xf32>,
    } else {
    }
    return
  }
  func.func @transform_0(%arg0: i32, %arg1: i32) -> (i32, i32, i32) {
    %c0_i32 = arith.constant 0 : i32
    %c0_i32_0 = arith.constant 0 : i32
    return %arg1, %arg0, %c0_i32 : i32, i32, i32
  }
  func.func @transform_1(%arg0: i32, %arg1: i32) -> (i32, i32) {
    %c0_i32 = arith.constant 0 : i32
    %c0_i32_0 = arith.constant 0 : i32
    %c0_i32_1 = arith.constant 0 : i32
    return %c0_i32, %c0_i32_0 : i32, i32
  }
  func.func @transform_2(%arg0: i32, %arg1: i32) -> (i32, i32) {
    %c0_i32 = arith.constant 0 : i32
    %c0_i32_0 = arith.constant 0 : i32
    %c0_i32_1 = arith.constant 0 : i32
    return %c0_i32, %c0_i32_0 : i32, i32
  }
  func.func @transform_3(%arg0: i32, %arg1: i32) -> (i32, i32) {
    %c0_i32 = arith.constant 0 : i32
    %c0_i32_0 = arith.constant 0 : i32
    %c0_i32_1 = arith.constant 0 : i32
    return %c0_i32, %c0_i32_0 : i32, i32
  }
  func.func @transform_4(%arg0: i32, %arg1: i32) -> (i32, i32) {
    %c0_i32 = arith.constant 0 : i32
    %c0_i32_0 = arith.constant 0 : i32
    %c0_i32_1 = arith.constant 0 : i32
    return %c0_i32, %c0_i32_0 : i32, i32
  }
  func.func @transform_5(%arg0: i32, %arg1: i32) -> (i32, i32) {
    %c0_i32 = arith.constant 0 : i32
    %c0_i32_0 = arith.constant 0 : i32
    %c0_i32_1 = arith.constant 0 : i32
    return %c0_i32, %c0_i32_0 : i32, i32
  }
  func.func @transform_6(%arg0: i32, %arg1: i32) -> (i32, i32, i32) {
    %c0_i32 = arith.constant 0 : i32
    %c0_i32_0 = arith.constant 0 : i32
    return %arg1, %arg0, %c0_i32 : i32, i32, i32
  }
  func.func @transform_7(%arg0: i32, %arg1: i32) -> (i32, i32) {
    %c0_i32 = arith.constant 0 : i32
    %c0_i32_0 = arith.constant 0 : i32
    return %arg0, %c0_i32 : i32, i32
  }
  func.func @transform_8(%arg0: i32, %arg1: i32) -> (i32, i32) {
    %c0_i32 = arith.constant 0 : i32
    %c0_i32_0 = arith.constant 0 : i32
    return %arg0, %c0_i32 : i32, i32
  }
}

module attributes {stable_mosaic.version = 11 : i64} {
  func.func @_ffn_kernel(%arg0: i32, %arg1: memref<16x32xf32, #tpu.memory_space<vmem>>, %arg2: memref<1x32xf32, #tpu.memory_space<vmem>>, %arg3: memref<1x32xf32, #tpu.memory_space<vmem>>, %arg4: memref<1x32xf32, #tpu.memory_space<vmem>>, %arg5: memref<1x32xf32, #tpu.memory_space<vmem>>, %arg6: memref<32x32xf32, #tpu.memory_space<vmem>>, %arg7: memref<1x32xf32, #tpu.memory_space<vmem>>, %arg8: memref<16x32xf32, #tpu.memory_space<vmem>>) attributes {dimension_semantics = [#tpu.dimension_semantics<parallel>], iteration_bounds = array<i64: 1>, scalar_prefetch = 0 : i64, scratch_operands = 0 : i64, tpu.core_type = #tpu.core_type<tc>, window_params = [{transform_indices = @transform_0, window_bounds = array<i64: 16, 32>}, {pipeline_mode = #tpu.pipeline_mode<synchronous>, transform_indices = @transform_1, window_bounds = array<i64: 1, 32>}, {pipeline_mode = #tpu.pipeline_mode<synchronous>, transform_indices = @transform_2, window_bounds = array<i64: 1, 32>}, {pipeline_mode = #tpu.pipeline_mode<synchronous>, transform_indices = @transform_3, window_bounds = array<i64: 1, 32>}, {pipeline_mode = #tpu.pipeline_mode<synchronous>, transform_indices = @transform_4, window_bounds = array<i64: 1, 32>}, {pipeline_mode = #tpu.pipeline_mode<synchronous>, transform_indices = @transform_5, window_bounds = array<i64: 32, 32>}, {pipeline_mode = #tpu.pipeline_mode<synchronous>, transform_indices = @transform_6, window_bounds = array<i64: 1, 32>}, {transform_indices = @transform_7, window_bounds = array<i64: 16, 32>}]} {
    %c0 = arith.constant 0 : index
    %c0_0 = arith.constant 0 : index
    %0 = vector.load %arg1[%c0, %c0_0] : memref<16x32xf32, #tpu.memory_space<vmem>>, vector<16x32xf32>
    %c0_1 = arith.constant 0 : index
    %c0_2 = arith.constant 0 : index
    %1 = vector.load %arg2[%c0_1, %c0_2] : memref<1x32xf32, #tpu.memory_space<vmem>>, vector<1x32xf32>
    %c0_3 = arith.constant 0 : index
    %c0_4 = arith.constant 0 : index
    %2 = vector.load %arg3[%c0_3, %c0_4] : memref<1x32xf32, #tpu.memory_space<vmem>>, vector<1x32xf32>
    %c0_5 = arith.constant 0 : index
    %c0_6 = arith.constant 0 : index
    %3 = vector.load %arg4[%c0_5, %c0_6] : memref<1x32xf32, #tpu.memory_space<vmem>>, vector<1x32xf32>
    %c0_7 = arith.constant 0 : index
    %c0_8 = arith.constant 0 : index
    %4 = vector.load %arg5[%c0_7, %c0_8] : memref<1x32xf32, #tpu.memory_space<vmem>>, vector<1x32xf32>
    %c0_9 = arith.constant 0 : index
    %c0_10 = arith.constant 0 : index
    %5 = vector.load %arg6[%c0_9, %c0_10] : memref<32x32xf32, #tpu.memory_space<vmem>>, vector<32x32xf32>
    %c0_11 = arith.constant 0 : index
    %c0_12 = arith.constant 0 : index
    %6 = vector.load %arg7[%c0_11, %c0_12] : memref<1x32xf32, #tpu.memory_space<vmem>>, vector<1x32xf32>
    %cst = arith.constant dense<0.000000e+00> : vector<16xf32>
    %7 = vector.multi_reduction <add>, %0, %cst [1] : vector<16x32xf32> to vector<16xf32>
    %8 = vector.shape_cast %7 : vector<16xf32> to vector<16x1xf32>
    %cst_13 = arith.constant 3.200000e+01 : f32
    %9 = vector.broadcast %cst_13 : f32 to vector<16x1xf32>
    %10 = arith.divf %8, %9 : vector<16x1xf32>
    %11 = vector.broadcast %10 : vector<16x1xf32> to vector<16x32xf32>
    %12 = arith.subf %0, %11 : vector<16x32xf32>
    %13 = arith.mulf %12, %12 : vector<16x32xf32>
    %cst_14 = arith.constant dense<0.000000e+00> : vector<16xf32>
    %14 = vector.multi_reduction <add>, %13, %cst_14 [1] : vector<16x32xf32> to vector<16xf32>
    %15 = vector.shape_cast %14 : vector<16xf32> to vector<16x1xf32>
    %cst_15 = arith.constant 3.200000e+01 : f32
    %16 = vector.broadcast %cst_15 : f32 to vector<16x1xf32>
    %17 = arith.divf %15, %16 : vector<16x1xf32>
    %18 = vector.broadcast %10 : vector<16x1xf32> to vector<16x32xf32>
    %19 = arith.subf %0, %18 : vector<16x32xf32>
    %cst_16 = arith.constant 9.99999996E-13 : f32
    %20 = vector.broadcast %cst_16 : f32 to vector<16x1xf32>
    %21 = arith.addf %17, %20 : vector<16x1xf32>
    %22 = math.rsqrt %21 : vector<16x1xf32>
    %23 = vector.broadcast %22 : vector<16x1xf32> to vector<16x32xf32>
    %24 = arith.mulf %19, %23 : vector<16x32xf32>
    %25 = vector.broadcast %1 : vector<1x32xf32> to vector<16x32xf32>
    %26 = arith.mulf %24, %25 : vector<16x32xf32>
    %27 = vector.broadcast %2 : vector<1x32xf32> to vector<16x32xf32>
    %28 = arith.addf %26, %27 : vector<16x32xf32>
    %cst_17 = arith.constant dense<0.000000e+00> : vector<16xf32>
    %29 = vector.multi_reduction <add>, %0, %cst_17 [1] : vector<16x32xf32> to vector<16xf32>
    %30 = vector.shape_cast %29 : vector<16xf32> to vector<16x1xf32>
    %cst_18 = arith.constant 3.200000e+01 : f32
    %31 = vector.broadcast %cst_18 : f32 to vector<16x1xf32>
    %32 = arith.divf %30, %31 : vector<16x1xf32>
    %33 = vector.broadcast %32 : vector<16x1xf32> to vector<16x32xf32>
    %34 = arith.subf %0, %33 : vector<16x32xf32>
    %35 = arith.mulf %34, %34 : vector<16x32xf32>
    %cst_19 = arith.constant dense<0.000000e+00> : vector<16xf32>
    %36 = vector.multi_reduction <add>, %35, %cst_19 [1] : vector<16x32xf32> to vector<16xf32>
    %37 = vector.shape_cast %36 : vector<16xf32> to vector<16x1xf32>
    %cst_20 = arith.constant 3.200000e+01 : f32
    %38 = vector.broadcast %cst_20 : f32 to vector<16x1xf32>
    %39 = arith.divf %37, %38 : vector<16x1xf32>
    %40 = vector.broadcast %32 : vector<16x1xf32> to vector<16x32xf32>
    %41 = arith.subf %0, %40 : vector<16x32xf32>
    %cst_21 = arith.constant 9.99999996E-13 : f32
    %42 = vector.broadcast %cst_21 : f32 to vector<16x1xf32>
    %43 = arith.addf %39, %42 : vector<16x1xf32>
    %44 = math.rsqrt %43 : vector<16x1xf32>
    %45 = vector.broadcast %44 : vector<16x1xf32> to vector<16x32xf32>
    %46 = arith.mulf %41, %45 : vector<16x32xf32>
    %47 = vector.broadcast %3 : vector<1x32xf32> to vector<16x32xf32>
    %48 = arith.mulf %46, %47 : vector<16x32xf32>
    %49 = vector.broadcast %4 : vector<1x32xf32> to vector<16x32xf32>
    %50 = arith.addf %48, %49 : vector<16x32xf32>
    %cst_22 = arith.constant dense<0.000000e+00> : vector<16x32xf32>
    %51 = tpu.matmul %50, %5, %cst_22 {dimension_numbers = #tpu.dot_dimension_numbers<[1], [0], [0], [1], [0, 0, 1, 1], [], []>} : vector<16x32xf32>, vector<32x32xf32>, vector<16x32xf32> -> vector<16x32xf32>
    %52 = vector.broadcast %6 : vector<1x32xf32> to vector<16x32xf32>
    %53 = arith.addf %51, %52 : vector<16x32xf32>
    %cst_23 = arith.constant 1.702000e+00 : f32
    %54 = vector.broadcast %cst_23 : f32 to vector<16x32xf32>
    %55 = arith.mulf %54, %53 : vector<16x32xf32>
    %56 = arith.negf %55 : vector<16x32xf32>
    %57 = math.exp %56 : vector<16x32xf32>
    %cst_24 = arith.constant 1.000000e+00 : f32
    %58 = vector.broadcast %cst_24 : f32 to vector<16x32xf32>
    %59 = arith.addf %58, %57 : vector<16x32xf32>
    %60 = arith.divf %58, %59 : vector<16x32xf32>
    %61 = arith.mulf %53, %60 : vector<16x32xf32>
    %62 = arith.addf %61, %28 : vector<16x32xf32>
    %c0_25 = arith.constant 0 : index
    %c0_26 = arith.constant 0 : index
    %63 = vector.load %arg8[%c0_25, %c0_26] : memref<16x32xf32, #tpu.memory_space<vmem>>, vector<16x32xf32>
    tpu.vector_store %arg8[%c0_25, %c0_26], %62 {strides = array<i32>} : memref<16x32xf32, #tpu.memory_space<vmem>>, vector<16x32xf32>,
    return
  }
  func.func @transform_0(%arg0: i32) -> (i32, i32) {
    %c0_i32 = arith.constant 0 : i32
    %c0_i32_0 = arith.constant 0 : i32
    return %arg0, %c0_i32 : i32, i32
  }
  func.func @transform_1(%arg0: i32) -> (i32, i32) {
    %c0_i32 = arith.constant 0 : i32
    %c0_i32_0 = arith.constant 0 : i32
    %c0_i32_1 = arith.constant 0 : i32
    return %c0_i32, %c0_i32_0 : i32, i32
  }
  func.func @transform_2(%arg0: i32) -> (i32, i32) {
    %c0_i32 = arith.constant 0 : i32
    %c0_i32_0 = arith.constant 0 : i32
    %c0_i32_1 = arith.constant 0 : i32
    return %c0_i32, %c0_i32_0 : i32, i32
  }
  func.func @transform_3(%arg0: i32) -> (i32, i32) {
    %c0_i32 = arith.constant 0 : i32
    %c0_i32_0 = arith.constant 0 : i32
    %c0_i32_1 = arith.constant 0 : i32
    return %c0_i32, %c0_i32_0 : i32, i32
  }
  func.func @transform_4(%arg0: i32) -> (i32, i32) {
    %c0_i32 = arith.constant 0 : i32
    %c0_i32_0 = arith.constant 0 : i32
    %c0_i32_1 = arith.constant 0 : i32
    return %c0_i32, %c0_i32_0 : i32, i32
  }
  func.func @transform_5(%arg0: i32) -> (i32, i32) {
    %c0_i32 = arith.constant 0 : i32
    %c0_i32_0 = arith.constant 0 : i32
    %c0_i32_1 = arith.constant 0 : i32
    return %c0_i32, %c0_i32_0 : i32, i32
  }
  func.func @transform_6(%arg0: i32) -> (i32, i32) {
    %c0_i32 = arith.constant 0 : i32
    %c0_i32_0 = arith.constant 0 : i32
    %c0_i32_1 = arith.constant 0 : i32
    return %c0_i32, %c0_i32_0 : i32, i32
  }
  func.func @transform_7(%arg0: i32) -> (i32, i32) {
    %c0_i32 = arith.constant 0 : i32
    %c0_i32_0 = arith.constant 0 : i32
    return %arg0, %c0_i32 : i32, i32
  }
}

module attributes {stable_mosaic.version = 11 : i64} {
  func.func @_ffn_mem_kernel(%arg0: i32, %arg1: memref<16x32xf32, #tpu.memory_space<vmem>>, %arg2: memref<1x32xf32, #tpu.memory_space<vmem>>, %arg3: memref<1x32xf32, #tpu.memory_space<vmem>>, %arg4: memref<1x32xf32, #tpu.memory_space<vmem>>, %arg5: memref<1x32xf32, #tpu.memory_space<vmem>>, %arg6: memref<1x32xf32, #tpu.memory_space<vmem>>, %arg7: memref<1x32xf32, #tpu.memory_space<vmem>>, %arg8: memref<32x32xf32, #tpu.memory_space<vmem>>, %arg9: memref<1x32xf32, #tpu.memory_space<vmem>>, %arg10: memref<16x32xf32, #tpu.memory_space<vmem>>, %arg11: memref<16x32xf32, #tpu.memory_space<vmem>>) attributes {dimension_semantics = [#tpu.dimension_semantics<parallel>], iteration_bounds = array<i64: 1>, scalar_prefetch = 0 : i64, scratch_operands = 0 : i64, tpu.core_type = #tpu.core_type<tc>, window_params = [{transform_indices = @transform_0, window_bounds = array<i64: 16, 32>}, {pipeline_mode = #tpu.pipeline_mode<synchronous>, transform_indices = @transform_1, window_bounds = array<i64: 1, 32>}, {pipeline_mode = #tpu.pipeline_mode<synchronous>, transform_indices = @transform_2, window_bounds = array<i64: 1, 32>}, {pipeline_mode = #tpu.pipeline_mode<synchronous>, transform_indices = @transform_3, window_bounds = array<i64: 1, 32>}, {pipeline_mode = #tpu.pipeline_mode<synchronous>, transform_indices = @transform_4, window_bounds = array<i64: 1, 32>}, {pipeline_mode = #tpu.pipeline_mode<synchronous>, transform_indices = @transform_5, window_bounds = array<i64: 1, 32>}, {pipeline_mode = #tpu.pipeline_mode<synchronous>, transform_indices = @transform_6, window_bounds = array<i64: 1, 32>}, {pipeline_mode = #tpu.pipeline_mode<synchronous>, transform_indices = @transform_7, window_bounds = array<i64: 32, 32>}, {pipeline_mode = #tpu.pipeline_mode<synchronous>, transform_indices = @transform_8, window_bounds = array<i64: 1, 32>}, {transform_indices = @transform_9, window_bounds = array<i64: 16, 32>}, {transform_indices = @transform_10, window_bounds = array<i64: 16, 32>}]} {
    %c0 = arith.constant 0 : index
    %c0_0 = arith.constant 0 : index
    %0 = vector.load %arg1[%c0, %c0_0] : memref<16x32xf32, #tpu.memory_space<vmem>>, vector<16x32xf32>
    %c0_1 = arith.constant 0 : index
    %c0_2 = arith.constant 0 : index
    %1 = vector.load %arg6[%c0_1, %c0_2] : memref<1x32xf32, #tpu.memory_space<vmem>>, vector<1x32xf32>
    %c0_3 = arith.constant 0 : index
    %c0_4 = arith.constant 0 : index
    %2 = vector.load %arg7[%c0_3, %c0_4] : memref<1x32xf32, #tpu.memory_space<vmem>>, vector<1x32xf32>
    %cst = arith.constant dense<0.000000e+00> : vector<16xf32>
    %3 = vector.multi_reduction <add>, %0, %cst [1] : vector<16x32xf32> to vector<16xf32>
    %4 = vector.shape_cast %3 : vector<16xf32> to vector<16x1xf32>
    %cst_5 = arith.constant 3.200000e+01 : f32
    %5 = vector.broadcast %cst_5 : f32 to vector<16x1xf32>
    %6 = arith.divf %4, %5 : vector<16x1xf32>
    %7 = vector.broadcast %6 : vector<16x1xf32> to vector<16x32xf32>
    %8 = arith.subf %0, %7 : vector<16x32xf32>
    %9 = arith.mulf %8, %8 : vector<16x32xf32>
    %cst_6 = arith.constant dense<0.000000e+00> : vector<16xf32>
    %10 = vector.multi_reduction <add>, %9, %cst_6 [1] : vector<16x32xf32> to vector<16xf32>
    %11 = vector.shape_cast %10 : vector<16xf32> to vector<16x1xf32>
    %cst_7 = arith.constant 3.200000e+01 : f32
    %12 = vector.broadcast %cst_7 : f32 to vector<16x1xf32>
    %13 = arith.divf %11, %12 : vector<16x1xf32>
    %14 = vector.broadcast %6 : vector<16x1xf32> to vector<16x32xf32>
    %15 = arith.subf %0, %14 : vector<16x32xf32>
    %cst_8 = arith.constant 9.99999996E-13 : f32
    %16 = vector.broadcast %cst_8 : f32 to vector<16x1xf32>
    %17 = arith.addf %13, %16 : vector<16x1xf32>
    %18 = math.rsqrt %17 : vector<16x1xf32>
    %19 = vector.broadcast %18 : vector<16x1xf32> to vector<16x32xf32>
    %20 = arith.mulf %15, %19 : vector<16x32xf32>
    %21 = vector.broadcast %1 : vector<1x32xf32> to vector<16x32xf32>
    %22 = arith.mulf %20, %21 : vector<16x32xf32>
    %23 = vector.broadcast %2 : vector<1x32xf32> to vector<16x32xf32>
    %24 = arith.addf %22, %23 : vector<16x32xf32>
    %c0_9 = arith.constant 0 : index
    %c0_10 = arith.constant 0 : index
    %25 = vector.load %arg11[%c0_9, %c0_10] : memref<16x32xf32, #tpu.memory_space<vmem>>, vector<16x32xf32>
    tpu.vector_store %arg11[%c0_9, %c0_10], %24 {strides = array<i32>} : memref<16x32xf32, #tpu.memory_space<vmem>>, vector<16x32xf32>,
    %c0_11 = arith.constant 0 : index
    %c0_12 = arith.constant 0 : index
    %26 = vector.load %arg2[%c0_11, %c0_12] : memref<1x32xf32, #tpu.memory_space<vmem>>, vector<1x32xf32>
    %c0_13 = arith.constant 0 : index
    %c0_14 = arith.constant 0 : index
    %27 = vector.load %arg3[%c0_13, %c0_14] : memref<1x32xf32, #tpu.memory_space<vmem>>, vector<1x32xf32>
    %c0_15 = arith.constant 0 : index
    %c0_16 = arith.constant 0 : index
    %28 = vector.load %arg4[%c0_15, %c0_16] : memref<1x32xf32, #tpu.memory_space<vmem>>, vector<1x32xf32>
    %c0_17 = arith.constant 0 : index
    %c0_18 = arith.constant 0 : index
    %29 = vector.load %arg5[%c0_17, %c0_18] : memref<1x32xf32, #tpu.memory_space<vmem>>, vector<1x32xf32>
    %c0_19 = arith.constant 0 : index
    %c0_20 = arith.constant 0 : index
    %30 = vector.load %arg8[%c0_19, %c0_20] : memref<32x32xf32, #tpu.memory_space<vmem>>, vector<32x32xf32>
    %c0_21 = arith.constant 0 : index
    %c0_22 = arith.constant 0 : index
    %31 = vector.load %arg9[%c0_21, %c0_22] : memref<1x32xf32, #tpu.memory_space<vmem>>, vector<1x32xf32>
    %cst_23 = arith.constant dense<0.000000e+00> : vector<16xf32>
    %32 = vector.multi_reduction <add>, %0, %cst_23 [1] : vector<16x32xf32> to vector<16xf32>
    %33 = vector.shape_cast %32 : vector<16xf32> to vector<16x1xf32>
    %cst_24 = arith.constant 3.200000e+01 : f32
    %34 = vector.broadcast %cst_24 : f32 to vector<16x1xf32>
    %35 = arith.divf %33, %34 : vector<16x1xf32>
    %36 = vector.broadcast %35 : vector<16x1xf32> to vector<16x32xf32>
    %37 = arith.subf %0, %36 : vector<16x32xf32>
    %38 = arith.mulf %37, %37 : vector<16x32xf32>
    %cst_25 = arith.constant dense<0.000000e+00> : vector<16xf32>
    %39 = vector.multi_reduction <add>, %38, %cst_25 [1] : vector<16x32xf32> to vector<16xf32>
    %40 = vector.shape_cast %39 : vector<16xf32> to vector<16x1xf32>
    %cst_26 = arith.constant 3.200000e+01 : f32
    %41 = vector.broadcast %cst_26 : f32 to vector<16x1xf32>
    %42 = arith.divf %40, %41 : vector<16x1xf32>
    %43 = vector.broadcast %35 : vector<16x1xf32> to vector<16x32xf32>
    %44 = arith.subf %0, %43 : vector<16x32xf32>
    %cst_27 = arith.constant 9.99999996E-13 : f32
    %45 = vector.broadcast %cst_27 : f32 to vector<16x1xf32>
    %46 = arith.addf %42, %45 : vector<16x1xf32>
    %47 = math.rsqrt %46 : vector<16x1xf32>
    %48 = vector.broadcast %47 : vector<16x1xf32> to vector<16x32xf32>
    %49 = arith.mulf %44, %48 : vector<16x32xf32>
    %50 = vector.broadcast %26 : vector<1x32xf32> to vector<16x32xf32>
    %51 = arith.mulf %49, %50 : vector<16x32xf32>
    %52 = vector.broadcast %27 : vector<1x32xf32> to vector<16x32xf32>
    %53 = arith.addf %51, %52 : vector<16x32xf32>
    %cst_28 = arith.constant dense<0.000000e+00> : vector<16xf32>
    %54 = vector.multi_reduction <add>, %0, %cst_28 [1] : vector<16x32xf32> to vector<16xf32>
    %55 = vector.shape_cast %54 : vector<16xf32> to vector<16x1xf32>
    %cst_29 = arith.constant 3.200000e+01 : f32
    %56 = vector.broadcast %cst_29 : f32 to vector<16x1xf32>
    %57 = arith.divf %55, %56 : vector<16x1xf32>
    %58 = vector.broadcast %57 : vector<16x1xf32> to vector<16x32xf32>
    %59 = arith.subf %0, %58 : vector<16x32xf32>
    %60 = arith.mulf %59, %59 : vector<16x32xf32>
    %cst_30 = arith.constant dense<0.000000e+00> : vector<16xf32>
    %61 = vector.multi_reduction <add>, %60, %cst_30 [1] : vector<16x32xf32> to vector<16xf32>
    %62 = vector.shape_cast %61 : vector<16xf32> to vector<16x1xf32>
    %cst_31 = arith.constant 3.200000e+01 : f32
    %63 = vector.broadcast %cst_31 : f32 to vector<16x1xf32>
    %64 = arith.divf %62, %63 : vector<16x1xf32>
    %65 = vector.broadcast %57 : vector<16x1xf32> to vector<16x32xf32>
    %66 = arith.subf %0, %65 : vector<16x32xf32>
    %cst_32 = arith.constant 9.99999996E-13 : f32
    %67 = vector.broadcast %cst_32 : f32 to vector<16x1xf32>
    %68 = arith.addf %64, %67 : vector<16x1xf32>
    %69 = math.rsqrt %68 : vector<16x1xf32>
    %70 = vector.broadcast %69 : vector<16x1xf32> to vector<16x32xf32>
    %71 = arith.mulf %66, %70 : vector<16x32xf32>
    %72 = vector.broadcast %28 : vector<1x32xf32> to vector<16x32xf32>
    %73 = arith.mulf %71, %72 : vector<16x32xf32>
    %74 = vector.broadcast %29 : vector<1x32xf32> to vector<16x32xf32>
    %75 = arith.addf %73, %74 : vector<16x32xf32>
    %cst_33 = arith.constant dense<0.000000e+00> : vector<16x32xf32>
    %76 = tpu.matmul %75, %30, %cst_33 {dimension_numbers = #tpu.dot_dimension_numbers<[1], [0], [0], [1], [0, 0, 1, 1], [], []>} : vector<16x32xf32>, vector<32x32xf32>, vector<16x32xf32> -> vector<16x32xf32>
    %77 = vector.broadcast %31 : vector<1x32xf32> to vector<16x32xf32>
    %78 = arith.addf %76, %77 : vector<16x32xf32>
    %cst_34 = arith.constant 1.702000e+00 : f32
    %79 = vector.broadcast %cst_34 : f32 to vector<16x32xf32>
    %80 = arith.mulf %79, %78 : vector<16x32xf32>
    %81 = arith.negf %80 : vector<16x32xf32>
    %82 = math.exp %81 : vector<16x32xf32>
    %cst_35 = arith.constant 1.000000e+00 : f32
    %83 = vector.broadcast %cst_35 : f32 to vector<16x32xf32>
    %84 = arith.addf %83, %82 : vector<16x32xf32>
    %85 = arith.divf %83, %84 : vector<16x32xf32>
    %86 = arith.mulf %78, %85 : vector<16x32xf32>
    %87 = arith.addf %86, %53 : vector<16x32xf32>
    %c0_36 = arith.constant 0 : index
    %c0_37 = arith.constant 0 : index
    %88 = vector.load %arg10[%c0_36, %c0_37] : memref<16x32xf32, #tpu.memory_space<vmem>>, vector<16x32xf32>
    tpu.vector_store %arg10[%c0_36, %c0_37], %87 {strides = array<i32>} : memref<16x32xf32, #tpu.memory_space<vmem>>, vector<16x32xf32>,
    return
  }
  func.func @transform_0(%arg0: i32) -> (i32, i32) {
    %c0_i32 = arith.constant 0 : i32
    %c0_i32_0 = arith.constant 0 : i32
    return %arg0, %c0_i32 : i32, i32
  }
  func.func @transform_1(%arg0: i32) -> (i32, i32) {
    %c0_i32 = arith.constant 0 : i32
    %c0_i32_0 = arith.constant 0 : i32
    %c0_i32_1 = arith.constant 0 : i32
    return %c0_i32, %c0_i32_0 : i32, i32
  }
  func.func @transform_2(%arg0: i32) -> (i32, i32) {
    %c0_i32 = arith.constant 0 : i32
    %c0_i32_0 = arith.constant 0 : i32
    %c0_i32_1 = arith.constant 0 : i32
    return %c0_i32, %c0_i32_0 : i32, i32
  }
  func.func @transform_3(%arg0: i32) -> (i32, i32) {
    %c0_i32 = arith.constant 0 : i32
    %c0_i32_0 = arith.constant 0 : i32
    %c0_i32_1 = arith.constant 0 : i32
    return %c0_i32, %c0_i32_0 : i32, i32
  }
  func.func @transform_4(%arg0: i32) -> (i32, i32) {
    %c0_i32 = arith.constant 0 : i32
    %c0_i32_0 = arith.constant 0 : i32
    %c0_i32_1 = arith.constant 0 : i32
    return %c0_i32, %c0_i32_0 : i32, i32
  }
  func.func @transform_5(%arg0: i32) -> (i32, i32) {
    %c0_i32 = arith.constant 0 : i32
    %c0_i32_0 = arith.constant 0 : i32
    %c0_i32_1 = arith.constant 0 : i32
    return %c0_i32, %c0_i32_0 : i32, i32
  }
  func.func @transform_6(%arg0: i32) -> (i32, i32) {
    %c0_i32 = arith.constant 0 : i32
    %c0_i32_0 = arith.constant 0 : i32
    %c0_i32_1 = arith.constant 0 : i32
    return %c0_i32, %c0_i32_0 : i32, i32
  }
  func.func @transform_7(%arg0: i32) -> (i32, i32) {
    %c0_i32 = arith.constant 0 : i32
    %c0_i32_0 = arith.constant 0 : i32
    %c0_i32_1 = arith.constant 0 : i32
    return %c0_i32, %c0_i32_0 : i32, i32
  }
  func.func @transform_8(%arg0: i32) -> (i32, i32) {
    %c0_i32 = arith.constant 0 : i32
    %c0_i32_0 = arith.constant 0 : i32
    %c0_i32_1 = arith.constant 0 : i32
    return %c0_i32, %c0_i32_0 : i32, i32
  }
  func.func @transform_9(%arg0: i32) -> (i32, i32) {
    %c0_i32 = arith.constant 0 : i32
    %c0_i32_0 = arith.constant 0 : i32
    return %arg0, %c0_i32 : i32, i32
  }
  func.func @transform_10(%arg0: i32) -> (i32, i32) {
    %c0_i32 = arith.constant 0 : i32
    %c0_i32_0 = arith.constant 0 : i32
    return %arg0, %c0_i32 : i32, i32
  }
}

</mosaic_0001>

<bundles_post_ra>
// kernel: sharnn_model_forward.8
= control target key start
LH: loop header
LB: loop body
LE: loop exit
PB: predicated region body
PF: predicated region fallthrough
CT: control target
= control target key end

     0   :  { %s791_s18 = smov 0   ;;  %s793_s19 = smov 0   ;;  %s854_s0 = inlined_call_operand.vmem [shape: f32[2,8,32], index: 0, kind: input, shape index: {}]   ;;  %s855_s1 = inlined_call_operand.vmem [shape: f32[2,8,32], index: 1, kind: input, shape index: {}]   ;;  %s856_s2 = inlined_call_operand.vmem [shape: f32[2,8,32], index: 2, kind: input, shape index: {}]   ;;  %s857_s3 = inlined_call_operand.vmem [shape: f32[1,32], index: 3, kind: input, shape index: {}]   ;;  %s858_s4 = inlined_call_operand.vmem [shape: f32[1,32], index: 4, kind: input, shape index: {}]   ;;  %s859_s5 = inlined_call_operand.vmem [shape: f32[2,8,32], index: 5, kind: output, shape index: {}]  }
   0x1   :  { %s795_s20 = smov 0  }
   0x2 LB: > { %s34_s21 = sadd.s32 1, %s751_s19  ;;  %p671_p0 = scmp.ge.s32.totalorder %s755_s20, 1  ;;  %s755_s20 = sphi %s795_s20, %s15_s20   ;;  %s751_s19 = sphi %s793_s19, %s861_s19   ;;  %s747_s18 = sphi %s791_s18, %s860_s18  }
   0x3   : > { %p36_p1 = scmp.ge.s32.totalorder %s34_s21, 2  ;;  %p240_p2 = scmp.lt.s32.totalorder %s755_s20, 3 }
   0x5   : > { %s863_s21 = smov (%p36_p1, %s34_s21), 0  ;;  %p241_p3 = pnand %p671_p0, %p240_p2 }
   0x6   : > { %p286_p4 = scmp.lt.s32.totalorder (!%p241_p3), %s747_s18, 1  ;;  %vm321_vm0 = vcmask (!%p241_p3), 261120   ;;  %v757_v0 = vmov (!%p241_p3), 0.0   ;;  %vm758_vm1 = vmmov (!%p241_p3), 0   ;;  %v676_v1 = vld [vmem:[%s857_s3] ss:$0 sm:$0xff] (!%p241_p3)  ;;  %v426_v6 = vlaneseq (!%p241_p3) }
   0x7   : > { %244 = sbr.rel (%p241_p3) target bundleno = 823 (0x337), region = 40  ;;  %687 = vmatprep.subr.mxu0 (!%p241_p3), %v757_v0  ;;  %322 = vst.msk [vmem:[#allocation4] sm:$0xff] (!%p241_p3), %vm321_vm0, %v757_v0  ;;  %689 = vmatprep.mubr.msk.f32.mxu0 (!%p241_p3), %vm758_vm1, %v757_v0  ;;  %vm318_vm2 = vcmask (!%p241_p3), 7168   ;;  %v759_v5 = vmov (!%p241_p3), -1e+30   ;;  %vm437_vm4 = vcmask (!%p241_p3), 64512  }
   0x8   : > { %692 = vmatprep.subr.mxu1 (!%p241_p3), %v757_v0  ;;  %694 = vmatprep.mubr.msk.f32.mxu1 (!%p241_p3), %vm758_vm1, %v757_v0  ;;  %319 = vst.msk [vmem:[#allocation2] sm:$0xff] (!%p241_p3), %vm318_vm2, %v759_v5  ;;  %320 = vst.msk [vmem:[#allocation3] sm:$0xff] (!%p241_p3), %vm318_vm2, %v757_v0  ;;  %v427_v7 = vshrl.u32 (!%p241_p3), %v426_v6, 7  ;;  %v431_v8 = vand.u32 (!%p241_p3), 127, %v426_v6  ;;  %v760_v14 = vmov (!%p241_p3), 0  }
   0x9   : > { %725 = vset.pattern.permute.xlu0 (!%p241_p3), %v760_v14  ;;  %726 = vset.pattern.permute.xlu1 (!%p241_p3), %v760_v14  ;;  %v677_v19 = vld [vmem:[%s858_s4] ss:$0 sm:$0xff] (!%p241_p3) }
   0xa   : > { %vm434_vm3 = vcmp.gt.s32.totalorder (!%p241_p3), %v431_v8, %v427_v7 }
   0xe   : > { %s865_s18 = smov (!%p286_p4, %s747_s18), 1  ;;  %v461_v34 = vld [vmem:[#allocation4] sm:$0xff] }
   0xf   : > { %s810_s22 = sshll.u32 %s865_s18, 3  ;;  %v436_v15 = vld [vmem:[#allocation2] sm:$0xff]  ;;  %v453_v28 = vld [vmem:[#allocation3] sm:$0xff] }
  0x10   : > { %s299_s27 = scalar_lea.vmem %s855_s1, %s810_s22  ;;  %s292_s30 = scalar_lea.vmem %s854_s0, %s810_s22 }
  0x11   : > { %v331_v2 = vld [vmem:[%s299_s27] sm:$0xff]  ;;  %s306_s10 = scalar_lea.vmem %s856_s2, %s810_s22  ;;  %s313_s13 = scalar_lea.vmem %s859_s5, %s810_s22 }
  0x12   : > { %v339_v3 = vmul.f32 %v676_v1, %v331_v2  ;;  %v330_v4 = vld [vmem:[%s292_s30] sm:$0xff]  ;;  %v347_v20 = vmul.f32 %v677_v19, %v331_v2 }
  0x13   : > { %v556_v41 = vld [vmem:[%s306_s10] sm:$0xff] }
  0x14   : > { %688 = vmatpush3.xpose.msk.msra.mxu0 %vm321_vm0, %v339_v3  ;;  %693 = vmatpush3.msra.mxu1 %v347_v20 }
  0x17   : > { %690 = vmatmul.mubr.msk.f32.vlgmr.msra.gmra.mrb[0].mxu0 %vm321_vm0, %v330_v4 }
  0xea   : > { %v421_v9 = vpop.f32.mrb[0].mxu0 }
  0xeb   : > { %v425_v10 = vmul.f32 0.17677669, %v421_v9  ;;  %v691_v11 = vpop.f32.mrb[1].mxu0 }
  0xed   : > { %v435_v12 = vsel %vm434_vm3, -1e+30, %v425_v10 }
  0xee   : > { %v438_v13 = vsel %vm437_vm4, %v435_v12, -inf }
  0xef   : > { %439 = vmax.xlane.f32.xlu0 %v438_v13 }
 0x17c   : > { %v440_v16 = vpop.xlane.xlu0 %439 }
 0x17d   : > { %v441_v17 = vmax.f32 %v436_v15, %v440_v16 }
 0x17f   : > { %v442_v18 = vsub.f32 %v436_v15, %v441_v17  ;;  %543 = vst.msk [vmem:[#allocation2] sm:$0xff] %vm318_vm2, %v441_v17  ;;  %447 = vperm.xlu0 %725, %v441_v17  }
 0x181   : > { %v443_v26 = vmul.f32 1.442695, %v442_v18 }
 0x1fe   : > { %v448_v21 = vpop.permute.xlu0 %447 }
 0x1ff   : > { %v450_v22 = vsub.f32 %v435_v12, %v448_v21 }
 0x201   : > { %v451_v23 = vmul.f32 1.442695, %v450_v22 }
 0x203   : > { %727 = vpow2.f32 %v451_v23 }
 0x204   : > { %729 = vpow2.f32 %v443_v26 }
 0x20d   : > { %v728_v24 = vpop.eup %727 }
 0x20e   : > { %695 = vmatmul.mubr.msk.f32.vlgmr.msra.gmra.mrb[0].mxu1 %vm437_vm4, %v728_v24  ;;  %v455_v25 = vsel %vm437_vm4, %v728_v24, 0.0  ;;  %v730_v27 = vpop.eup %729 }
 0x20f   : > { %456 = vadd.xlane.f32.xlu1 %v455_v25  ;;  %v454_v29 = vmul.f32 %v730_v27, %v453_v28 }
 0x220   : > { %464 = vperm.xlu1 %726, %v730_v27  }
 0x29c   : > { %v457_v30 = vpop.xlane.xlu1 %456 }
 0x29d   : > { %v458_v31 = vadd.f32 %v457_v30, %v454_v29 }
 0x29f   : > { %460 = vst.msk [vmem:[#allocation3] sm:$0xff] %vm318_vm2, %v458_v31 }
 0x2a0   : > { %v465_v35 = vpop.permute.xlu1 %464 }
 0x2a1   : > { %v467_v36 = vmul.f32 %v465_v35, %v461_v34 }
 0x2a6   : > { %v547_v32 = vld [vmem:[#allocation3] sm:$0xff] }
 0x2a7   : > { %731 = vrcp.f32 %v547_v32 }
 0x2b1   : > { %v732_v33 = vpop.eup %731 }
 0x2b2   : > { %552 = vperm.xlu1 %726, %v732_v33  }
 0x2e1   : > { %v537_v37 = vpop.f32.mrb[0].mxu1 }
 0x2e2   : > { %v541_v38 = vadd.f32 %v537_v37, %v467_v36  ;;  %v696_v39 = vpop.f32.mrb[1].mxu1 }
 0x2e4   : > { %542 = vst.msk [vmem:[#allocation4] sm:$0xff] %vm321_vm0, %v541_v38 }
 0x2eb   : > { %v549_v40 = vld [vmem:[#allocation4] sm:$0xff] }
 0x331   : > { %v553_v42 = vpop.permute.xlu1 %552 }
 0x332   : > { %v555_v43 = vmul.f32 %v553_v42, %v549_v40 }
 0x334   : > { %v557_v44 = vadd.f32 %v556_v41, %v555_v43 }
 0x336   : > { %559 = vst.msk [vmem:[%s313_s13] sm:$0xff] %vm321_vm0, %v557_v44 }
 0x337 PF: > { %s15_s20 = sadd.s32 1, %s755_s20   ;;  %s860_s18 = smov %s751_s19 }
 0x338   : > { %p12_p5 = scmp.ge.s32.totalorder %s15_s20, 4   ;;  %s861_s19 = smov %s863_s21 }
 0x33a   :  { %14 = sbr.rel (!%p12_p5) target bundleno = 2 (0x2), region = 88 }

// kernel: sharnn_model_forward.7
= control target key start
LH: loop header
LB: loop body
LE: loop exit
PB: predicated region body
PF: predicated region fallthrough
CT: control target
= control target key end

     0   :  { %vm41_vm0 = vcmask 261120   ;;  %s431_s0 = inlined_call_operand.vmem [shape: f32[16,32], index: 0, kind: input, shape index: {}]   ;;  %s432_s5 = inlined_call_operand.vmem [shape: f32[32,32], index: 5, kind: input, shape index: {}]   ;;  %s433_s1 = inlined_call_operand.vmem [shape: f32[1,32], index: 1, kind: input, shape index: {}]   ;;  %s434_s3 = inlined_call_operand.vmem [shape: f32[1,32], index: 3, kind: input, shape index: {}]   ;;  %s435_s2 = inlined_call_operand.vmem [shape: f32[1,32], index: 2, kind: input, shape index: {}]   ;;  %s436_s4 = inlined_call_operand.vmem [shape: f32[1,32], index: 4, kind: input, shape index: {}]   ;;  %s437_s11 = inlined_call_operand.vmem [shape: f32[16,32], index: 11, kind: output, shape index: {1}]   ;;  %s438_s6 = inlined_call_operand.vmem [shape: f32[1,32], index: 6, kind: input, shape index: {}]   ;;  %s439_s7 = inlined_call_operand.vmem [shape: f32[1,32], index: 7, kind: input, shape index: {}]   ;;  %s440_s8 = inlined_call_operand.vmem [shape: f32[1,32], index: 8, kind: input, shape index: {}]   ;;  %s441_s9 = inlined_call_operand.vmem [shape: f32[1,32], index: 9, kind: input, shape index: {}]   ;;  %s442_s10 = inlined_call_operand.vmem [shape: f32[16,32], index: 10, kind: output, shape index: {0}]  }
   0x1   :  { %v37_v0 = vld [vmem:[%s431_s0] sm:$0xff]  ;;  %v38_v1 = vld [vmem:[%s431_s0 + $0x8] sm:$0xff]  ;;  %v107_v16 = vld [vmem:[%s432_s5 + $0x10] sm:$0xff] }
   0x2   :  { %v42_v2 = vsel %vm41_vm0, %v37_v0, 0.0  ;;  %v45_v3 = vsel %vm41_vm0, %v38_v1, 0.0  ;;  %v105_v14 = vld [vmem:[%s432_s5] sm:$0xff]  ;;  %v106_v15 = vld [vmem:[%s432_s5 + $0x8] sm:$0xff]  ;;  %v108_v18 = vld [vmem:[%s432_s5 + $0x18] sm:$0xff] }
   0x3   :  { %43 = vadd.xlane.f32.xlu0 %v42_v2  ;;  %v287_v17 = vpack.c.bf16 %v106_v15, %v105_v14  ;;  %v291_v19 = vpack.c.bf16 %v108_v18, %v107_v16  ;;  %v260_v27 = vld [vmem:[%s433_s1] ss:$0 sm:$0xff] }
   0x4   :  { %v262_v28 = vld [vmem:[%s434_s3] ss:$0 sm:$0xff] }
   0x5   :  { %288 = vmatprep.subr.bf16.mxu0 %v287_v17  ;;  %v261_v30 = vld [vmem:[%s435_s2] ss:$0 sm:$0xff] }
   0x6   :  { %290 = vmatpush3.bf16.msra.mxu0 %v287_v17  ;;  %v263_v31 = vld [vmem:[%s436_s4] ss:$0 sm:$0xff] }
   0x7   :  { %46 = vadd.xlane.f32.xlu0 %v45_v3  ;;  %292 = vmatprep.subr.bf16.mxu0 %v291_v19  ;;  %v264_v42 = vld [vmem:[%s438_s6] ss:$0 sm:$0xff] }
   0x8   :  { %v267_v2 = vld [vmem:[%s439_s7] ss:$0 sm:$0xff] }
   0xa   :  { %294 = vmatpush3.bf16.msra.mxu0 %v291_v19 }
  0x90   :  { %v44_v4 = vpop.xlane.xlu0 %43 }
  0x91   :  { %v49_v5 = vmul.f32 0.03125, %v44_v4 }
  0x93   :  { %v51_v6 = vsub.f32 %v37_v0, %v49_v5  ;;  %v268_v5 = vld [vmem:[%s440_s8] ss:$0 sm:$0xff] }
  0x94   :  { %v47_v7 = vpop.xlane.xlu0 %46 }
  0x95   :  { %v50_v8 = vmul.f32 0.03125, %v47_v7  ;;  %v53_v9 = vmul.f32 %v51_v6, %v51_v6 }
  0x97   :  { %v52_v10 = vsub.f32 %v38_v1, %v50_v8  ;;  %v55_v11 = vsel %vm41_vm0, %v53_v9, 0.0  ;;  %v269_v8 = vld [vmem:[%s441_s9] ss:$0 sm:$0xff] }
  0x98   :  { %56 = vadd.xlane.f32.xlu1 %v55_v11 }
  0x99   :  { %v54_v12 = vmul.f32 %v52_v10, %v52_v10 }
  0x9b   :  { %v58_v13 = vsel %vm41_vm0, %v54_v12, 0.0 }
  0x9c   :  { %59 = vadd.xlane.f32.xlu1 %v58_v13 }
 0x125   :  { %v57_v20 = vpop.xlane.xlu1 %56 }
 0x126   :  { %v61_v21 = vmul.f32 0.03125, %v57_v20 }
 0x128   :  { %v63_v22 = vadd.f32 1e-12, %v61_v21 }
 0x129   :  { %v60_v23 = vpop.xlane.xlu1 %59 }
 0x12a   :  { %295 = vrsqrt.f32 %v63_v22  ;;  %v62_v24 = vmul.f32 0.03125, %v60_v23 }
 0x12c   :  { %v64_v25 = vadd.f32 1e-12, %v62_v24 }
 0x12e   :  { %297 = vrsqrt.f32 %v64_v25 }
 0x134   :  { %v296_v26 = vpop.eup %295 }
 0x135   :  { %v67_v29 = vmul.f32 %v296_v26, %v51_v6 }
 0x137   :  { %v75_v32 = vmul.f32 %v260_v27, %v67_v29  ;;  %v95_v33 = vmul.f32 %v262_v28, %v67_v29 }
 0x138   :  { %v298_v34 = vpop.eup %297 }
 0x139   :  { %v68_v35 = vmul.f32 %v298_v34, %v52_v10  ;;  %v83_v36 = vadd.f32 %v261_v30, %v75_v32  ;;  %v103_v37 = vadd.f32 %v263_v31, %v95_v33 }
 0x13b   :  { %v76_v38 = vmul.f32 %v260_v27, %v68_v35  ;;  %85 = vst.msk [vmem:[%s437_s11] sm:$0xff] %vm41_vm0, %v83_v36  ;;  %v96_v39 = vmul.f32 %v262_v28, %v68_v35  ;;  %284 = vmatprep.mubr.msk.f32.mxu0 %vm41_vm0, %v103_v37 }
 0x13d   :  { %v84_v40 = vadd.f32 %v261_v30, %v76_v38  ;;  %v104_v41 = vadd.f32 %v263_v31, %v96_v39 }
 0x13f   :  { %86 = vst.msk [vmem:[%s437_s11 + $0x8] sm:$0xff] %vm41_vm0, %v84_v40  ;;  %285 = vmatmul.mubr.msk.f32.vlgmr.msra.gmra.mrb[0].mxu0 %vm41_vm0, %v104_v41 }
 0x212   :  { %v286_v43 = vpop.f32.mrb[0].mxu0 }
 0x213   :  { %v194_v44 = vadd.f32 %v286_v43, %v264_v42  ;;  %v188_v45 = vpop.f32.mrb[1].mxu0 }
 0x214   :  { %v189_v46 = vadd.f32 %v264_v42, %v188_v45 }
 0x215   :  { %v203_v47 = vsel %vm41_vm0, %v194_v44, 0.0 }
 0x216   :  { %204 = vadd.xlane.f32.xlu1 %v203_v47  ;;  %v200_v48 = vsel %vm41_vm0, %v189_v46, 0.0 }
 0x217   :  { %201 = vadd.xlane.f32.xlu0 %v200_v48 }
 0x2a3   :  { %v205_v49 = vpop.xlane.xlu1 %204 }
 0x2a4   :  { %v207_v50 = vmul.f32 0.03125, %v205_v49  ;;  %v202_v51 = vpop.xlane.xlu0 %201 }
 0x2a5   :  { %v206_v52 = vmul.f32 0.03125, %v202_v51 }
 0x2a6   :  { %v209_v53 = vsub.f32 %v194_v44, %v207_v50 }
 0x2a7   :  { %v208_v54 = vsub.f32 %v189_v46, %v206_v52 }
 0x2a8   :  { %v211_v55 = vmul.f32 %v209_v53, %v209_v53 }
 0x2a9   :  { %v210_v56 = vmul.f32 %v208_v54, %v208_v54 }
 0x2aa   :  { %v215_v57 = vsel %vm41_vm0, %v211_v55, 0.0 }
 0x2ab   :  { %216 = vadd.xlane.f32.xlu1 %v215_v57  ;;  %v212_v58 = vsel %vm41_vm0, %v210_v56, 0.0 }
 0x2ac   :  { %213 = vadd.xlane.f32.xlu0 %v212_v58 }
 0x338   :  { %v217_v59 = vpop.xlane.xlu1 %216 }
 0x339   :  { %v219_v60 = vmul.f32 0.03125, %v217_v59  ;;  %v214_v61 = vpop.xlane.xlu0 %213 }
 0x33a   :  { %v218_v62 = vmul.f32 0.03125, %v214_v61 }
 0x33b   :  { %v221_v63 = vadd.f32 1e-12, %v219_v60 }
 0x33c   :  { %v220_v0 = vadd.f32 1e-12, %v218_v62 }
 0x33d   :  { %299 = vrsqrt.f32 %v221_v63 }
 0x33e   :  { %301 = vrsqrt.f32 %v220_v0 }
 0x347   :  { %v300_v1 = vpop.eup %299 }
 0x348   :  { %v302_v3 = vpop.eup %301  ;;  %v225_v4 = vmul.f32 %v300_v1, %v209_v53 }
 0x349   :  { %v224_v6 = vmul.f32 %v302_v3, %v208_v54 }
 0x34a   :  { %v233_v7 = vmul.f32 %v267_v2, %v225_v4 }
 0x34b   :  { %v232_v9 = vmul.f32 %v267_v2, %v224_v6 }
 0x34c   :  { %v241_v10 = vadd.f32 %v268_v5, %v233_v7 }
 0x34d   :  { %v240_v11 = vadd.f32 %v268_v5, %v232_v9 }
 0x34e   :  { %v249_v12 = vmul.f32 %v269_v8, %v241_v10 }
 0x34f   :  { %v248_v13 = vmul.f32 %v269_v8, %v240_v11 }
 0x350   :  { %251 = vst.msk [vmem:[%s442_s10 + $0x8] sm:$0xff] %vm41_vm0, %v249_v12 }
 0x351   :  { %250 = vst.msk [vmem:[%s442_s10] sm:$0xff] %vm41_vm0, %v248_v13 }

// kernel: sharnn_model_forward.9
= control target key start
LH: loop header
LB: loop body
LE: loop exit
PB: predicated region body
PF: predicated region fallthrough
CT: control target
= control target key end

     0   :  { %vm37_vm0 = vcmask 261120   ;;  %s341_s0 = inlined_call_operand.vmem [shape: f32[16,32], index: 0, kind: input, shape index: {}]   ;;  %s342_s5 = inlined_call_operand.vmem [shape: f32[32,32], index: 5, kind: input, shape index: {}]   ;;  %s343_s3 = inlined_call_operand.vmem [shape: f32[1,32], index: 3, kind: input, shape index: {}]   ;;  %s344_s4 = inlined_call_operand.vmem [shape: f32[1,32], index: 4, kind: input, shape index: {}]   ;;  %s345_s6 = inlined_call_operand.vmem [shape: f32[1,32], index: 6, kind: input, shape index: {}]   ;;  %s346_s1 = inlined_call_operand.vmem [shape: f32[1,32], index: 1, kind: input, shape index: {}]   ;;  %s347_s2 = inlined_call_operand.vmem [shape: f32[1,32], index: 2, kind: input, shape index: {}]   ;;  %s348_s7 = inlined_call_operand.vmem [shape: f32[16,32], index: 7, kind: output, shape index: {}]  }
   0x1   :  { %v26_v0 = vld [vmem:[%s341_s0] sm:$0xff]  ;;  %v27_v1 = vld [vmem:[%s341_s0 + $0x8] sm:$0xff]  ;;  %v34_v16 = vld [vmem:[%s342_s5 + $0x10] sm:$0xff] }
   0x2   :  { %v38_v2 = vsel %vm37_vm0, %v26_v0, 0.0  ;;  %v41_v3 = vsel %vm37_vm0, %v27_v1, 0.0  ;;  %v32_v14 = vld [vmem:[%s342_s5] sm:$0xff]  ;;  %v33_v15 = vld [vmem:[%s342_s5 + $0x8] sm:$0xff]  ;;  %v35_v18 = vld [vmem:[%s342_s5 + $0x18] sm:$0xff] }
   0x3   :  { %39 = vadd.xlane.f32.xlu0 %v38_v2  ;;  %v234_v17 = vpack.c.bf16 %v33_v15, %v32_v14  ;;  %v238_v19 = vpack.c.bf16 %v35_v18, %v34_v16  ;;  %v210_v27 = vld [vmem:[%s343_s3] ss:$0 sm:$0xff] }
   0x4   :  { %v211_v29 = vld [vmem:[%s344_s4] ss:$0 sm:$0xff] }
   0x5   :  { %235 = vmatprep.subr.bf16.mxu0 %v234_v17  ;;  %v212_v36 = vld [vmem:[%s345_s6] ss:$0 sm:$0xff] }
   0x6   :  { %237 = vmatpush3.bf16.msra.mxu0 %v234_v17  ;;  %v208_v49 = vld [vmem:[%s346_s1] ss:$0 sm:$0xff] }
   0x7   :  { %42 = vadd.xlane.f32.xlu0 %v41_v3  ;;  %239 = vmatprep.subr.bf16.mxu0 %v238_v19  ;;  %v209_v52 = vld [vmem:[%s347_s2] ss:$0 sm:$0xff] }
   0xa   :  { %241 = vmatpush3.bf16.msra.mxu0 %v238_v19 }
  0x90   :  { %v40_v4 = vpop.xlane.xlu0 %39 }
  0x91   :  { %v45_v5 = vmul.f32 0.03125, %v40_v4 }
  0x93   :  { %v47_v6 = vsub.f32 %v26_v0, %v45_v5 }
  0x94   :  { %v43_v7 = vpop.xlane.xlu0 %42 }
  0x95   :  { %v46_v8 = vmul.f32 0.03125, %v43_v7  ;;  %v49_v9 = vmul.f32 %v47_v6, %v47_v6 }
  0x97   :  { %v48_v10 = vsub.f32 %v27_v1, %v46_v8  ;;  %v51_v11 = vsel %vm37_vm0, %v49_v9, 0.0 }
  0x98   :  { %52 = vadd.xlane.f32.xlu1 %v51_v11 }
  0x99   :  { %v50_v12 = vmul.f32 %v48_v10, %v48_v10 }
  0x9b   :  { %v54_v13 = vsel %vm37_vm0, %v50_v12, 0.0 }
  0x9c   :  { %55 = vadd.xlane.f32.xlu1 %v54_v13 }
 0x125   :  { %v53_v20 = vpop.xlane.xlu1 %52 }
 0x126   :  { %v57_v21 = vmul.f32 0.03125, %v53_v20 }
 0x128   :  { %v59_v22 = vadd.f32 1e-12, %v57_v21 }
 0x129   :  { %v56_v23 = vpop.xlane.xlu1 %55 }
 0x12a   :  { %242 = vrsqrt.f32 %v59_v22  ;;  %v58_v24 = vmul.f32 0.03125, %v56_v23 }
 0x12c   :  { %v60_v25 = vadd.f32 1e-12, %v58_v24 }
 0x12e   :  { %244 = vrsqrt.f32 %v60_v25 }
 0x134   :  { %v243_v26 = vpop.eup %242 }
 0x135   :  { %v63_v28 = vmul.f32 %v243_v26, %v47_v6 }
 0x137   :  { %v87_v30 = vmul.f32 %v210_v27, %v63_v28  ;;  %v71_v51 = vmul.f32 %v208_v49, %v63_v28 }
 0x138   :  { %v245_v31 = vpop.eup %244 }
 0x139   :  { %v64_v32 = vmul.f32 %v245_v31, %v48_v10  ;;  %v95_v33 = vadd.f32 %v211_v29, %v87_v30  ;;  %v79_v57 = vadd.f32 %v209_v52, %v71_v51 }
 0x13b   :  { %v88_v34 = vmul.f32 %v210_v27, %v64_v32  ;;  %231 = vmatprep.mubr.msk.f32.mxu0 %vm37_vm0, %v95_v33  ;;  %v72_v50 = vmul.f32 %v208_v49, %v64_v32 }
 0x13d   :  { %v96_v35 = vadd.f32 %v211_v29, %v88_v34  ;;  %v80_v55 = vadd.f32 %v209_v52, %v72_v50 }
 0x13f   :  { %232 = vmatmul.mubr.msk.f32.vlgmr.msra.gmra.mrb[0].mxu0 %vm37_vm0, %v96_v35 }
 0x212   :  { %v233_v37 = vpop.f32.mrb[0].mxu0 }
 0x213   :  { %v181_v38 = vadd.f32 %v233_v37, %v212_v36  ;;  %v175_v39 = vpop.f32.mrb[1].mxu0 }
 0x214   :  { %v176_v40 = vadd.f32 %v212_v36, %v175_v39 }
 0x215   :  { %v216_v41 = vmul.f32 -1.702, %v181_v38 }
 0x216   :  { %v215_v42 = vmul.f32 -1.702, %v176_v40 }
 0x217   :  { %v190_v43 = vmul.f32 1.442695, %v216_v41 }
 0x218   :  { %v188_v44 = vmul.f32 1.442695, %v215_v42 }
 0x219   :  { %246 = vpow2.f32 %v190_v43 }
 0x21a   :  { %248 = vpow2.f32 %v188_v44 }
 0x223   :  { %v247_v45 = vpop.eup %246 }
 0x224   :  { %v249_v46 = vpop.eup %248  ;;  %v193_v47 = vadd.f32 1.0, %v247_v45 }
 0x225   :  { %v192_v48 = vadd.f32 1.0, %v249_v46 }
 0x226   :  { %250 = vrcp.f32 %v193_v47 }
 0x227   :  { %252 = vrcp.f32 %v192_v48 }
 0x230   :  { %v251_v53 = vpop.eup %250 }
 0x231   :  { %v253_v54 = vpop.eup %252  ;;  %v199_v56 = vmul.f32 %v251_v53, %v181_v38 }
 0x232   :  { %v198_v58 = vmul.f32 %v253_v54, %v176_v40 }
 0x233   :  { %v201_v59 = vadd.f32 %v199_v56, %v80_v55 }
 0x234   :  { %v200_v60 = vadd.f32 %v198_v58, %v79_v57 }
 0x235   :  { %203 = vst.msk [vmem:[%s348_s7 + $0x8] sm:$0xff] %vm37_vm0, %v201_v59 }
 0x236   :  { %202 = vst.msk [vmem:[%s348_s7] sm:$0xff] %vm37_vm0, %v200_v60 }

// kernel: sharnn_model_forward.6
= control target key start
LH: loop header
LB: loop body
LE: loop exit
PB: predicated region body
PF: predicated region fallthrough
CT: control target
= control target key end

     0   :  { %14 = vsyncpa [#allocation5], 0  ;;  %vm32_vm0 = vcmask 254976   ;;  %s2561_s0 = inlined_call_operand.vmem [shape: f32[8,2,32], index: 0, kind: input, shape index: {}]   ;;  %s2562_s1 = inlined_call_operand.vmem [shape: f32[1,32], index: 1, kind: input, shape index: {}]   ;;  %s2563_s2 = inlined_call_operand.vmem [shape: f32[1,32], index: 2, kind: input, shape index: {}]   ;;  %s2564_s3 = inlined_call_operand.vmem [shape: f32[32,128], index: 3, kind: input, shape index: {}]   ;;  %s2565_s4 = inlined_call_operand.vmem [shape: f32[32,128], index: 4, kind: input, shape index: {}]   ;;  %s2566_s5 = inlined_call_operand.vmem [shape: f32[1,128], index: 5, kind: input, shape index: {}]   ;;  %s2567_s6 = inlined_call_operand.vmem [shape: f32[8,2,32], index: 6, kind: output, shape index: {0}]   ;;  %s2568_s7 = inlined_call_operand.hbm [shape: f32[2,32], index: 7, kind: output, shape index: {1}]   ;;  %s2569_s8 = inlined_call_operand.hbm [shape: f32[2,32], index: 8, kind: output, shape index: {2}]  }
   0x1   :  { %v48_v0 = vld [vmem:[%s2561_s0] sm:$0x3] }
   0x2   :  { %15 = vsyncpa [#allocation7], 0  ;;  %v50_v1 = vsel %vm32_vm0, %v48_v0, 0.0  ;;  %v41_v7 = vld [vmem:[%s2565_s4] sm:$0xff]  ;;  %v42_v8 = vld [vmem:[%s2565_s4 + $0x8] sm:$0xff]  ;;  %v2188_v10 = vmov 0.0|0.0  }
   0x3   :  { %51 = vadd.xlane.f32.xlu0 %v50_v1  ;;  %v37_v9 = vld [vmem:[%s2564_s3] sm:$0xff]  ;;  %1956 = vmatprep.subr.bf16.mxu0 %v2188_v10  ;;  %v2256_v11 = vpack.c.bf16 %v42_v8, %v41_v7  ;;  %v38_v12 = vld [vmem:[%s2564_s3 + $0x8] sm:$0xff]  ;;  %v43_v13 = vld [vmem:[%s2565_s4 + $0x10] sm:$0xff]  ;;  %v2189_v15 = vmov 0.0   ;;  %vm2190_vm1 = vmmov 0   ;;  %vm78_vm2 = vcmask 261120  }
   0x4   :  { %1962 = vmatprep.subr.bf16.mxu1 %v2188_v10  ;;  %v44_v14 = vld [vmem:[%s2565_s4 + $0x18] sm:$0xff]  ;;  %33 = vst.msk [vmem:[#allocation2] sm:$0x3] %vm32_vm0, %v2189_v15  ;;  %34 = vst.msk [vmem:[#allocation3] sm:$0x3] %vm32_vm0, %v2189_v15  ;;  %v2272_v16 = vpack.c.bf16 %v38_v12, %v37_v9  ;;  %v39_v17 = vld [vmem:[%s2564_s3 + $0x10] sm:$0xff]  ;;  %1788 = vmatprep.mubr.msk.f32.mxu0 %vm2190_vm1, %v2189_v15 }
   0x5   :  { %v40_v18 = vld [vmem:[%s2564_s3 + $0x18] sm:$0xff]  ;;  %1799 = vmatprep.mubr.msk.f32.mxu1 %vm2190_vm1, %v2189_v15  ;;  %1958 = vmatpush3.bf16.msra.mxu0 %v2256_v11  ;;  %v2285_v19 = vpack.c.bf16 %v44_v14, %v43_v13  ;;  %v2306_v26 = vld [vmem:[%s2562_s1] ss:$0 sm:$0xff]  ;;  %s2191_s25 = smov 64   ;;  %s2192_s26 = smov 32  }
   0x6   :  { %1964 = vmatpush3.bf16.msra.mxu1 %v2272_v16  ;;  %1959 = vmatprep.subr.bf16.mxu0 %v2188_v10  ;;  %v2289_v20 = vpack.c.bf16 %v40_v18, %v39_v17  ;;  %v2311_v28 = vld [vmem:[%s2563_s2] ss:$0 sm:$0xff]  ;;  %v1665_v40 = vld [vmem:[%s2561_s0 + $0x2] sm:$0x3]  ;;  %v1670_v13 = vld [vmem:[%s2561_s0 + $0x4] sm:$0x3] }
   0x7   :  { %1965 = vmatprep.subr.bf16.mxu1 %v2188_v10  ;;  %v2325_v33 = vld [vmem:[%s2566_s5] ss:$0 sm:$0xff]  ;;  %v267_v41 = vsel %vm32_vm0, %v1665_v40, 0.0  ;;  %v460_v14 = vsel %vm32_vm0, %v1670_v13, 0.0  ;;  %s2193_s5 = smov 96   ;;  %s2194_s29 = smov [#allocation4]  }
   0x8   :  { %s1635_s30 = sshll.u32 %s2194_s29, 4  ;;  %s2195_s9 = smov [#allocation6]   ;;  %s1636_s30 = int_to_ptr.vmem [resolvable:$true] %s1635_s30 }
   0x9   :  { %1961 = vmatpush3.bf16.msra.mxu0 %v2285_v19  ;;  %s1645_s10 = sshll.u32 %s2195_s9, 4  ;;  %p2145_p1 = scmp.lt.s32.totalorder %s1636_s30, %s1636_s30  ;;  %s1646_s10 = int_to_ptr.vmem [resolvable:$true] %s1645_s10 }
   0xa   :  { %1967 = vmatpush3.bf16.msra.mxu1 %v2289_v20  ;;  %1968 = vmatprep.subr.bf16.mxu0 %v2188_v10 }
   0xb   :  { %v46_v21 = vld [vmem:[#allocation2] sm:$0x3]  ;;  %1974 = vmatprep.subr.bf16.mxu1 %v2188_v10  ;;  %v47_v39 = vld [vmem:[#allocation3] sm:$0x3] }
   0xc   :  { %1789 = vmatmul.mubr.msk.f32.vlgmr.msra.gmra.mrb[0].mxu0 %vm78_vm2, %v46_v21 }
   0xd   :  { %1970 = vmatpush3.bf16.msra.mxu0 %v2256_v11  ;;  %1810 = vmatprep.mubr.msk.f32.mxu0 %vm2190_vm1, %v2189_v15 }
   0xe   :  { %1971 = vmatprep.subr.bf16.mxu0 %v2188_v10 }
  0x11   :  { %1973 = vmatpush3.bf16.msra.mxu0 %v2285_v19 }
  0x12   :  { %1980 = vmatprep.subr.bf16.mxu0 %v2188_v10 }
  0x90   :  { %v52_v2 = vpop.xlane.xlu0 %51 }
  0x91   :  { %v54_v3 = vmul.f32 0.03125, %v52_v2 }
  0x93   :  { %v55_v4 = vsub.f32 %v48_v0, %v54_v3 }
  0x95   :  { %v56_v5 = vmul.f32 %v55_v4, %v55_v4 }
  0x97   :  { %v57_v6 = vsel %vm32_vm0, %v56_v5, 0.0 }
  0x98   :  { %58 = vadd.xlane.f32.xlu0 %v57_v6 }
  0xdf   :  { %v148_v31 = vpop.f32.mrb[0].mxu0 }
  0xe0   :  { %v1790_v32 = vpop.f32.mrb[1].mxu0 }
 0x125   :  { %v59_v22 = vpop.xlane.xlu0 %58 }
 0x126   :  { %v60_v23 = vmul.f32 0.03125, %v59_v22 }
 0x128   :  { %v61_v24 = vadd.f32 1e-12, %v60_v23 }
 0x12a   :  { %2060 = vrsqrt.f32 %v61_v24 }
 0x134   :  { %v2061_v25 = vpop.eup %2060 }
 0x135   :  { %v63_v27 = vmul.f32 %v2061_v25, %v55_v4 }
 0x137   :  { %v70_v29 = vmul.f32 %v2306_v26, %v63_v27 }
 0x139   :  { %v77_v30 = vadd.f32 %v2311_v28, %v70_v29 }
 0x13b   :  { %1800 = vmatmul.mubr.msk.f32.vlgmr.msra.gmra.mrb[0].mxu1 %vm78_vm2, %v77_v30 }
 0x13c   :  { %1976 = vmatpush3.bf16.msra.mxu1 %v2272_v16  ;;  %1821 = vmatprep.mubr.msk.f32.mxu1 %vm2190_vm1, %v2189_v15 }
 0x13d   :  { %1977 = vmatprep.subr.bf16.mxu1 %v2188_v10 }
 0x140   :  { %1979 = vmatpush3.bf16.msra.mxu1 %v2289_v20 }
 0x141   :  { %1986 = vmatprep.subr.bf16.mxu1 %v2188_v10 }
 0x20e   :  { %v221_v34 = vpop.f32.mrb[0].mxu1 }
 0x20f   :  { %v222_v35 = vadd.f32 %v221_v34, %v148_v31  ;;  %v1801_v36 = vpop.f32.mrb[1].mxu1 }
 0x211   :  { %v231_v37 = vadd.f32 %v2325_v33, %v222_v35 }
 0x213   :  { %2062 = vtanh.f32 %v231_v37  ;;  %v1664_v42 = vmul.f32 -1.442695, %v231_v37 }
 0x215   :  { %2064 = vpow2.f32 %v1664_v42 }
 0x21d   :  { %v2063_v38 = vpop.eup %2062 }
 0x21e   :  { %245 = vrot.lane.b32.xlu1 %v2063_v38, %s2191_s25 }
 0x21f   :  { %v2065_v43 = vpop.eup %2064 }
 0x220   :  { %v235_v44 = vadd.f32 1.0, %v2065_v43 }
 0x222   :  { %240 = vrot.lane.b32.xlu1 %v47_v39, %s2192_s26  ;;  %2066 = vrcp.f32 %v235_v44 }
 0x22c   :  { %v2067_v45 = vpop.eup %2066 }
 0x246   :  { %268 = vadd.xlane.f32.xlu1 %v267_v41 }
 0x290   :  { %v246_v46 = vpop.permute.xlu1 %245 }
 0x291   :  { %v248_v47 = vmul.f32 %v2067_v45, %v246_v46 }
 0x293   :  { %250 = vrot.lane.b32.xlu0 %v248_v47, %s2192_s26 }
 0x294   :  { %v241_v48 = vpop.permute.xlu1 %240 }
 0x295   :  { %v243_v49 = vmul.f32 %v2067_v45, %v241_v48 }
 0x2d3   :  { %v269_v53 = vpop.xlane.xlu1 %268 }
 0x2d4   :  { %v270_v54 = vmul.f32 0.03125, %v269_v53 }
 0x2d6   :  { %v271_v55 = vsub.f32 %v1665_v40, %v270_v54  ;;  %v1675_v54 = vld [vmem:[%s2561_s0 + $0x6] sm:$0x3] }
 0x2d8   :  { %v272_v56 = vmul.f32 %v271_v55, %v271_v55 }
 0x2da   :  { %v273_v57 = vsel %vm32_vm0, %v272_v56, 0.0 }
 0x305   :  { %v251_v50 = vpop.permute.xlu0 %250 }
 0x306   :  { %v253_v51 = vadd.f32 %v251_v50, %v243_v49 }
 0x308   :  { %2068 = vtanh.f32 %v253_v51 }
 0x312   :  { %v2069_v52 = vpop.eup %2068 }
 0x313   :  { %256 = vrot.lane.b32.xlu0 %v2069_v52, %s2191_s25 }
 0x332   :  { %274 = vadd.xlane.f32.xlu0 %v273_v57 }
 0x385   :  { %v257_v58 = vpop.permute.xlu0 %256 }
 0x386   :  { %v259_v59 = vmul.f32 %v2067_v45, %v257_v58 }
 0x388   :  { %261 = vrot.lane.b32.xlu1 %v259_v59, %s2192_s26 }
 0x3bf   :  { %v275_v60 = vpop.xlane.xlu0 %274 }
 0x3c0   :  { %v276_v61 = vmul.f32 0.03125, %v275_v60 }
 0x3c2   :  { %v277_v62 = vadd.f32 1e-12, %v276_v61 }
 0x3c4   :  { %2070 = vrsqrt.f32 %v277_v62 }
 0x3ce   :  { %v2071_v63 = vpop.eup %2070 }
 0x3cf   :  { %v279_v0 = vmul.f32 %v2071_v63, %v271_v55  ;;  %v653_v55 = vsel %vm32_vm0, %v1675_v54, 0.0 }
 0x3d1   :  { %v280_v1 = vmul.f32 %v2306_v26, %v279_v0 }
 0x3d3   :  { %v281_v2 = vadd.f32 %v2311_v28, %v280_v1 }
 0x3d5   :  { %1822 = vmatmul.mubr.msk.f32.vlgmr.msra.gmra.mrb[2].mxu1 %vm78_vm2, %v281_v2 }
 0x3d6   :  { %1988 = vmatpush3.bf16.msra.mxu1 %v2272_v16  ;;  %1843 = vmatprep.mubr.msk.f32.mxu1 %vm2190_vm1, %v2189_v15 }
 0x3d7   :  { %1989 = vmatprep.subr.bf16.mxu1 %v2188_v10 }
 0x3da   :  { %1991 = vmatpush3.bf16.msra.mxu1 %v2289_v20 }
 0x3db   :  { %1998 = vmatprep.subr.bf16.mxu1 %v2188_v10 }
 0x3fa   :  { %v262_v3 = vpop.permute.xlu1 %261 }
 0x3fb   :  { %264 = vst.msk [vmem:[%s2567_s6] sm:$0x3] %vm32_vm0, %v262_v3  ;;  %1811 = vmatmul.mubr.msk.f32.vlgmr.msra.gmra.mrb[2].mxu0 %vm78_vm2, %v262_v3 }
 0x3fc   :  { %1982 = vmatpush3.bf16.msra.mxu0 %v2256_v11  ;;  %1832 = vmatprep.mubr.msk.f32.mxu0 %vm2190_vm1, %v2189_v15 }
 0x3fd   :  { %1983 = vmatprep.subr.bf16.mxu0 %v2188_v10 }
 0x400   :  { %1985 = vmatpush3.bf16.msra.mxu0 %v2285_v19 }
 0x401   :  { %1992 = vmatprep.subr.bf16.mxu0 %v2188_v10 }
 0x4a8   :  { %v423_v4 = vpop.f32.mrb[2].mxu1 }
 0x4a9   :  { %v1823_v5 = vpop.f32.mrb[3].mxu1 }
 0x4ce   :  { %v350_v6 = vpop.f32.mrb[2].mxu0 }
 0x4cf   :  { %v424_v7 = vadd.f32 %v423_v4, %v350_v6  ;;  %v1812_v8 = vpop.f32.mrb[3].mxu0 }
 0x4d1   :  { %v427_v9 = vadd.f32 %v2325_v33, %v424_v7 }
 0x4d3   :  { %2072 = vtanh.f32 %v427_v9  ;;  %v1668_v17 = vmul.f32 -1.442695, %v427_v9 }
 0x4d5   :  { %2074 = vpow2.f32 %v1668_v17 }
 0x4dd   :  { %v2073_v12 = vpop.eup %2072 }
 0x4de   :  { %437 = vrot.lane.b32.xlu1 %v2073_v12, %s2191_s25 }
 0x4df   :  { %v2075_v18 = vpop.eup %2074 }
 0x4e0   :  { %v431_v21 = vadd.f32 1.0, %v2075_v18 }
 0x4e2   :  { %2076 = vrcp.f32 %v431_v21 }
 0x4ec   :  { %v2077_v22 = vpop.eup %2076 }
 0x4ed   :  { %v435_v25 = vmul.f32 %v2077_v22, %v253_v51 }
 0x502   :  { %461 = vadd.xlane.f32.xlu1 %v460_v14 }
 0x550   :  { %v438_v23 = vpop.permute.xlu1 %437 }
 0x551   :  { %v440_v24 = vmul.f32 %v2077_v22, %v438_v23 }
 0x553   :  { %442 = vrot.lane.b32.xlu0 %v440_v24, %s2192_s26 }
 0x58f   :  { %v462_v31 = vpop.xlane.xlu1 %461 }
 0x590   :  { %v463_v32 = vmul.f32 0.03125, %v462_v31 }
 0x592   :  { %v464_v34 = vsub.f32 %v1670_v13, %v463_v32  ;;  %v1680_v32 = vld [vmem:[%s2561_s0 + $0x8] sm:$0x3] }
 0x594   :  { %v465_v35 = vmul.f32 %v464_v34, %v464_v34 }
 0x596   :  { %v466_v36 = vsel %vm32_vm0, %v465_v35, 0.0 }
 0x5c5   :  { %v443_v27 = vpop.permute.xlu0 %442 }
 0x5c6   :  { %v445_v29 = vadd.f32 %v443_v27, %v435_v25 }
 0x5c8   :  { %2078 = vtanh.f32 %v445_v29 }
 0x5d2   :  { %v2079_v30 = vpop.eup %2078 }
 0x5d3   :  { %448 = vrot.lane.b32.xlu0 %v2079_v30, %s2191_s25 }
 0x5f2   :  { %467 = vadd.xlane.f32.xlu0 %v466_v36 }
 0x645   :  { %v449_v37 = vpop.permute.xlu0 %448 }
 0x646   :  { %v451_v38 = vmul.f32 %v2077_v22, %v449_v37 }
 0x648   :  { %453 = vrot.lane.b32.xlu1 %v451_v38, %s2192_s26 }
 0x67f   :  { %v468_v39 = vpop.xlane.xlu0 %467 }
 0x680   :  { %v469_v40 = vmul.f32 0.03125, %v468_v39 }
 0x682   :  { %v470_v41 = vadd.f32 1e-12, %v469_v40 }
 0x684   :  { %2080 = vrsqrt.f32 %v470_v41 }
 0x68e   :  { %v2081_v42 = vpop.eup %2080 }
 0x68f   :  { %v472_v43 = vmul.f32 %v2081_v42, %v464_v34  ;;  %v846_v34 = vsel %vm32_vm0, %v1680_v32, 0.0 }
 0x691   :  { %v473_v44 = vmul.f32 %v2306_v26, %v472_v43 }
 0x693   :  { %v474_v45 = vadd.f32 %v2311_v28, %v473_v44 }
 0x695   :  { %1844 = vmatmul.mubr.msk.f32.vlgmr.msra.gmra.mrb[4].mxu1 %vm78_vm2, %v474_v45 }
 0x696   :  { %2000 = vmatpush3.bf16.msra.mxu1 %v2272_v16  ;;  %1865 = vmatprep.mubr.msk.f32.mxu1 %vm2190_vm1, %v2189_v15 }
 0x697   :  { %2001 = vmatprep.subr.bf16.mxu1 %v2188_v10 }
 0x69a   :  { %2003 = vmatpush3.bf16.msra.mxu1 %v2289_v20 }
 0x69b   :  { %2010 = vmatprep.subr.bf16.mxu1 %v2188_v10 }
 0x6ba   :  { %v454_v46 = vpop.permute.xlu1 %453 }
 0x6bb   :  { %1669 = vst.msk [vmem:[%s2567_s6 + $0x2] sm:$0x3] %vm32_vm0, %v454_v46  ;;  %1833 = vmatmul.mubr.msk.f32.vlgmr.msra.gmra.mrb[4].mxu0 %vm78_vm2, %v454_v46 }
 0x6bc   :  { %1994 = vmatpush3.bf16.msra.mxu0 %v2256_v11  ;;  %1854 = vmatprep.mubr.msk.f32.mxu0 %vm2190_vm1, %v2189_v15 }
 0x6bd   :  { %1995 = vmatprep.subr.bf16.mxu0 %v2188_v10 }
 0x6c0   :  { %1997 = vmatpush3.bf16.msra.mxu0 %v2285_v19 }
 0x6c1   :  { %2004 = vmatprep.subr.bf16.mxu0 %v2188_v10 }
 0x768   :  { %v616_v47 = vpop.f32.mrb[4].mxu1 }
 0x769   :  { %v1845_v48 = vpop.f32.mrb[5].mxu1 }
 0x78e   :  { %v543_v49 = vpop.f32.mrb[4].mxu0 }
 0x78f   :  { %v617_v50 = vadd.f32 %v616_v47, %v543_v49  ;;  %v1834_v51 = vpop.f32.mrb[5].mxu0 }
 0x791   :  { %v620_v52 = vadd.f32 %v2325_v33, %v617_v50 }
 0x793   :  { %2082 = vtanh.f32 %v620_v52  ;;  %v1673_v56 = vmul.f32 -1.442695, %v620_v52 }
 0x795   :  { %2084 = vpow2.f32 %v1673_v56 }
 0x79d   :  { %v2083_v53 = vpop.eup %2082 }
 0x79e   :  { %630 = vrot.lane.b32.xlu1 %v2083_v53, %s2191_s25 }
 0x79f   :  { %v2085_v57 = vpop.eup %2084 }
 0x7a0   :  { %v624_v58 = vadd.f32 1.0, %v2085_v57 }
 0x7a2   :  { %2086 = vrcp.f32 %v624_v58 }
 0x7ac   :  { %v2087_v59 = vpop.eup %2086 }
 0x7ad   :  { %v628_v62 = vmul.f32 %v2087_v59, %v445_v29 }
 0x7c2   :  { %654 = vadd.xlane.f32.xlu1 %v653_v55 }
 0x810   :  { %v631_v60 = vpop.permute.xlu1 %630 }
 0x811   :  { %v633_v61 = vmul.f32 %v2087_v59, %v631_v60 }
 0x813   :  { %635 = vrot.lane.b32.xlu0 %v633_v61, %s2192_s26 }
 0x84f   :  { %v655_v2 = vpop.xlane.xlu1 %654 }
 0x850   :  { %v656_v3 = vmul.f32 0.03125, %v655_v2 }
 0x852   :  { %v657_v4 = vsub.f32 %v1675_v54, %v656_v3  ;;  %v1685_v3 = vld [vmem:[%s2561_s0 + $0xa] sm:$0x3] }
 0x854   :  { %v658_v5 = vmul.f32 %v657_v4, %v657_v4 }
 0x856   :  { %v659_v6 = vsel %vm32_vm0, %v658_v5, 0.0 }
 0x885   :  { %v636_v63 = vpop.permute.xlu0 %635 }
 0x886   :  { %v638_v0 = vadd.f32 %v636_v63, %v628_v62 }
 0x888   :  { %2088 = vtanh.f32 %v638_v0 }
 0x892   :  { %v2089_v1 = vpop.eup %2088 }
 0x893   :  { %641 = vrot.lane.b32.xlu0 %v2089_v1, %s2191_s25 }
 0x8b2   :  { %660 = vadd.xlane.f32.xlu0 %v659_v6 }
 0x905   :  { %v642_v7 = vpop.permute.xlu0 %641 }
 0x906   :  { %v644_v8 = vmul.f32 %v2087_v59, %v642_v7 }
 0x908   :  { %646 = vrot.lane.b32.xlu1 %v644_v8, %s2192_s26 }
 0x93f   :  { %v661_v9 = vpop.xlane.xlu0 %660 }
 0x940   :  { %v662_v12 = vmul.f32 0.03125, %v661_v9 }
 0x942   :  { %v663_v13 = vadd.f32 1e-12, %v662_v12 }
 0x944   :  { %2090 = vrsqrt.f32 %v663_v13 }
 0x94e   :  { %v2091_v14 = vpop.eup %2090 }
 0x94f   :  { %v665_v17 = vmul.f32 %v2091_v14, %v657_v4  ;;  %v1039_v4 = vsel %vm32_vm0, %v1685_v3, 0.0 }
 0x951   :  { %v666_v18 = vmul.f32 %v2306_v26, %v665_v17 }
 0x953   :  { %v667_v21 = vadd.f32 %v2311_v28, %v666_v18 }
 0x955   :  { %1866 = vmatmul.mubr.msk.f32.vlgmr.msra.gmra.mrb[6].mxu1 %vm78_vm2, %v667_v21 }
 0x956   :  { %2012 = vmatpush3.bf16.msra.mxu1 %v2272_v16  ;;  %1887 = vmatprep.mubr.msk.f32.mxu1 %vm2190_vm1, %v2189_v15 }
 0x957   :  { %2013 = vmatprep.subr.bf16.mxu1 %v2188_v10 }
 0x95a   :  { %2015 = vmatpush3.bf16.msra.mxu1 %v2289_v20 }
 0x95b   :  { %2022 = vmatprep.subr.bf16.mxu1 %v2188_v10 }
 0x97a   :  { %v647_v22 = vpop.permute.xlu1 %646 }
 0x97b   :  { %1674 = vst.msk [vmem:[%s2567_s6 + $0x4] sm:$0x3] %vm32_vm0, %v647_v22  ;;  %1855 = vmatmul.mubr.msk.f32.vlgmr.msra.gmra.mrb[6].mxu0 %vm78_vm2, %v647_v22 }
 0x97c   :  { %2006 = vmatpush3.bf16.msra.mxu0 %v2256_v11  ;;  %1876 = vmatprep.mubr.msk.f32.mxu0 %vm2190_vm1, %v2189_v15 }
 0x97d   :  { %2007 = vmatprep.subr.bf16.mxu0 %v2188_v10 }
 0x980   :  { %2009 = vmatpush3.bf16.msra.mxu0 %v2285_v19 }
 0x981   :  { %2016 = vmatprep.subr.bf16.mxu0 %v2188_v10 }
 0xa28   :  { %v809_v23 = vpop.f32.mrb[6].mxu1 }
 0xa29   :  { %v1867_v24 = vpop.f32.mrb[7].mxu1 }
 0xa4e   :  { %v736_v25 = vpop.f32.mrb[6].mxu0 }
 0xa4f   :  { %v810_v27 = vadd.f32 %v809_v23, %v736_v25  ;;  %v1856_v29 = vpop.f32.mrb[7].mxu0 }
 0xa51   :  { %v813_v30 = vadd.f32 %v2325_v33, %v810_v27 }
 0xa53   :  { %2092 = vtanh.f32 %v813_v30  ;;  %v1678_v35 = vmul.f32 -1.442695, %v813_v30 }
 0xa55   :  { %2094 = vpow2.f32 %v1678_v35 }
 0xa5d   :  { %v2093_v31 = vpop.eup %2092 }
 0xa5e   :  { %823 = vrot.lane.b32.xlu1 %v2093_v31, %s2191_s25 }
 0xa5f   :  { %v2095_v36 = vpop.eup %2094 }
 0xa60   :  { %v817_v37 = vadd.f32 1.0, %v2095_v36 }
 0xa62   :  { %2096 = vrcp.f32 %v817_v37 }
 0xa6c   :  { %v2097_v38 = vpop.eup %2096 }
 0xa6d   :  { %v821_v41 = vmul.f32 %v2097_v38, %v638_v0 }
 0xa82   :  { %847 = vadd.xlane.f32.xlu1 %v846_v34 }
 0xad0   :  { %v824_v39 = vpop.permute.xlu1 %823 }
 0xad1   :  { %v826_v40 = vmul.f32 %v2097_v38, %v824_v39 }
 0xad3   :  { %828 = vrot.lane.b32.xlu0 %v826_v40, %s2192_s26 }
 0xb0f   :  { %v848_v45 = vpop.xlane.xlu1 %847 }
 0xb10   :  { %v849_v46 = vmul.f32 0.03125, %v848_v45 }
 0xb12   :  { %v850_v47 = vsub.f32 %v1680_v32, %v849_v46  ;;  %v1690_v46 = vld [vmem:[%s2561_s0 + $0xc] sm:$0x3] }
 0xb14   :  { %v851_v48 = vmul.f32 %v850_v47, %v850_v47 }
 0xb16   :  { %v852_v49 = vsel %vm32_vm0, %v851_v48, 0.0 }
 0xb45   :  { %v829_v42 = vpop.permute.xlu0 %828 }
 0xb46   :  { %v831_v43 = vadd.f32 %v829_v42, %v821_v41 }
 0xb48   :  { %2098 = vtanh.f32 %v831_v43 }
 0xb52   :  { %v2099_v44 = vpop.eup %2098 }
 0xb53   :  { %834 = vrot.lane.b32.xlu0 %v2099_v44, %s2191_s25 }
 0xb72   :  { %853 = vadd.xlane.f32.xlu0 %v852_v49 }
 0xbc5   :  { %v835_v50 = vpop.permute.xlu0 %834 }
 0xbc6   :  { %v837_v51 = vmul.f32 %v2097_v38, %v835_v50 }
 0xbc8   :  { %839 = vrot.lane.b32.xlu1 %v837_v51, %s2192_s26 }
 0xbff   :  { %v854_v52 = vpop.xlane.xlu0 %853 }
 0xc00   :  { %v855_v53 = vmul.f32 0.03125, %v854_v52 }
 0xc02   :  { %v856_v54 = vadd.f32 1e-12, %v855_v53 }
 0xc04   :  { %2100 = vrsqrt.f32 %v856_v54 }
 0xc0e   :  { %v2101_v55 = vpop.eup %2100 }
 0xc0f   :  { %v858_v56 = vmul.f32 %v2101_v55, %v850_v47  ;;  %v1232_v47 = vsel %vm32_vm0, %v1690_v46, 0.0 }
 0xc11   :  { %v859_v57 = vmul.f32 %v2306_v26, %v858_v56 }
 0xc13   :  { %v860_v58 = vadd.f32 %v2311_v28, %v859_v57 }
 0xc15   :  { %1888 = vmatmul.mubr.msk.f32.vlgmr.msra.gmra.mrb[8].mxu1 %vm78_vm2, %v860_v58 }
 0xc16   :  { %2024 = vmatpush3.bf16.msra.mxu1 %v2272_v16  ;;  %1909 = vmatprep.mubr.msk.f32.mxu1 %vm2190_vm1, %v2189_v15 }
 0xc17   :  { %2025 = vmatprep.subr.bf16.mxu1 %v2188_v10 }
 0xc1a   :  { %2027 = vmatpush3.bf16.msra.mxu1 %v2289_v20 }
 0xc1b   :  { %2034 = vmatprep.subr.bf16.mxu1 %v2188_v10 }
 0xc3a   :  { %v840_v59 = vpop.permute.xlu1 %839 }
 0xc3b   :  { %1679 = vst.msk [vmem:[%s2567_s6 + $0x6] sm:$0x3] %vm32_vm0, %v840_v59  ;;  %1877 = vmatmul.mubr.msk.f32.vlgmr.msra.gmra.mrb[8].mxu0 %vm78_vm2, %v840_v59 }
 0xc3c   :  { %2018 = vmatpush3.bf16.msra.mxu0 %v2256_v11  ;;  %1898 = vmatprep.mubr.msk.f32.mxu0 %vm2190_vm1, %v2189_v15 }
 0xc3d   :  { %2019 = vmatprep.subr.bf16.mxu0 %v2188_v10 }
 0xc40   :  { %2021 = vmatpush3.bf16.msra.mxu0 %v2285_v19 }
 0xc41   :  { %2028 = vmatprep.subr.bf16.mxu0 %v2188_v10 }
 0xce8   :  { %v1002_v60 = vpop.f32.mrb[8].mxu1 }
 0xce9   :  { %v1889_v61 = vpop.f32.mrb[9].mxu1 }
 0xd0e   :  { %v929_v62 = vpop.f32.mrb[8].mxu0 }
 0xd0f   :  { %v1003_v63 = vadd.f32 %v1002_v60, %v929_v62  ;;  %v1878_v0 = vpop.f32.mrb[9].mxu0 }
 0xd11   :  { %v1006_v1 = vadd.f32 %v2325_v33, %v1003_v63 }
 0xd13   :  { %2102 = vtanh.f32 %v1006_v1  ;;  %v1683_v5 = vmul.f32 -1.442695, %v1006_v1 }
 0xd15   :  { %2104 = vpow2.f32 %v1683_v5 }
 0xd1d   :  { %v2103_v2 = vpop.eup %2102 }
 0xd1e   :  { %1016 = vrot.lane.b32.xlu1 %v2103_v2, %s2191_s25 }
 0xd1f   :  { %v2105_v6 = vpop.eup %2104 }
 0xd20   :  { %v1010_v7 = vadd.f32 1.0, %v2105_v6 }
 0xd22   :  { %2106 = vrcp.f32 %v1010_v7 }
 0xd2c   :  { %v2107_v8 = vpop.eup %2106 }
 0xd2d   :  { %v1014_v13 = vmul.f32 %v2107_v8, %v831_v43 }
 0xd42   :  { %1040 = vadd.xlane.f32.xlu1 %v1039_v4 }
 0xd90   :  { %v1017_v9 = vpop.permute.xlu1 %1016 }
 0xd91   :  { %v1019_v12 = vmul.f32 %v2107_v8, %v1017_v9 }
 0xd93   :  { %1021 = vrot.lane.b32.xlu0 %v1019_v12, %s2192_s26 }
 0xdcf   :  { %v1041_v21 = vpop.xlane.xlu1 %1040 }
 0xdd0   :  { %v1042_v22 = vmul.f32 0.03125, %v1041_v21 }
 0xdd2   :  { %v1043_v23 = vsub.f32 %v1685_v3, %v1042_v22 }
 0xdd4   :  { %v1044_v24 = vmul.f32 %v1043_v23, %v1043_v23 }
 0xdd6   :  { %v1045_v25 = vsel %vm32_vm0, %v1044_v24, 0.0 }
 0xe05   :  { %v1022_v14 = vpop.permute.xlu0 %1021 }
 0xe06   :  { %v1024_v17 = vadd.f32 %v1022_v14, %v1014_v13 }
 0xe08   :  { %2108 = vtanh.f32 %v1024_v17 }
 0xe12   :  { %v2109_v18 = vpop.eup %2108 }
 0xe13   :  { %1027 = vrot.lane.b32.xlu0 %v2109_v18, %s2191_s25 }
 0xe32   :  { %1046 = vadd.xlane.f32.xlu0 %v1045_v25 }
 0xe85   :  { %v1028_v27 = vpop.permute.xlu0 %1027 }
 0xe86   :  { %v1030_v29 = vmul.f32 %v2107_v8, %v1028_v27 }
 0xe88   :  { %1032 = vrot.lane.b32.xlu1 %v1030_v29, %s2192_s26 }
 0xebf   :  { %v1047_v30 = vpop.xlane.xlu0 %1046 }
 0xec0   :  { %v1048_v31 = vmul.f32 0.03125, %v1047_v30 }
 0xec2   :  { %v1049_v32 = vadd.f32 1e-12, %v1048_v31 }
 0xec4   :  { %2110 = vrsqrt.f32 %v1049_v32 }
 0xece   :  { %v2111_v34 = vpop.eup %2110 }
 0xecf   :  { %v1051_v35 = vmul.f32 %v2111_v34, %v1043_v23 }
 0xed1   :  { %v1052_v36 = vmul.f32 %v2306_v26, %v1051_v35 }
 0xed3   :  { %v1053_v37 = vadd.f32 %v2311_v28, %v1052_v36 }
 0xed5   :  { %1910 = vmatmul.mubr.msk.f32.vlgmr.msra.gmra.mrb[10].mxu1 %vm78_vm2, %v1053_v37 }
 0xed6   :  { %2036 = vmatpush3.bf16.msra.mxu1 %v2272_v16  ;;  %1931 = vmatprep.mubr.msk.f32.mxu1 %vm2190_vm1, %v2189_v15 }
 0xed7   :  { %2037 = vmatprep.subr.bf16.mxu1 %v2188_v10 }
 0xeda   :  { %2039 = vmatpush3.bf16.msra.mxu1 %v2289_v20 }
 0xedb   :  { %2046 = vmatprep.subr.bf16.mxu1 %v2188_v10 }
 0xefa   :  { %v1033_v38 = vpop.permute.xlu1 %1032 }
 0xefb   :  { %1684 = vst.msk [vmem:[%s2567_s6 + $0x8] sm:$0x3] %vm32_vm0, %v1033_v38  ;;  %1899 = vmatmul.mubr.msk.f32.vlgmr.msra.gmra.mrb[10].mxu0 %vm78_vm2, %v1033_v38 }
 0xefc   :  { %2030 = vmatpush3.bf16.msra.mxu0 %v2256_v11  ;;  %1920 = vmatprep.mubr.msk.f32.mxu0 %vm2190_vm1, %v2189_v15 }
 0xefd   :  { %2031 = vmatprep.subr.bf16.mxu0 %v2188_v10 }
 0xf00   :  { %2033 = vmatpush3.bf16.msra.mxu0 %v2285_v19 }
 0xf01   :  { %2040 = vmatprep.subr.bf16.mxu0 %v2188_v10 }
 0xfa8   :  { %v1195_v39 = vpop.f32.mrb[10].mxu1 }
 0xfa9   :  { %v1911_v40 = vpop.f32.mrb[11].mxu1 }
 0xfce   :  { %v1122_v41 = vpop.f32.mrb[10].mxu0 }
 0xfcf   :  { %v1196_v42 = vadd.f32 %v1195_v39, %v1122_v41  ;;  %v1900_v43 = vpop.f32.mrb[11].mxu0 }
 0xfd1   :  { %v1199_v44 = vadd.f32 %v2325_v33, %v1196_v42 }
 0xfd3   :  { %2112 = vtanh.f32 %v1199_v44  ;;  %v1688_v48 = vmul.f32 -1.442695, %v1199_v44 }
 0xfd5   :  { %2114 = vpow2.f32 %v1688_v48 }
 0xfdd   :  { %v2113_v45 = vpop.eup %2112 }
 0xfde   :  { %1209 = vrot.lane.b32.xlu1 %v2113_v45, %s2191_s25 }
 0xfdf   :  { %v2115_v49 = vpop.eup %2114 }
 0xfe0   :  { %v1203_v50 = vadd.f32 1.0, %v2115_v49 }
 0xfe2   :  { %2116 = vrcp.f32 %v1203_v50 }
 0xfec   :  { %v2117_v51 = vpop.eup %2116 }
 0xfed   :  { %v1207_v54 = vmul.f32 %v2117_v51, %v1024_v17 }
0x1002   :  { %1233 = vadd.xlane.f32.xlu1 %v1232_v47 }
0x1050   :  { %v1210_v52 = vpop.permute.xlu1 %1209 }
0x1051   :  { %v1212_v53 = vmul.f32 %v2117_v51, %v1210_v52 }
0x1053   :  { %1214 = vrot.lane.b32.xlu0 %v1212_v53, %s2192_s26 }
0x108f   :  { %v1234_v58 = vpop.xlane.xlu1 %1233 }
0x1090   :  { %v1235_v59 = vmul.f32 0.03125, %v1234_v58 }
0x1092   :  { %v1236_v60 = vsub.f32 %v1690_v46, %v1235_v59 }
0x1094   :  { %v1237_v61 = vmul.f32 %v1236_v60, %v1236_v60 }
0x1096   :  { %v1238_v62 = vsel %vm32_vm0, %v1237_v61, 0.0 }
0x10c5   :  { %v1215_v55 = vpop.permute.xlu0 %1214 }
0x10c6   :  { %v1217_v56 = vadd.f32 %v1215_v55, %v1207_v54 }
0x10c8   :  { %2118 = vtanh.f32 %v1217_v56 }
0x10d2   :  { %v2119_v57 = vpop.eup %2118 }
0x10d3   :  { %1220 = vrot.lane.b32.xlu0 %v2119_v57, %s2191_s25 }
0x10f2   :  { %1239 = vadd.xlane.f32.xlu0 %v1238_v62 }
0x1145   :  { %v1221_v63 = vpop.permute.xlu0 %1220 }
0x1146   :  { %v1223_v0 = vmul.f32 %v2117_v51, %v1221_v63 }
0x1148   :  { %1225 = vrot.lane.b32.xlu1 %v1223_v0, %s2192_s26 }
0x117f   :  { %v1240_v1 = vpop.xlane.xlu0 %1239 }
0x1180   :  { %v1241_v2 = vmul.f32 0.03125, %v1240_v1 }
0x1182   :  { %v1242_v3 = vadd.f32 1e-12, %v1241_v2 }
0x1184   :  { %2120 = vrsqrt.f32 %v1242_v3 }
0x118e   :  { %v2121_v4 = vpop.eup %2120 }
0x118f   :  { %v1244_v5 = vmul.f32 %v2121_v4, %v1236_v60 }
0x1191   :  { %v1245_v6 = vmul.f32 %v2306_v26, %v1244_v5 }
0x1193   :  { %v1246_v7 = vadd.f32 %v2311_v28, %v1245_v6 }
0x1195   :  { %1932 = vmatmul.mubr.msk.f32.vlgmr.msra.gmra.mrb[12].mxu1 %vm78_vm2, %v1246_v7 }
0x1196   :  { %2048 = vmatpush3.bf16.msra.mxu1 %v2272_v16  ;;  %1953 = vmatprep.mubr.msk.f32.mxu1 %vm2190_vm1, %v2189_v15 }
0x1197   :  { %2049 = vmatprep.subr.bf16.mxu1 %v2188_v10 }
0x119a   :  { %2051 = vmatpush3.bf16.msra.mxu1 %v2289_v20 }
0x11ba   :  { %v1226_v8 = vpop.permute.xlu1 %1225 }
0x11bb   :  { %1689 = vst.msk [vmem:[%s2567_s6 + $0xa] sm:$0x3] %vm32_vm0, %v1226_v8  ;;  %1921 = vmatmul.mubr.msk.f32.vlgmr.msra.gmra.mrb[12].mxu0 %vm78_vm2, %v1226_v8 }
0x11bc   :  { %2042 = vmatpush3.bf16.msra.mxu0 %v2256_v11  ;;  %1942 = vmatprep.mubr.msk.f32.mxu0 %vm2190_vm1, %v2189_v15  ;;  %v1695_v11 = vld [vmem:[%s2561_s0 + $0xe] sm:$0x3] }
0x11bd   :  { %2043 = vmatprep.subr.bf16.mxu0 %v2188_v10  ;;  %v1425_v15 = vsel %vm32_vm0, %v1695_v11, 0.0 }
0x11c0   :  { %2045 = vmatpush3.bf16.msra.mxu0 %v2285_v19 }
0x1268   :  { %v1388_v16 = vpop.f32.mrb[12].mxu1 }
0x1269   :  { %v1933_v9 = vpop.f32.mrb[13].mxu1 }
0x128e   :  { %v1315_v20 = vpop.f32.mrb[12].mxu0 }
0x128f   :  { %v1389_v12 = vadd.f32 %v1388_v16, %v1315_v20  ;;  %v1922_v13 = vpop.f32.mrb[13].mxu0 }
0x1291   :  { %v1392_v14 = vadd.f32 %v2325_v33, %v1389_v12 }
0x1293   :  { %2122 = vtanh.f32 %v1392_v14  ;;  %v1693_v10 = vmul.f32 -1.442695, %v1392_v14 }
0x1295   :  { %2124 = vpow2.f32 %v1693_v10 }
0x129d   :  { %v2123_v17 = vpop.eup %2122 }
0x129e   :  { %1402 = vrot.lane.b32.xlu1 %v2123_v17, %s2191_s25 }
0x129f   :  { %v2125_v19 = vpop.eup %2124 }
0x12a0   :  { %v1396_v18 = vadd.f32 1.0, %v2125_v19 }
0x12a2   :  { %2126 = vrcp.f32 %v1396_v18 }
0x12ac   :  { %v2127_v21 = vpop.eup %2126 }
0x12ad   :  { %v1400_v24 = vmul.f32 %v2127_v21, %v1217_v56 }
0x12c2   :  { %1426 = vadd.xlane.f32.xlu1 %v1425_v15 }
0x1310   :  { %v1403_v22 = vpop.permute.xlu1 %1402 }
0x1311   :  { %v1405_v23 = vmul.f32 %v2127_v21, %v1403_v22 }
0x1313   :  { %1407 = vrot.lane.b32.xlu0 %v1405_v23, %s2192_s26 }
0x134f   :  { %v1427_v30 = vpop.xlane.xlu1 %1426 }
0x1350   :  { %v1428_v31 = vmul.f32 0.03125, %v1427_v30 }
0x1352   :  { %v1429_v32 = vsub.f32 %v1695_v11, %v1428_v31 }
0x1354   :  { %v1430_v34 = vmul.f32 %v1429_v32, %v1429_v32 }
0x1356   :  { %v1431_v35 = vsel %vm32_vm0, %v1430_v34, 0.0 }
0x1385   :  { %v1408_v25 = vpop.permute.xlu0 %1407 }
0x1386   :  { %v1410_v27 = vadd.f32 %v1408_v25, %v1400_v24 }
0x1388   :  { %2128 = vtanh.f32 %v1410_v27 }
0x1392   :  { %v2129_v29 = vpop.eup %2128 }
0x1393   :  { %1413 = vrot.lane.b32.xlu0 %v2129_v29, %s2191_s25 }
0x13b2   :  { %1432 = vadd.xlane.f32.xlu0 %v1431_v35 }
0x1405   :  { %v1414_v36 = vpop.permute.xlu0 %1413 }
0x1406   :  { %v1416_v37 = vmul.f32 %v2127_v21, %v1414_v36 }
0x1408   :  { %1418 = vrot.lane.b32.xlu1 %v1416_v37, %s2192_s26 }
0x143f   :  { %v1433_v38 = vpop.xlane.xlu0 %1432 }
0x1440   :  { %v1434_v39 = vmul.f32 0.03125, %v1433_v38 }
0x1442   :  { %v1435_v40 = vadd.f32 1e-12, %v1434_v39 }
0x1444   :  { %2130 = vrsqrt.f32 %v1435_v40 }
0x144e   :  { %v2131_v41 = vpop.eup %2130 }
0x144f   :  { %v1437_v42 = vmul.f32 %v2131_v41, %v1429_v32 }
0x1451   :  { %v1438_v43 = vmul.f32 %v2306_v26, %v1437_v42 }
0x1453   :  { %v1439_v44 = vadd.f32 %v2311_v28, %v1438_v43 }
0x1455   :  { %1954 = vmatmul.mubr.msk.f32.vlgmr.msra.gmra.mrb[14].mxu1 %vm78_vm2, %v1439_v44 }
0x147a   :  { %v1419_v45 = vpop.permute.xlu1 %1418 }
0x147b   :  { %1694 = vst.msk [vmem:[%s2567_s6 + $0xc] sm:$0x3] %vm32_vm0, %v1419_v45  ;;  %1943 = vmatmul.mubr.msk.f32.vlgmr.msra.gmra.mrb[14].mxu0 %vm78_vm2, %v1419_v45 }
0x1528   :  { %v1581_v46 = vpop.f32.mrb[14].mxu1 }
0x1529   :  { %v1955_v47 = vpop.f32.mrb[15].mxu1 }
0x154e   :  { %v1508_v48 = vpop.f32.mrb[14].mxu0 }
0x154f   :  { %v1582_v49 = vadd.f32 %v1581_v46, %v1508_v48  ;;  %v1944_v50 = vpop.f32.mrb[15].mxu0 }
0x1551   :  { %v1585_v51 = vadd.f32 %v2325_v33, %v1582_v49 }
0x1553   :  { %2132 = vtanh.f32 %v1585_v51  ;;  %v1698_v28 = vmul.f32 -1.442695, %v1585_v51 }
0x1555   :  { %2134 = vpow2.f32 %v1698_v28 }
0x155d   :  { %v2133_v26 = vpop.eup %2132 }
0x155e   :  { %1595 = vrot.lane.b32.xlu1 %v2133_v26, %s2191_s25 }
0x155f   :  { %v2135_v52 = vpop.eup %2134 }
0x1560   :  { %v1589_v53 = vadd.f32 1.0, %v2135_v52 }
0x1562   :  { %2136 = vrcp.f32 %v1589_v53 }
0x156c   :  { %v2137_v54 = vpop.eup %2136 }
0x156d   :  { %v1593_v57 = vmul.f32 %v2137_v54, %v1410_v27 }
0x15d0   :  { %v1596_v55 = vpop.permute.xlu1 %1595 }
0x15d1   :  { %v1598_v56 = vmul.f32 %v2137_v54, %v1596_v55 }
0x15d3   :  { %1600 = vrot.lane.b32.xlu0 %v1598_v56, %s2192_s26 }
0x1645   :  { %v1601_v58 = vpop.permute.xlu0 %1600 }
0x1646   :  { %v1603_v59 = vadd.f32 %v1601_v58, %v1593_v57 }
0x1648   :  { %2138 = vtanh.f32 %v1603_v59 }
0x1652   :  { %v2139_v60 = vpop.eup %2138 }
0x1653   :  { %1606 = vrot.lane.b32.xlu1 %v2139_v60, %s2191_s25  ;;  %s2140_s25 = scalar_lea.vmem %s1636_s30, 32 }
0x1654   :  { %p2141_p0 = scmp.ne.s32.totalorder %s1636_s30, %s2140_s25  ;;  %p2146_p2 = scmp.lt.s32.totalorder %s2140_s25, %s2140_s25 }
0x1656   :  { %p2147_p3 = por %p2146_p2, %p2145_p1 }
0x1658   :  { %p2148_p4 = pnand %p2147_p3, %p2141_p0 }
0x16c5   :  { %v1607_v33 = vpop.permute.xlu1 %1606 }
0x16c6   :  { %v1609_v61 = vmul.f32 %v2137_v54, %v1607_v33 }
0x16c8   :  { %1611 = vrot.lane.b32.xlu1 %v1609_v61, %s2192_s26 }
0x16cc   :  { %1618 = vrot.lane.b32.xlu1 %v1603_v59, %s2193_s5 }
0x173a   :  { %v1612_v62 = vpop.permute.xlu1 %1611 }
0x173b   :  { %1699 = vst.msk [vmem:[%s2567_s6 + $0xe] sm:$0x3] %vm32_vm0, %v1612_v62  ;;  %1616 = vst.msk [vmem:[#allocation2] sm:$0x3] %vm32_vm0, %v1612_v62 }
0x173c   :  { %1625 = vst.msk [vmem:[#allocation4] sm:$0x3] %vm32_vm0, %v1612_v62 }
0x173d   :  { %2151 = shalt.err (!%p2148_p4)
}
0x173e   :  { %s2152_s14 = scalar_lea.hbm %s2568_s7, 32 }
0x173f   :  { %p2153_p5 = scmp.ne.s32.totalorder %s2568_s7, %s2152_s14  ;;  %p2156_p6 = scmp.lt.u32.totalorder %s2152_s14, %s2568_s7 }
0x1741   :  { %p2158_p7 = pnand %p2156_p6, %p2153_p5 }
0x1743   :  { %2161 = shalt.err (!%p2158_p7)
}
0x1744   :  { %1638 = dma.vmem_to_hbm [thread:$0]  %s1636_s30, 32, %s2568_s7, [#allocation5]   ;;  %v1619_v63 = vpop.permute.xlu1 %1618 }
0x1745   :  { %1621 = vst.msk [vmem:[#allocation3] sm:$0x3] %vm32_vm0, %v1619_v63  ;;  %1626 = vst.msk [vmem:[#allocation6] sm:$0x3] %vm32_vm0, %v1619_v63  ;;  %s2162_s20 = scalar_lea.vmem %s1646_s10, 32  ;;  %p2167_p9 = scmp.lt.s32.totalorder %s1646_s10, %s1646_s10 }
0x1746   :  { %p2163_p8 = scmp.ne.s32.totalorder %s1646_s10, %s2162_s20  ;;  %p2168_p10 = scmp.lt.s32.totalorder %s2162_s20, %s2162_s20 }
0x1748   :  { %p2169_p11 = por %p2168_p10, %p2167_p9 }
0x174a   :  { %p2170_p12 = pnand %p2169_p11, %p2163_p8 }
0x174c   :  { %2173 = shalt.err (!%p2170_p12)
}
0x174d   :  { %s2174_s3 = scalar_lea.hbm %s2569_s8, 32 }
0x174e   :  { %p2175_p13 = scmp.ne.s32.totalorder %s2569_s8, %s2174_s3  ;;  %p2178_p0 = scmp.lt.u32.totalorder %s2174_s3, %s2569_s8 }
0x1750   :  { %p2180_p1 = pnand %p2178_p0, %p2175_p13 }
0x1752   :  { %2183 = shalt.err (!%p2180_p1)
}
0x1753   :  { %1648 = dma.vmem_to_hbm [thread:$0]  %s1646_s10, 32, %s2569_s8, [#allocation7]  }
0x1754   :  { %2184 = dma.done.wait [#allocation5], 32  }
0x1755   :  { %2185 = vsyncadd [#allocation5], 4294967264 }
0x1756   :  { %2186 = dma.done.wait [#allocation7], 32  }
0x1757   :  { %2187 = vsyncadd [#allocation7], 4294967264 }
0x1758   :  { %1657 = vsyncpa [#allocation5], 1 }
0x1759   :  { %1658 = vsyncpa [#allocation7], 1 }

// kernel: sharnn_model_forward.11
= control target key start
LH: loop header
LB: loop body
LE: loop exit
PB: predicated region body
PF: predicated region fallthrough
CT: control target
= control target key end

     0   :  { %16 = vsyncpa [#allocation3], 0  ;;  %vm40_vm0 = vcmask 261120   ;;  %s504_s0 = inlined_call_operand.vmem [shape: f32[16,32], index: 0, kind: input, shape index: {}]   ;;  %s505_s1 = inlined_call_operand.vmem [shape: f32[1,32], index: 1, kind: input, shape index: {}]   ;;  %s506_s2 = inlined_call_operand.vmem [shape: f32[1,32], index: 2, kind: input, shape index: {}]   ;;  %s507_s3 = inlined_call_operand.vmem [shape: f32[1,32], index: 3, kind: input, shape index: {}]   ;;  %s508_s4 = inlined_call_operand.vmem [shape: f32[1,32], index: 4, kind: input, shape index: {}]   ;;  %s509_s5 = inlined_call_operand.vmem [shape: f32[1,32], index: 5, kind: input, shape index: {}]   ;;  %s510_s6 = inlined_call_operand.vmem [shape: f32[1,32], index: 6, kind: input, shape index: {}]   ;;  %s511_s7 = inlined_call_operand.vmem [shape: f32[32,32], index: 7, kind: input, shape index: {}]   ;;  %s512_s8 = inlined_call_operand.vmem [shape: f32[1,32], index: 8, kind: input, shape index: {}]   ;;  %s513_s9 = inlined_call_operand.hbm [shape: f32[16,32], index: 9, kind: output, shape index: {0}]   ;;  %s514_s10 = inlined_call_operand.hbm [shape: f32[16,32], index: 10, kind: output, shape index: {1}]  }
   0x1   :  { %v36_v0 = vld [vmem:[%s504_s0] sm:$0xff]  ;;  %v37_v1 = vld [vmem:[%s504_s0 + $0x8] sm:$0xff] }
   0x2   :  { %17 = vsyncpa [#allocation5], 0  ;;  %v41_v2 = vsel %vm40_vm0, %v36_v0, 0.0  ;;  %v44_v3 = vsel %vm40_vm0, %v37_v1, 0.0  ;;  %v90_v14 = vld [vmem:[%s511_s7] sm:$0xff]  ;;  %v91_v15 = vld [vmem:[%s511_s7 + $0x8] sm:$0xff] }
   0x3   :  { %42 = vadd.xlane.f32.xlu0 %v41_v2  ;;  %v92_v16 = vld [vmem:[%s511_s7 + $0x10] sm:$0xff]  ;;  %v294_v17 = vpack.c.bf16 %v91_v15, %v90_v14  ;;  %v93_v18 = vld [vmem:[%s511_s7 + $0x18] sm:$0xff]  ;;  %v270_v27 = vld [vmem:[%s507_s3] ss:$0 sm:$0xff]  ;;  %s366_s3 = smov [#allocation4]  }
   0x4   :  { %v298_v19 = vpack.c.bf16 %v93_v18, %v92_v16  ;;  %v266_v28 = vld [vmem:[%s509_s5] ss:$0 sm:$0xff] }
   0x5   :  { %295 = vmatprep.subr.bf16.mxu0 %v294_v17  ;;  %v271_v30 = vld [vmem:[%s508_s4] ss:$0 sm:$0xff]  ;;  %s251_s4 = sshll.u32 %s366_s3, 4  ;;  %s252_s4 = int_to_ptr.vmem [resolvable:$true] %s251_s4 }
   0x6   :  { %297 = vmatpush3.bf16.msra.mxu0 %v294_v17  ;;  %v267_v31 = vld [vmem:[%s510_s6] ss:$0 sm:$0xff]  ;;  %s318_s5 = scalar_lea.vmem %s252_s4, 256  ;;  %p323_p1 = scmp.lt.s32.totalorder %s252_s4, %s252_s4 }
   0x7   :  { %45 = vadd.xlane.f32.xlu0 %v44_v3  ;;  %299 = vmatprep.subr.bf16.mxu0 %v298_v19  ;;  %p319_p0 = scmp.ne.s32.totalorder %s252_s4, %s318_s5  ;;  %p324_p2 = scmp.lt.s32.totalorder %s318_s5, %s318_s5 }
   0x9   :  { %p325_p3 = por %p324_p2, %p323_p1 }
   0xa   :  { %301 = vmatpush3.bf16.msra.mxu0 %v298_v19 }
   0xb   :  { %p326_p4 = pnand %p325_p3, %p319_p0 }
  0x90   :  { %v43_v4 = vpop.xlane.xlu0 %42 }
  0x91   :  { %v48_v5 = vmul.f32 0.03125, %v43_v4 }
  0x93   :  { %v50_v6 = vsub.f32 %v36_v0, %v48_v5 }
  0x94   :  { %v46_v7 = vpop.xlane.xlu0 %45 }
  0x95   :  { %v49_v8 = vmul.f32 0.03125, %v46_v7  ;;  %v52_v9 = vmul.f32 %v50_v6, %v50_v6 }
  0x97   :  { %v51_v10 = vsub.f32 %v37_v1, %v49_v8  ;;  %v54_v11 = vsel %vm40_vm0, %v52_v9, 0.0 }
  0x98   :  { %55 = vadd.xlane.f32.xlu1 %v54_v11 }
  0x99   :  { %v53_v12 = vmul.f32 %v51_v10, %v51_v10 }
  0x9b   :  { %v57_v13 = vsel %vm40_vm0, %v53_v12, 0.0 }
  0x9c   :  { %58 = vadd.xlane.f32.xlu1 %v57_v13 }
 0x125   :  { %v56_v20 = vpop.xlane.xlu1 %55 }
 0x126   :  { %v60_v21 = vmul.f32 0.03125, %v56_v20 }
 0x128   :  { %v62_v22 = vadd.f32 1e-12, %v60_v21 }
 0x129   :  { %v59_v23 = vpop.xlane.xlu1 %58 }
 0x12a   :  { %306 = vrsqrt.f32 %v62_v22  ;;  %v61_v24 = vmul.f32 0.03125, %v59_v23 }
 0x12c   :  { %v63_v25 = vadd.f32 1e-12, %v61_v24 }
 0x12e   :  { %308 = vrsqrt.f32 %v63_v25 }
 0x134   :  { %v307_v26 = vpop.eup %306 }
 0x135   :  { %v66_v29 = vmul.f32 %v307_v26, %v50_v6 }
 0x137   :  { %v117_v32 = vmul.f32 %v270_v27, %v66_v29  ;;  %v74_v33 = vmul.f32 %v266_v28, %v66_v29 }
 0x138   :  { %v309_v34 = vpop.eup %308 }
 0x139   :  { %v67_v35 = vmul.f32 %v309_v34, %v51_v10  ;;  %v125_v36 = vadd.f32 %v271_v30, %v117_v32  ;;  %v82_v37 = vadd.f32 %v267_v31, %v74_v33 }
 0x13b   :  { %v118_v38 = vmul.f32 %v270_v27, %v67_v35  ;;  %291 = vmatprep.mubr.msk.f32.mxu0 %vm40_vm0, %v125_v36  ;;  %v75_v39 = vmul.f32 %v266_v28, %v67_v35  ;;  %84 = vst.msk [vmem:[#allocation4] sm:$0xff] %vm40_vm0, %v82_v37 }
 0x13d   :  { %v126_v40 = vadd.f32 %v271_v30, %v118_v38  ;;  %v83_v41 = vadd.f32 %v267_v31, %v75_v39 }
 0x13f   :  { %292 = vmatmul.mubr.msk.f32.vlgmr.msra.gmra.mrb[0].mxu0 %vm40_vm0, %v126_v40  ;;  %85 = vst.msk [vmem:[#allocation4 + $0x8] sm:$0xff] %vm40_vm0, %v83_v41 }
 0x140   :  { %329 = shalt.err (!%p326_p4)
}
 0x141   :  { %s330_s12 = scalar_lea.hbm %s514_s10, 256 }
 0x142   :  { %p331_p5 = scmp.ne.s32.totalorder %s514_s10, %s330_s12  ;;  %p334_p6 = scmp.lt.u32.totalorder %s330_s12, %s514_s10 }
 0x144   :  { %p336_p7 = pnand %p334_p6, %p331_p5 }
 0x146   :  { %339 = shalt.err (!%p336_p7)
}
 0x147   :  { %s367_s0 = smov 128   ;;  %s368_s17 = smov 8   ;;  %v272_v42 = vld [vmem:[%s512_s8] ss:$0 sm:$0xff] }
 0x148   :  { %257 = dma.vmem_to_hbm [thread:$0]  %s252_s4, 256, %s514_s10, [#allocation5], %s367_s0, %s367_s0, %s368_s17  }
 0x149   :  { %v268_v55 = vld [vmem:[%s505_s1] ss:$0 sm:$0xff]  ;;  %s369_s24 = smov [#allocation2]  }
 0x14a   :  { %v102_v56 = vmul.f32 %v268_v55, %v67_v35  ;;  %v101_v57 = vmul.f32 %v268_v55, %v66_v29  ;;  %v269_v58 = vld [vmem:[%s506_s2] ss:$0 sm:$0xff]  ;;  %s239_s25 = sshll.u32 %s369_s24, 4  ;;  %s240_s25 = int_to_ptr.vmem [resolvable:$true] %s239_s25 }
 0x14b   :  { %s340_s1 = scalar_lea.vmem %s240_s25, 256  ;;  %p345_p9 = scmp.lt.s32.totalorder %s240_s25, %s240_s25 }
 0x14c   :  { %v110_v61 = vadd.f32 %v269_v58, %v102_v56  ;;  %v109_v63 = vadd.f32 %v269_v58, %v101_v57  ;;  %p341_p8 = scmp.ne.s32.totalorder %s240_s25, %s340_s1  ;;  %p346_p10 = scmp.lt.s32.totalorder %s340_s1, %s340_s1 }
 0x14e   :  { %p347_p11 = por %p346_p10, %p345_p9 }
 0x150   :  { %p348_p12 = pnand %p347_p11, %p341_p8 }
 0x212   :  { %v293_v43 = vpop.f32.mrb[0].mxu0 }
 0x213   :  { %v211_v44 = vadd.f32 %v293_v43, %v272_v42  ;;  %v205_v45 = vpop.f32.mrb[1].mxu0 }
 0x214   :  { %v206_v46 = vadd.f32 %v272_v42, %v205_v45 }
 0x215   :  { %v276_v47 = vmul.f32 -1.702, %v211_v44 }
 0x216   :  { %v275_v48 = vmul.f32 -1.702, %v206_v46 }
 0x217   :  { %v220_v49 = vmul.f32 1.442695, %v276_v47 }
 0x218   :  { %v218_v50 = vmul.f32 1.442695, %v275_v48 }
 0x219   :  { %310 = vpow2.f32 %v220_v49 }
 0x21a   :  { %312 = vpow2.f32 %v218_v50 }
 0x223   :  { %v311_v51 = vpop.eup %310 }
 0x224   :  { %v313_v52 = vpop.eup %312  ;;  %v223_v53 = vadd.f32 1.0, %v311_v51 }
 0x225   :  { %v222_v54 = vadd.f32 1.0, %v313_v52 }
 0x226   :  { %314 = vrcp.f32 %v223_v53 }
 0x227   :  { %316 = vrcp.f32 %v222_v54 }
 0x230   :  { %v315_v59 = vpop.eup %314 }
 0x231   :  { %v317_v60 = vpop.eup %316  ;;  %v229_v62 = vmul.f32 %v315_v59, %v211_v44 }
 0x232   :  { %v228_v0 = vmul.f32 %v317_v60, %v206_v46 }
 0x233   :  { %v231_v1 = vadd.f32 %v229_v62, %v110_v61 }
 0x234   :  { %v230_v2 = vadd.f32 %v228_v0, %v109_v63 }
 0x235   :  { %233 = vst.msk [vmem:[#allocation2 + $0x8] sm:$0xff] %vm40_vm0, %v231_v1 }
 0x236   :  { %232 = vst.msk [vmem:[#allocation2] sm:$0xff] %vm40_vm0, %v230_v2 }
 0x237   :  { %351 = shalt.err (!%p348_p12)
}
 0x238   :  { %s352_s7 = scalar_lea.hbm %s513_s9, 256 }
 0x239   :  { %p353_p13 = scmp.ne.s32.totalorder %s513_s9, %s352_s7  ;;  %p356_p0 = scmp.lt.u32.totalorder %s352_s7, %s513_s9 }
 0x23b   :  { %p358_p1 = pnand %p356_p0, %p353_p13 }
 0x23d   :  { %361 = shalt.err (!%p358_p1)
}
 0x23e   :  { %245 = dma.vmem_to_hbm [thread:$0]  %s240_s25, 256, %s513_s9, [#allocation3], %s367_s0, %s367_s0, %s368_s17  }
 0x23f   :  { %362 = dma.done.wait [#allocation3], 256  }
 0x240   :  { %363 = vsyncadd [#allocation3], 4294967040 }
 0x241   :  { %364 = dma.done.wait [#allocation5], 256  }
 0x242   :  { %365 = vsyncadd [#allocation5], 4294967040 }
 0x243   :  { %264 = vsyncpa [#allocation3], 1 }
 0x244   :  { %265 = vsyncpa [#allocation5], 1 }

</bundles_post_ra>
